<compile_context>
chip_gen: v6e
topology: v6e:2x2x1
jax: 0.10.0
libtpu: 0.0.40
codegen_flags: <defaults>
</compile_context>

<pallas_src>
import math
from functools import partial

import jax
import jax.numpy as jnp
from jax import lax
from jax.experimental import pallas as pl
from jax.experimental.pallas import tpu as pltpu


# ----------------------------------------------------------------------------
# Kernel
# ----------------------------------------------------------------------------
def _basic_res_block_kernel(x_ref, w1_ref, b1_ref, w2_ref, b2_ref, o_ref,
                            xpad_ref, midpad_ref, patch_ref,
                            *, Nb, H, W, Cin, Cout, BH):
    # x_ref:      (Nb, H, W, Cin)   f32   unpadded input block (also residual)
    # w1_ref:     (9*Cin, Cout)     bf16  BN1-scale-folded conv1 weights (im2col)
    # b1_ref:     (1, Cout)         f32   BN1 bias
    # w2_ref:     (9*Cout, Cout)    bf16  BN2-scale-folded conv2 weights (im2col)
    # b2_ref:     (1, Cout)         f32   BN2 bias
    # o_ref:      (Nb, H, W, Cout)  f32   output block
    # xpad_ref:   (Nb, H+2, W+2, Cin)  bf16  zero-halo padded input scratch
    # midpad_ref: (Nb, H+2, W+2, Cout) bf16  zero-halo padded intermediate
    # patch_ref:  (Nb, BH, W, 9*Cmax)  bf16  im2col patch scratch for ONE band
    n_bands = H // BH

    def _zero_halo(ref, C):
        # Only the 1-pixel perimeter needs zeros; the interior is fully
        # rewritten every grid step.  Per-step (cheap, perimeter-only)
        # re-zeroing keeps correctness under megacore grid sharding.
        zrow = jnp.zeros((Nb, 1, W + 2, C), jnp.bfloat16)
        zcol = jnp.zeros((Nb, H, 1, C), jnp.bfloat16)
        ref[:, 0:1, :, :] = zrow
        ref[:, H + 1:H + 2, :, :] = zrow
        ref[:, 1:H + 1, 0:1, :] = zcol
        ref[:, 1:H + 1, W + 1:W + 2, :] = zcol

    _zero_halo(xpad_ref, Cin)
    _zero_halo(midpad_ref, Cout)

    # Single activation stream: x_ref is conv1's input AND the residual.
    # One bf16 interior store (≈1/9 of the patch store traffic).
    xpad_ref[:, 1:H + 1, 1:W + 1, :] = x_ref[...].astype(jnp.bfloat16)

    # Loop-invariant operands, loaded once.
    w1 = w1_ref[...]
    b1 = b1_ref[...]
    w2 = w2_ref[...]
    b2 = b2_ref[...]

    def _conv_band(src_ref, C, w, r0):
        # Build the (Nb*BH*W, 9*C) im2col LHS for one band of output rows,
        # then one fat MXU matmul (bf16 x bf16 -> f32 accumulate).
        for kh in range(3):
            for kw in range(3):
                t = kh * 3 + kw
                patch_ref[:, :, :, t * C:(t + 1) * C] = (
                    src_ref[:, pl.ds(r0 + kh, BH), kw:kw + W, :])
        p = patch_ref[:, :, :, :9 * C].reshape(Nb * BH * W, 9 * C)
        return jnp.dot(p, w, preferred_element_type=jnp.float32)

    # ---- conv1 (BN1 scale folded into weights) + bias + ReLU, band by band --
    def conv1_body(band, carry):
        r0 = band * BH
        h1 = jnp.maximum(_conv_band(xpad_ref, Cin, w1, r0) + b1, 0.0)
        midpad_ref[:, pl.ds(r0 + 1, BH), 1:W + 1, :] = (
            h1.reshape(Nb, BH, W, Cout).astype(jnp.bfloat16))
        return carry

    lax.fori_loop(0, n_bands, conv1_body, 0)

    # ---- conv2 (BN2 scale folded) + bias + residual + ReLU, band by band ----
    # (conv2 of band b reads midpad rows from neighbouring bands, so the conv1
    #  loop above must finish first; two sequential loops keep this correct.)
    def conv2_body(band, carry):
        r0 = band * BH
        h2 = _conv_band(midpad_ref, Cout, w2, r0) + b2
        xres = x_ref[:, pl.ds(r0, BH), :, :]                     # f32 residual
        o_ref[:, pl.ds(r0, BH), :, :] = jnp.maximum(
            h2.reshape(Nb, BH, W, Cout) + xres, 0.0)
        return carry

    lax.fori_loop(0, n_bands, conv2_body, 0)


# ----------------------------------------------------------------------------
# VMEM budgeting / tiling heuristics
# ----------------------------------------------------------------------------
def _padded_bytes(shape, itemsize):
    """VMEM footprint of one buffer, accounting for (sublane, 128) tiling."""
    *lead, s, l = shape
    sub = 8 * (4 // itemsize)          # 8 sublanes for f32, 16 for bf16
    s_p = -(-s // sub) * sub
    l_p = -(-l // 128) * 128
    return math.prod(lead) * s_p * l_p * itemsize if lead else s_p * l_p * itemsize


def _block_vmem_bytes(Nb, H, W, Cin, Cout, BH):
    Cmax = max(Cin, Cout)
    b = 0
    b += 2 * _padded_bytes((Nb, H, W, Cin), 4)          # double-buffered input
    b += 2 * _padded_bytes((Nb, H, W, Cout), 4)         # double-buffered output
    b += _padded_bytes((Nb, H + 2, W + 2, Cin), 2)      # xpad (bf16)
    b += _padded_bytes((Nb, H + 2, W + 2, Cout), 2)     # midpad (bf16)
    b += _padded_bytes((Nb, BH, W, 9 * Cmax), 2)        # im2col band patch
    b += 2 * (_padded_bytes((9 * Cin, Cout), 2)
              + _padded_bytes((9 * Cout, Cout), 2)
              + 2 * _padded_bytes((1, Cout), 4))        # weights + biases
    return b


def _vmem_limit_bytes():
    # ~96 MiB on 128 MiB chips (v5e/v6e), ~48 MiB on 64 MiB chips (v7x).
    try:
        cap = getattr(pltpu.get_tpu_info(), "vmem_capacity_bytes", 64 << 20)
    except Exception:  # no TPU info available -> conservative (v7x) default
        cap = 64 << 20
    return max(32 << 20, int(cap * 0.75))


def _pick_band(H):
    """Largest divisor of H that is <= 8 (row-band height for im2col)."""
    for bh in range(min(H, 8), 0, -1):
        if H % bh == 0:
            return bh
    return H


def _pick_block_n(N, H, W, Cin, Cout, BH, budget):
    """Largest divisor of N fitting the VMEM budget, preferring grid >= 2."""
    divisors = [d for d in range(N, 0, -1) if N % d == 0]
    fitting = [d for d in divisors
               if _block_vmem_bytes(d, H, W, Cin, Cout, BH) <= budget]
    if not fitting:
        return 1
    for d in fitting:                  # largest block that still leaves >= 2 steps
        if N // d >= 2:
            return d
    return fitting[0]                  # N == 1 (single image)


# ----------------------------------------------------------------------------
# Wrappers
# ----------------------------------------------------------------------------
def basic_res_block(x_nhwc, w1, s1, b1, w2, s2, b2, *, block_n=None, band_h=None):
    """BasicResBlock forward, NHWC layout (stride=1, no downsample, Cin==Cout).

    x_nhwc: (N, H, W, C) f32; w1/w2: HWIO (3, 3, C, C); s*/b*: folded BN
    scale/bias (from running stats, eval mode).  Returns NHWC f32.
    """
    N, H, W, Cin = x_nhwc.shape
    Cout = w1.shape[-1]
    assert Cin == Cout, "identity path requires in_channels == out_channels"
    assert w1.shape == (3, 3, Cin, Cout) and w2.shape == (3, 3, Cout, Cout)

    BH = band_h if band_h is not None else _pick_band(H)
    assert H % BH == 0

    vmem_limit = _vmem_limit_bytes()
    Nb = block_n if block_n is not None else _pick_block_n(
        N, H, W, Cin, Cout, BH, int(vmem_limit * 0.9))
    assert N % Nb == 0

    x = x_nhwc.astype(jnp.float32)

    # Fold BN scale into the conv weights ((x*w)*s == x*(w*s)), lay out for
    # im2col, and cast to bf16 for the MXU.  Biases stay f32.
    w1m = (w1.astype(jnp.float32) * s1.reshape(1, 1, 1, Cout)
           ).reshape(9 * Cin, Cout).astype(jnp.bfloat16)
    w2m = (w2.astype(jnp.float32) * s2.reshape(1, 1, 1, Cout)
           ).reshape(9 * Cout, Cout).astype(jnp.bfloat16)
    b1r = b1.reshape(1, Cout).astype(jnp.float32)
    b2r = b2.reshape(1, Cout).astype(jnp.float32)

    kernel = partial(_basic_res_block_kernel,
                     Nb=Nb, H=H, W=W, Cin=Cin, Cout=Cout, BH=BH)
    Cmax = max(Cin, Cout)

    return pl.pallas_call(
        kernel,
        out_shape=jax.ShapeDtypeStruct((N, H, W, Cout), jnp.float32),
        grid_spec=pltpu.PrefetchScalarGridSpec(
            num_scalar_prefetch=0,
            grid=(N // Nb,),
            in_specs=[
                pl.BlockSpec((Nb, H, W, Cin), lambda n: (n, 0, 0, 0)),
                pl.BlockSpec((9 * Cin, Cout), lambda n: (0, 0)),
                pl.BlockSpec((1, Cout), lambda n: (0, 0)),
                pl.BlockSpec((9 * Cout, Cout), lambda n: (0, 0)),
                pl.BlockSpec((1, Cout), lambda n: (0, 0)),
            ],
            out_specs=pl.BlockSpec((Nb, H, W, Cout), lambda n: (n, 0, 0, 0)),
            scratch_shapes=[
                pltpu.VMEM((Nb, H + 2, W + 2, Cin), jnp.bfloat16),
                pltpu.VMEM((Nb, H + 2, W + 2, Cout), jnp.bfloat16),
                pltpu.VMEM((Nb, BH, W, 9 * Cmax), jnp.bfloat16),
            ],
        ),
        compiler_params=pltpu.CompilerParams(
            dimension_semantics=("parallel",),
            vmem_limit_bytes=vmem_limit,
        ),
    )(x, w1m, b1r, w2m, b2r)


def basic_res_block_nchw(x_nchw, w1, s1, b1, w2, s2, b2, **kwargs):
    """Convenience adapter matching the PyTorch module's NCHW layout.

    NOTE: the two transposes are full extra HBM round-trips of the activation
    tensor; prefer the NHWC entry point `basic_res_block` on the hot path.
    """
    y = basic_res_block(jnp.transpose(x_nchw, (0, 2, 3, 1)),
                        w1, s1, b1, w2, s2, b2, **kwargs)
    return jnp.transpose(y, (0, 3, 1, 2))


# ----------------------------------------------------------------------------
# Reference + demo
# ----------------------------------------------------------------------------
def _reference_forward_nhwc(x, w1, s1, b1, w2, s2, b2):
    """Pure-JAX reference (lax conv) matching the PyTorch forward in eval mode."""
    x = x.astype(jnp.float32)
    dn = jax.lax.conv_dimension_numbers(x.shape, w1.shape,
                                        ("NHWC", "HWIO", "NHWC"))
    y = jax.lax.conv_general_dilated(x, w1, (1, 1), "SAME",
                                     dimension_numbers=dn)
    y = jnp.maximum(y * s1 + b1, 0.0)
    y = jax.lax.conv_general_dilated(y, w2, (1, 1), "SAME",
                                     dimension_numbers=dn)
    return jnp.maximum(y * s2 + b2 + x, 0.0)


def _fold_bn(gamma, beta, mean, var, eps=1e-5):
    scale = gamma / jnp.sqrt(var + eps)
    bias = beta - mean * scale
    return scale.reshape(1, -1), bias.reshape(1, -1)


if __name__ == "__main__":
    # BasicResBlock(in_channels=4, out_channels=4, stride=1, downsample=None)
    N, C, H, W = 2, 4, 16, 16
    key = jax.random.PRNGKey(0)
    ks = jax.random.split(key, 11)

    x = jax.random.normal(ks[0], (N, H, W, C), jnp.float32)      # NHWC

    # conv weights, HWIO layout
    w1 = jax.random.normal(ks[1], (3, 3, C, C), jnp.float32) * 0.2
    w2 = jax.random.normal(ks[2], (3, 3, C, C), jnp.float32) * 0.2

    # BatchNorm params (inference / running stats)
    g1 = 1.0 + 0.1 * jax.random.normal(ks[3], (C,), jnp.float32)
    be1 = 0.1 * jax.random.normal(ks[4], (C,), jnp.float32)
    m1 = 0.1 * jax.random.normal(ks[5], (C,), jnp.float32)
    v1 = jnp.abs(jax.random.normal(ks[6], (C,), jnp.float32)) + 0.5
    g2 = 1.0 + 0.1 * jax.random.normal(ks[7], (C,), jnp.float32)
    be2 = 0.1 * jax.random.normal(ks[8], (C,), jnp.float32)
    m2 = 0.1 * jax.random.normal(ks[9], (C,), jnp.float32)
    v2 = jnp.abs(jax.random.normal(ks[10], (C,), jnp.float32)) + 0.5

    s1, b1 = _fold_bn(g1, be1, m1, v1)
    s2, b2 = _fold_bn(g2, be2, m2, v2)

    # NHWC hot path.
    out = basic_res_block(x, w1, s1, b1, w2, s2, b2)
    out = jax.block_until_ready(out)

    ref = _reference_forward_nhwc(x, w1, s1, b1, w2, s2, b2)
    assert out.shape == (N, H, W, C)
    # bf16 matmul operands -> looser tolerance than the pure-f32 path.
    assert jnp.allclose(out, ref, atol=3e-2, rtol=3e-2), "mismatch vs reference"

    # NCHW adapter (PyTorch-module layout parity check).
    out_nchw = basic_res_block_nchw(jnp.transpose(x, (0, 3, 1, 2)),
                                    w1, s1, b1, w2, s2, b2)
    out_nchw = jax.block_until_ready(out_nchw)
    assert jnp.allclose(out_nchw, jnp.transpose(ref, (0, 3, 1, 2)),
                        atol=3e-2, rtol=3e-2), "NCHW adapter mismatch"

    print("KERNEL_OK")
</pallas_src>

<mosaic_0001>
module attributes {stable_mosaic.version = 11 : i64} {
  func.func @_basic_res_block_kernel(%arg0: i32, %arg1: memref<1x16x16x4xf32, #tpu.memory_space<vmem>>, %arg2: memref<36x4xbf16, #tpu.memory_space<vmem>>, %arg3: memref<1x4xf32, #tpu.memory_space<vmem>>, %arg4: memref<36x4xbf16, #tpu.memory_space<vmem>>, %arg5: memref<1x4xf32, #tpu.memory_space<vmem>>, %arg6: memref<1x16x16x4xf32, #tpu.memory_space<vmem>>, %arg7: memref<1x18x18x4xbf16, #tpu.memory_space<vmem>>, %arg8: memref<1x18x18x4xbf16, #tpu.memory_space<vmem>>, %arg9: memref<1x8x16x36xbf16, #tpu.memory_space<vmem>>) attributes {dimension_semantics = [#tpu.dimension_semantics<parallel>], iteration_bounds = array<i64: 2>, scalar_prefetch = 0 : i64, scratch_operands = 3 : i64, tpu.core_type = #tpu.core_type<tc>, window_params = [{transform_indices = @transform_0, window_bounds = array<i64: 1, 16, 16, 4>}, {pipeline_mode = #tpu.pipeline_mode<synchronous>, transform_indices = @transform_1, window_bounds = array<i64: 36, 4>}, {pipeline_mode = #tpu.pipeline_mode<synchronous>, transform_indices = @transform_2, window_bounds = array<i64: 1, 4>}, {pipeline_mode = #tpu.pipeline_mode<synchronous>, transform_indices = @transform_3, window_bounds = array<i64: 36, 4>}, {pipeline_mode = #tpu.pipeline_mode<synchronous>, transform_indices = @transform_4, window_bounds = array<i64: 1, 4>}, {transform_indices = @transform_5, window_bounds = array<i64: 1, 16, 16, 4>}]} {
    %cst = arith.constant 0.000000e+00 : bf16
    %0 = vector.broadcast %cst : bf16 to vector<1x1x18x4xbf16>
    %cst_0 = arith.constant 0.000000e+00 : bf16
    %1 = vector.broadcast %cst_0 : bf16 to vector<1x16x1x4xbf16>
    %c0 = arith.constant 0 : index
    %c0_1 = arith.constant 0 : index
    %c0_2 = arith.constant 0 : index
    %c0_3 = arith.constant 0 : index
    %2 = vector.load %arg7[%c0, %c0_1, %c0_2, %c0_3] : memref<1x18x18x4xbf16, #tpu.memory_space<vmem>>, vector<1x1x18x4xbf16>
    tpu.vector_store %arg7[%c0, %c0_1, %c0_2, %c0_3], %0 {strides = array<i32>} : memref<1x18x18x4xbf16, #tpu.memory_space<vmem>>, vector<1x1x18x4xbf16>,
    %c0_4 = arith.constant 0 : index
    %c17 = arith.constant 17 : index
    %c0_5 = arith.constant 0 : index
    %c0_6 = arith.constant 0 : index
    %3 = vector.load %arg7[%c0_4, %c17, %c0_5, %c0_6] : memref<1x18x18x4xbf16, #tpu.memory_space<vmem>>, vector<1x1x18x4xbf16>
    tpu.vector_store %arg7[%c0_4, %c17, %c0_5, %c0_6], %0 {strides = array<i32>} : memref<1x18x18x4xbf16, #tpu.memory_space<vmem>>, vector<1x1x18x4xbf16>,
    %c0_7 = arith.constant 0 : index
    %c1 = arith.constant 1 : index
    %c0_8 = arith.constant 0 : index
    %c0_9 = arith.constant 0 : index
    %4 = vector.load %arg7[%c0_7, %c1, %c0_8, %c0_9] : memref<1x18x18x4xbf16, #tpu.memory_space<vmem>>, vector<1x16x1x4xbf16>
    tpu.vector_store %arg7[%c0_7, %c1, %c0_8, %c0_9], %1 {strides = array<i32>} : memref<1x18x18x4xbf16, #tpu.memory_space<vmem>>, vector<1x16x1x4xbf16>,
    %c0_10 = arith.constant 0 : index
    %c1_11 = arith.constant 1 : index
    %c17_12 = arith.constant 17 : index
    %c0_13 = arith.constant 0 : index
    %5 = vector.load %arg7[%c0_10, %c1_11, %c17_12, %c0_13] : memref<1x18x18x4xbf16, #tpu.memory_space<vmem>>, vector<1x16x1x4xbf16>
    tpu.vector_store %arg7[%c0_10, %c1_11, %c17_12, %c0_13], %1 {strides = array<i32>} : memref<1x18x18x4xbf16, #tpu.memory_space<vmem>>, vector<1x16x1x4xbf16>,
    %cst_14 = arith.constant 0.000000e+00 : bf16
    %6 = vector.broadcast %cst_14 : bf16 to vector<1x1x18x4xbf16>
    %cst_15 = arith.constant 0.000000e+00 : bf16
    %7 = vector.broadcast %cst_15 : bf16 to vector<1x16x1x4xbf16>
    %c0_16 = arith.constant 0 : index
    %c0_17 = arith.constant 0 : index
    %c0_18 = arith.constant 0 : index
    %c0_19 = arith.constant 0 : index
    %8 = vector.load %arg8[%c0_16, %c0_17, %c0_18, %c0_19] : memref<1x18x18x4xbf16, #tpu.memory_space<vmem>>, vector<1x1x18x4xbf16>
    tpu.vector_store %arg8[%c0_16, %c0_17, %c0_18, %c0_19], %6 {strides = array<i32>} : memref<1x18x18x4xbf16, #tpu.memory_space<vmem>>, vector<1x1x18x4xbf16>,
    %c0_20 = arith.constant 0 : index
    %c17_21 = arith.constant 17 : index
    %c0_22 = arith.constant 0 : index
    %c0_23 = arith.constant 0 : index
    %9 = vector.load %arg8[%c0_20, %c17_21, %c0_22, %c0_23] : memref<1x18x18x4xbf16, #tpu.memory_space<vmem>>, vector<1x1x18x4xbf16>
    tpu.vector_store %arg8[%c0_20, %c17_21, %c0_22, %c0_23], %6 {strides = array<i32>} : memref<1x18x18x4xbf16, #tpu.memory_space<vmem>>, vector<1x1x18x4xbf16>,
    %c0_24 = arith.constant 0 : index
    %c1_25 = arith.constant 1 : index
    %c0_26 = arith.constant 0 : index
    %c0_27 = arith.constant 0 : index
    %10 = vector.load %arg8[%c0_24, %c1_25, %c0_26, %c0_27] : memref<1x18x18x4xbf16, #tpu.memory_space<vmem>>, vector<1x16x1x4xbf16>
    tpu.vector_store %arg8[%c0_24, %c1_25, %c0_26, %c0_27], %7 {strides = array<i32>} : memref<1x18x18x4xbf16, #tpu.memory_space<vmem>>, vector<1x16x1x4xbf16>,
    %c0_28 = arith.constant 0 : index
    %c1_29 = arith.constant 1 : index
    %c17_30 = arith.constant 17 : index
    %c0_31 = arith.constant 0 : index
    %11 = vector.load %arg8[%c0_28, %c1_29, %c17_30, %c0_31] : memref<1x18x18x4xbf16, #tpu.memory_space<vmem>>, vector<1x16x1x4xbf16>
    tpu.vector_store %arg8[%c0_28, %c1_29, %c17_30, %c0_31], %7 {strides = array<i32>} : memref<1x18x18x4xbf16, #tpu.memory_space<vmem>>, vector<1x16x1x4xbf16>,
    %c0_32 = arith.constant 0 : index
    %c0_33 = arith.constant 0 : index
    %c0_34 = arith.constant 0 : index
    %c0_35 = arith.constant 0 : index
    %12 = vector.load %arg1[%c0_32, %c0_33, %c0_34, %c0_35] : memref<1x16x16x4xf32, #tpu.memory_space<vmem>>, vector<1x16x16x4xf32>
    %13 = arith.truncf %12 : vector<1x16x16x4xf32> to vector<1x16x16x4xbf16>
    %c0_36 = arith.constant 0 : index
    %c1_37 = arith.constant 1 : index
    %c1_38 = arith.constant 1 : index
    %c0_39 = arith.constant 0 : index
    %14 = vector.load %arg7[%c0_36, %c1_37, %c1_38, %c0_39] : memref<1x18x18x4xbf16, #tpu.memory_space<vmem>>, vector<1x16x16x4xbf16>
    tpu.vector_store %arg7[%c0_36, %c1_37, %c1_38, %c0_39], %13 {strides = array<i32>} : memref<1x18x18x4xbf16, #tpu.memory_space<vmem>>, vector<1x16x16x4xbf16>,
    %c0_40 = arith.constant 0 : index
    %c0_41 = arith.constant 0 : index
    %15 = vector.load %arg2[%c0_40, %c0_41] : memref<36x4xbf16, #tpu.memory_space<vmem>>, vector<36x4xbf16>
    %c0_42 = arith.constant 0 : index
    %c0_43 = arith.constant 0 : index
    %16 = vector.load %arg3[%c0_42, %c0_43] : memref<1x4xf32, #tpu.memory_space<vmem>>, vector<1x4xf32>
    %c0_44 = arith.constant 0 : index
    %c0_45 = arith.constant 0 : index
    %17 = vector.load %arg4[%c0_44, %c0_45] : memref<36x4xbf16, #tpu.memory_space<vmem>>, vector<36x4xbf16>
    %c0_46 = arith.constant 0 : index
    %c0_47 = arith.constant 0 : index
    %18 = vector.load %arg5[%c0_46, %c0_47] : memref<1x4xf32, #tpu.memory_space<vmem>>, vector<1x4xf32>
    %c0_i32 = arith.constant 0 : i32
    %c2_i32 = arith.constant 2 : i32
    %19 = arith.addi %c0_i32, %c2_i32 : i32
    %c1_i32 = arith.constant 1 : i32
    scf.for %arg10 = %c0_i32 to %19 step %c1_i32  : i32 {
      %c8_i32 = arith.constant 8 : i32
      %21 = arith.muli %arg10, %c8_i32 : i32
      %c0_i32_53 = arith.constant 0 : i32
      %22 = arith.addi %21, %c0_i32_53 : i32
      %c0_54 = arith.constant 0 : index
      %23 = arith.index_cast %22 : i32 to index
      %c0_55 = arith.constant 0 : index
      %c0_56 = arith.constant 0 : index
      %24 = vector.load %arg7[%c0_54, %23, %c0_55, %c0_56] : memref<1x18x18x4xbf16, #tpu.memory_space<vmem>>, vector<1x8x16x4xbf16>
      %c0_57 = arith.constant 0 : index
      %c0_58 = arith.constant 0 : index
      %c0_59 = arith.constant 0 : index
      %c0_60 = arith.constant 0 : index
      %25 = vector.load %arg9[%c0_57, %c0_58, %c0_59, %c0_60] : memref<1x8x16x36xbf16, #tpu.memory_space<vmem>>, vector<1x8x16x4xbf16>
      tpu.vector_store %arg9[%c0_57, %c0_58, %c0_59, %c0_60], %24 {strides = array<i32>} : memref<1x8x16x36xbf16, #tpu.memory_space<vmem>>, vector<1x8x16x4xbf16>,
      %c0_i32_61 = arith.constant 0 : i32
      %26 = arith.addi %21, %c0_i32_61 : i32
      %c0_62 = arith.constant 0 : index
      %27 = arith.index_cast %26 : i32 to index
      %c1_63 = arith.constant 1 : index
      %c0_64 = arith.constant 0 : index
      %28 = vector.load %arg7[%c0_62, %27, %c1_63, %c0_64] : memref<1x18x18x4xbf16, #tpu.memory_space<vmem>>, vector<1x8x16x4xbf16>
      %c0_65 = arith.constant 0 : index
      %c0_66 = arith.constant 0 : index
      %c0_67 = arith.constant 0 : index
      %c4 = arith.constant 4 : index
      %29 = vector.load %arg9[%c0_65, %c0_66, %c0_67, %c4] : memref<1x8x16x36xbf16, #tpu.memory_space<vmem>>, vector<1x8x16x4xbf16>
      tpu.vector_store %arg9[%c0_65, %c0_66, %c0_67, %c4], %28 {strides = array<i32>} : memref<1x8x16x36xbf16, #tpu.memory_space<vmem>>, vector<1x8x16x4xbf16>,
      %c0_i32_68 = arith.constant 0 : i32
      %30 = arith.addi %21, %c0_i32_68 : i32
      %c0_69 = arith.constant 0 : index
      %31 = arith.index_cast %30 : i32 to index
      %c2 = arith.constant 2 : index
      %c0_70 = arith.constant 0 : index
      %32 = vector.load %arg7[%c0_69, %31, %c2, %c0_70] : memref<1x18x18x4xbf16, #tpu.memory_space<vmem>>, vector<1x8x16x4xbf16>
      %c0_71 = arith.constant 0 : index
      %c0_72 = arith.constant 0 : index
      %c0_73 = arith.constant 0 : index
      %c8 = arith.constant 8 : index
      %33 = vector.load %arg9[%c0_71, %c0_72, %c0_73, %c8] : memref<1x8x16x36xbf16, #tpu.memory_space<vmem>>, vector<1x8x16x4xbf16>
      tpu.vector_store %arg9[%c0_71, %c0_72, %c0_73, %c8], %32 {strides = array<i32>} : memref<1x8x16x36xbf16, #tpu.memory_space<vmem>>, vector<1x8x16x4xbf16>,
      %c1_i32_74 = arith.constant 1 : i32
      %34 = arith.addi %21, %c1_i32_74 : i32
      %c0_75 = arith.constant 0 : index
      %35 = arith.index_cast %34 : i32 to index
      %c0_76 = arith.constant 0 : index
      %c0_77 = arith.constant 0 : index
      %36 = vector.load %arg7[%c0_75, %35, %c0_76, %c0_77] : memref<1x18x18x4xbf16, #tpu.memory_space<vmem>>, vector<1x8x16x4xbf16>
      %c0_78 = arith.constant 0 : index
      %c0_79 = arith.constant 0 : index
      %c0_80 = arith.constant 0 : index
      %c12 = arith.constant 12 : index
      %37 = vector.load %arg9[%c0_78, %c0_79, %c0_80, %c12] : memref<1x8x16x36xbf16, #tpu.memory_space<vmem>>, vector<1x8x16x4xbf16>
      tpu.vector_store %arg9[%c0_78, %c0_79, %c0_80, %c12], %36 {strides = array<i32>} : memref<1x8x16x36xbf16, #tpu.memory_space<vmem>>, vector<1x8x16x4xbf16>,
      %c1_i32_81 = arith.constant 1 : i32
      %38 = arith.addi %21, %c1_i32_81 : i32
      %c0_82 = arith.constant 0 : index
      %39 = arith.index_cast %38 : i32 to index
      %c1_83 = arith.constant 1 : index
      %c0_84 = arith.constant 0 : index
      %40 = vector.load %arg7[%c0_82, %39, %c1_83, %c0_84] : memref<1x18x18x4xbf16, #tpu.memory_space<vmem>>, vector<1x8x16x4xbf16>
      %c0_85 = arith.constant 0 : index
      %c0_86 = arith.constant 0 : index
      %c0_87 = arith.constant 0 : index
      %c16 = arith.constant 16 : index
      %41 = vector.load %arg9[%c0_85, %c0_86, %c0_87, %c16] : memref<1x8x16x36xbf16, #tpu.memory_space<vmem>>, vector<1x8x16x4xbf16>
      tpu.vector_store %arg9[%c0_85, %c0_86, %c0_87, %c16], %40 {strides = array<i32>} : memref<1x8x16x36xbf16, #tpu.memory_space<vmem>>, vector<1x8x16x4xbf16>,
      %c1_i32_88 = arith.constant 1 : i32
      %42 = arith.addi %21, %c1_i32_88 : i32
      %c0_89 = arith.constant 0 : index
      %43 = arith.index_cast %42 : i32 to index
      %c2_90 = arith.constant 2 : index
      %c0_91 = arith.constant 0 : index
      %44 = vector.load %arg7[%c0_89, %43, %c2_90, %c0_91] : memref<1x18x18x4xbf16, #tpu.memory_space<vmem>>, vector<1x8x16x4xbf16>
      %c0_92 = arith.constant 0 : index
      %c0_93 = arith.constant 0 : index
      %c0_94 = arith.constant 0 : index
      %c20 = arith.constant 20 : index
      %45 = vector.load %arg9[%c0_92, %c0_93, %c0_94, %c20] : memref<1x8x16x36xbf16, #tpu.memory_space<vmem>>, vector<1x8x16x4xbf16>
      tpu.vector_store %arg9[%c0_92, %c0_93, %c0_94, %c20], %44 {strides = array<i32>} : memref<1x8x16x36xbf16, #tpu.memory_space<vmem>>, vector<1x8x16x4xbf16>,
      %c2_i32_95 = arith.constant 2 : i32
      %46 = arith.addi %21, %c2_i32_95 : i32
      %c0_96 = arith.constant 0 : index
      %47 = arith.index_cast %46 : i32 to index
      %c0_97 = arith.constant 0 : index
      %c0_98 = arith.constant 0 : index
      %48 = vector.load %arg7[%c0_96, %47, %c0_97, %c0_98] : memref<1x18x18x4xbf16, #tpu.memory_space<vmem>>, vector<1x8x16x4xbf16>
      %c0_99 = arith.constant 0 : index
      %c0_100 = arith.constant 0 : index
      %c0_101 = arith.constant 0 : index
      %c24 = arith.constant 24 : index
      %49 = vector.load %arg9[%c0_99, %c0_100, %c0_101, %c24] : memref<1x8x16x36xbf16, #tpu.memory_space<vmem>>, vector<1x8x16x4xbf16>
      tpu.vector_store %arg9[%c0_99, %c0_100, %c0_101, %c24], %48 {strides = array<i32>} : memref<1x8x16x36xbf16, #tpu.memory_space<vmem>>, vector<1x8x16x4xbf16>,
      %c2_i32_102 = arith.constant 2 : i32
      %50 = arith.addi %21, %c2_i32_102 : i32
      %c0_103 = arith.constant 0 : index
      %51 = arith.index_cast %50 : i32 to index
      %c1_104 = arith.constant 1 : index
      %c0_105 = arith.constant 0 : index
      %52 = vector.load %arg7[%c0_103, %51, %c1_104, %c0_105] : memref<1x18x18x4xbf16, #tpu.memory_space<vmem>>, vector<1x8x16x4xbf16>
      %c0_106 = arith.constant 0 : index
      %c0_107 = arith.constant 0 : index
      %c0_108 = arith.constant 0 : index
      %c28 = arith.constant 28 : index
      %53 = vector.load %arg9[%c0_106, %c0_107, %c0_108, %c28] : memref<1x8x16x36xbf16, #tpu.memory_space<vmem>>, vector<1x8x16x4xbf16>
      tpu.vector_store %arg9[%c0_106, %c0_107, %c0_108, %c28], %52 {strides = array<i32>} : memref<1x8x16x36xbf16, #tpu.memory_space<vmem>>, vector<1x8x16x4xbf16>,
      %c2_i32_109 = arith.constant 2 : i32
      %54 = arith.addi %21, %c2_i32_109 : i32
      %c0_110 = arith.constant 0 : index
      %55 = arith.index_cast %54 : i32 to index
      %c2_111 = arith.constant 2 : index
      %c0_112 = arith.constant 0 : index
      %56 = vector.load %arg7[%c0_110, %55, %c2_111, %c0_112] : memref<1x18x18x4xbf16, #tpu.memory_space<vmem>>, vector<1x8x16x4xbf16>
      %c0_113 = arith.constant 0 : index
      %c0_114 = arith.constant 0 : index
      %c0_115 = arith.constant 0 : index
      %c32 = arith.constant 32 : index
      %57 = vector.load %arg9[%c0_113, %c0_114, %c0_115, %c32] : memref<1x8x16x36xbf16, #tpu.memory_space<vmem>>, vector<1x8x16x4xbf16>
      tpu.vector_store %arg9[%c0_113, %c0_114, %c0_115, %c32], %56 {strides = array<i32>} : memref<1x8x16x36xbf16, #tpu.memory_space<vmem>>, vector<1x8x16x4xbf16>,
      %c0_116 = arith.constant 0 : index
      %c0_117 = arith.constant 0 : index
      %c0_118 = arith.constant 0 : index
      %c0_119 = arith.constant 0 : index
      %58 = vector.load %arg9[%c0_116, %c0_117, %c0_118, %c0_119] : memref<1x8x16x36xbf16, #tpu.memory_space<vmem>>, vector<1x8x16x36xbf16>
      %59 = vector.shape_cast %58 : vector<1x8x16x36xbf16> to vector<128x36xbf16>
      %cst_120 = arith.constant dense<0.000000e+00> : vector<128x4xf32>
      %60 = tpu.matmul %59, %15, %cst_120 {dimension_numbers = #tpu.dot_dimension_numbers<[1], [0], [0], [1], [0, 0, 1, 1], [], []>} : vector<128x36xbf16>, vector<36x4xbf16>, vector<128x4xf32> -> vector<128x4xf32>
      %61 = vector.broadcast %16 : vector<1x4xf32> to vector<128x4xf32>
      %62 = arith.addf %60, %61 : vector<128x4xf32>
      %cst_121 = arith.constant 0.000000e+00 : f32
      %63 = vector.broadcast %cst_121 : f32 to vector<128x4xf32>
      %64 = arith.maximumf %62, %63 : vector<128x4xf32>
      %65 = vector.shape_cast %64 : vector<128x4xf32> to vector<1x8x16x4xf32>
      %66 = arith.truncf %65 : vector<1x8x16x4xf32> to vector<1x8x16x4xbf16>
      %c1_i32_122 = arith.constant 1 : i32
      %67 = arith.addi %21, %c1_i32_122 : i32
      %c0_123 = arith.constant 0 : index
      %68 = arith.index_cast %67 : i32 to index
      %c1_124 = arith.constant 1 : index
      %c0_125 = arith.constant 0 : index
      %69 = vector.load %arg8[%c0_123, %68, %c1_124, %c0_125] : memref<1x18x18x4xbf16, #tpu.memory_space<vmem>>, vector<1x8x16x4xbf16>
      tpu.vector_store %arg8[%c0_123, %68, %c1_124, %c0_125], %66 {strides = array<i32>} : memref<1x18x18x4xbf16, #tpu.memory_space<vmem>>, vector<1x8x16x4xbf16>,
    }
    %c2_i32_48 = arith.constant 2 : i32
    %c0_i32_49 = arith.constant 0 : i32
    %c2_i32_50 = arith.constant 2 : i32
    %20 = arith.addi %c0_i32_49, %c2_i32_50 : i32
    %c1_i32_51 = arith.constant 1 : i32
    scf.for %arg10 = %c0_i32_49 to %20 step %c1_i32_51  : i32 {
      %c8_i32 = arith.constant 8 : i32
      %21 = arith.muli %arg10, %c8_i32 : i32
      %c0_i32_53 = arith.constant 0 : i32
      %22 = arith.addi %21, %c0_i32_53 : i32
      %c0_54 = arith.constant 0 : index
      %23 = arith.index_cast %22 : i32 to index
      %c0_55 = arith.constant 0 : index
      %c0_56 = arith.constant 0 : index
      %24 = vector.load %arg8[%c0_54, %23, %c0_55, %c0_56] : memref<1x18x18x4xbf16, #tpu.memory_space<vmem>>, vector<1x8x16x4xbf16>
      %c0_57 = arith.constant 0 : index
      %c0_58 = arith.constant 0 : index
      %c0_59 = arith.constant 0 : index
      %c0_60 = arith.constant 0 : index
      %25 = vector.load %arg9[%c0_57, %c0_58, %c0_59, %c0_60] : memref<1x8x16x36xbf16, #tpu.memory_space<vmem>>, vector<1x8x16x4xbf16>
      tpu.vector_store %arg9[%c0_57, %c0_58, %c0_59, %c0_60], %24 {strides = array<i32>} : memref<1x8x16x36xbf16, #tpu.memory_space<vmem>>, vector<1x8x16x4xbf16>,
      %c0_i32_61 = arith.constant 0 : i32
      %26 = arith.addi %21, %c0_i32_61 : i32
      %c0_62 = arith.constant 0 : index
      %27 = arith.index_cast %26 : i32 to index
      %c1_63 = arith.constant 1 : index
      %c0_64 = arith.constant 0 : index
      %28 = vector.load %arg8[%c0_62, %27, %c1_63, %c0_64] : memref<1x18x18x4xbf16, #tpu.memory_space<vmem>>, vector<1x8x16x4xbf16>
      %c0_65 = arith.constant 0 : index
      %c0_66 = arith.constant 0 : index
      %c0_67 = arith.constant 0 : index
      %c4 = arith.constant 4 : index
      %29 = vector.load %arg9[%c0_65, %c0_66, %c0_67, %c4] : memref<1x8x16x36xbf16, #tpu.memory_space<vmem>>, vector<1x8x16x4xbf16>
      tpu.vector_store %arg9[%c0_65, %c0_66, %c0_67, %c4], %28 {strides = array<i32>} : memref<1x8x16x36xbf16, #tpu.memory_space<vmem>>, vector<1x8x16x4xbf16>,
      %c0_i32_68 = arith.constant 0 : i32
      %30 = arith.addi %21, %c0_i32_68 : i32
      %c0_69 = arith.constant 0 : index
      %31 = arith.index_cast %30 : i32 to index
      %c2 = arith.constant 2 : index
      %c0_70 = arith.constant 0 : index
      %32 = vector.load %arg8[%c0_69, %31, %c2, %c0_70] : memref<1x18x18x4xbf16, #tpu.memory_space<vmem>>, vector<1x8x16x4xbf16>
      %c0_71 = arith.constant 0 : index
      %c0_72 = arith.constant 0 : index
      %c0_73 = arith.constant 0 : index
      %c8 = arith.constant 8 : index
      %33 = vector.load %arg9[%c0_71, %c0_72, %c0_73, %c8] : memref<1x8x16x36xbf16, #tpu.memory_space<vmem>>, vector<1x8x16x4xbf16>
      tpu.vector_store %arg9[%c0_71, %c0_72, %c0_73, %c8], %32 {strides = array<i32>} : memref<1x8x16x36xbf16, #tpu.memory_space<vmem>>, vector<1x8x16x4xbf16>,
      %c1_i32_74 = arith.constant 1 : i32
      %34 = arith.addi %21, %c1_i32_74 : i32
      %c0_75 = arith.constant 0 : index
      %35 = arith.index_cast %34 : i32 to index
      %c0_76 = arith.constant 0 : index
      %c0_77 = arith.constant 0 : index
      %36 = vector.load %arg8[%c0_75, %35, %c0_76, %c0_77] : memref<1x18x18x4xbf16, #tpu.memory_space<vmem>>, vector<1x8x16x4xbf16>
      %c0_78 = arith.constant 0 : index
      %c0_79 = arith.constant 0 : index
      %c0_80 = arith.constant 0 : index
      %c12 = arith.constant 12 : index
      %37 = vector.load %arg9[%c0_78, %c0_79, %c0_80, %c12] : memref<1x8x16x36xbf16, #tpu.memory_space<vmem>>, vector<1x8x16x4xbf16>
      tpu.vector_store %arg9[%c0_78, %c0_79, %c0_80, %c12], %36 {strides = array<i32>} : memref<1x8x16x36xbf16, #tpu.memory_space<vmem>>, vector<1x8x16x4xbf16>,
      %c1_i32_81 = arith.constant 1 : i32
      %38 = arith.addi %21, %c1_i32_81 : i32
      %c0_82 = arith.constant 0 : index
      %39 = arith.index_cast %38 : i32 to index
      %c1_83 = arith.constant 1 : index
      %c0_84 = arith.constant 0 : index
      %40 = vector.load %arg8[%c0_82, %39, %c1_83, %c0_84] : memref<1x18x18x4xbf16, #tpu.memory_space<vmem>>, vector<1x8x16x4xbf16>
      %c0_85 = arith.constant 0 : index
      %c0_86 = arith.constant 0 : index
      %c0_87 = arith.constant 0 : index
      %c16 = arith.constant 16 : index
      %41 = vector.load %arg9[%c0_85, %c0_86, %c0_87, %c16] : memref<1x8x16x36xbf16, #tpu.memory_space<vmem>>, vector<1x8x16x4xbf16>
      tpu.vector_store %arg9[%c0_85, %c0_86, %c0_87, %c16], %40 {strides = array<i32>} : memref<1x8x16x36xbf16, #tpu.memory_space<vmem>>, vector<1x8x16x4xbf16>,
      %c1_i32_88 = arith.constant 1 : i32
      %42 = arith.addi %21, %c1_i32_88 : i32
      %c0_89 = arith.constant 0 : index
      %43 = arith.index_cast %42 : i32 to index
      %c2_90 = arith.constant 2 : index
      %c0_91 = arith.constant 0 : index
      %44 = vector.load %arg8[%c0_89, %43, %c2_90, %c0_91] : memref<1x18x18x4xbf16, #tpu.memory_space<vmem>>, vector<1x8x16x4xbf16>
      %c0_92 = arith.constant 0 : index
      %c0_93 = arith.constant 0 : index
      %c0_94 = arith.constant 0 : index
      %c20 = arith.constant 20 : index
      %45 = vector.load %arg9[%c0_92, %c0_93, %c0_94, %c20] : memref<1x8x16x36xbf16, #tpu.memory_space<vmem>>, vector<1x8x16x4xbf16>
      tpu.vector_store %arg9[%c0_92, %c0_93, %c0_94, %c20], %44 {strides = array<i32>} : memref<1x8x16x36xbf16, #tpu.memory_space<vmem>>, vector<1x8x16x4xbf16>,
      %c2_i32_95 = arith.constant 2 : i32
      %46 = arith.addi %21, %c2_i32_95 : i32
      %c0_96 = arith.constant 0 : index
      %47 = arith.index_cast %46 : i32 to index
      %c0_97 = arith.constant 0 : index
      %c0_98 = arith.constant 0 : index
      %48 = vector.load %arg8[%c0_96, %47, %c0_97, %c0_98] : memref<1x18x18x4xbf16, #tpu.memory_space<vmem>>, vector<1x8x16x4xbf16>
      %c0_99 = arith.constant 0 : index
      %c0_100 = arith.constant 0 : index
      %c0_101 = arith.constant 0 : index
      %c24 = arith.constant 24 : index
      %49 = vector.load %arg9[%c0_99, %c0_100, %c0_101, %c24] : memref<1x8x16x36xbf16, #tpu.memory_space<vmem>>, vector<1x8x16x4xbf16>
      tpu.vector_store %arg9[%c0_99, %c0_100, %c0_101, %c24], %48 {strides = array<i32>} : memref<1x8x16x36xbf16, #tpu.memory_space<vmem>>, vector<1x8x16x4xbf16>,
      %c2_i32_102 = arith.constant 2 : i32
      %50 = arith.addi %21, %c2_i32_102 : i32
      %c0_103 = arith.constant 0 : index
      %51 = arith.index_cast %50 : i32 to index
      %c1_104 = arith.constant 1 : index
      %c0_105 = arith.constant 0 : index
      %52 = vector.load %arg8[%c0_103, %51, %c1_104, %c0_105] : memref<1x18x18x4xbf16, #tpu.memory_space<vmem>>, vector<1x8x16x4xbf16>
      %c0_106 = arith.constant 0 : index
      %c0_107 = arith.constant 0 : index
      %c0_108 = arith.constant 0 : index
      %c28 = arith.constant 28 : index
      %53 = vector.load %arg9[%c0_106, %c0_107, %c0_108, %c28] : memref<1x8x16x36xbf16, #tpu.memory_space<vmem>>, vector<1x8x16x4xbf16>
      tpu.vector_store %arg9[%c0_106, %c0_107, %c0_108, %c28], %52 {strides = array<i32>} : memref<1x8x16x36xbf16, #tpu.memory_space<vmem>>, vector<1x8x16x4xbf16>,
      %c2_i32_109 = arith.constant 2 : i32
      %54 = arith.addi %21, %c2_i32_109 : i32
      %c0_110 = arith.constant 0 : index
      %55 = arith.index_cast %54 : i32 to index
      %c2_111 = arith.constant 2 : index
      %c0_112 = arith.constant 0 : index
      %56 = vector.load %arg8[%c0_110, %55, %c2_111, %c0_112] : memref<1x18x18x4xbf16, #tpu.memory_space<vmem>>, vector<1x8x16x4xbf16>
      %c0_113 = arith.constant 0 : index
      %c0_114 = arith.constant 0 : index
      %c0_115 = arith.constant 0 : index
      %c32 = arith.constant 32 : index
      %57 = vector.load %arg9[%c0_113, %c0_114, %c0_115, %c32] : memref<1x8x16x36xbf16, #tpu.memory_space<vmem>>, vector<1x8x16x4xbf16>
      tpu.vector_store %arg9[%c0_113, %c0_114, %c0_115, %c32], %56 {strides = array<i32>} : memref<1x8x16x36xbf16, #tpu.memory_space<vmem>>, vector<1x8x16x4xbf16>,
      %c0_116 = arith.constant 0 : index
      %c0_117 = arith.constant 0 : index
      %c0_118 = arith.constant 0 : index
      %c0_119 = arith.constant 0 : index
      %58 = vector.load %arg9[%c0_116, %c0_117, %c0_118, %c0_119] : memref<1x8x16x36xbf16, #tpu.memory_space<vmem>>, vector<1x8x16x36xbf16>
      %59 = vector.shape_cast %58 : vector<1x8x16x36xbf16> to vector<128x36xbf16>
      %cst_120 = arith.constant dense<0.000000e+00> : vector<128x4xf32>
      %60 = tpu.matmul %59, %17, %cst_120 {dimension_numbers = #tpu.dot_dimension_numbers<[1], [0], [0], [1], [0, 0, 1, 1], [], []>} : vector<128x36xbf16>, vector<36x4xbf16>, vector<128x4xf32> -> vector<128x4xf32>
      %61 = vector.broadcast %18 : vector<1x4xf32> to vector<128x4xf32>
      %62 = arith.addf %60, %61 : vector<128x4xf32>
      %c0_121 = arith.constant 0 : index
      %63 = arith.index_cast %21 : i32 to index
      %c0_122 = arith.constant 0 : index
      %c0_123 = arith.constant 0 : index
      %64 = vector.load %arg1[%c0_121, %63, %c0_122, %c0_123] : memref<1x16x16x4xf32, #tpu.memory_space<vmem>>, vector<1x8x16x4xf32>
      %65 = vector.shape_cast %62 : vector<128x4xf32> to vector<1x8x16x4xf32>
      %66 = arith.addf %65, %64 : vector<1x8x16x4xf32>
      %cst_124 = arith.constant 0.000000e+00 : f32
      %67 = vector.broadcast %cst_124 : f32 to vector<1x8x16x4xf32>
      %68 = arith.maximumf %66, %67 : vector<1x8x16x4xf32>
      %c0_125 = arith.constant 0 : index
      %69 = arith.index_cast %21 : i32 to index
      %c0_126 = arith.constant 0 : index
      %c0_127 = arith.constant 0 : index
      %70 = vector.load %arg6[%c0_125, %69, %c0_126, %c0_127] : memref<1x16x16x4xf32, #tpu.memory_space<vmem>>, vector<1x8x16x4xf32>
      tpu.vector_store %arg6[%c0_125, %69, %c0_126, %c0_127], %68 {strides = array<i32>} : memref<1x16x16x4xf32, #tpu.memory_space<vmem>>, vector<1x8x16x4xf32>,
    }
    %c2_i32_52 = arith.constant 2 : i32
    return
  }
  func.func @transform_0(%arg0: i32) -> (i32, i32, i32, i32) {
    %c0_i32 = arith.constant 0 : i32
    %c0_i32_0 = arith.constant 0 : i32
    %c0_i32_1 = arith.constant 0 : i32
    %c0_i32_2 = arith.constant 0 : i32
    return %arg0, %c0_i32, %c0_i32_0, %c0_i32_1 : i32, i32, i32, i32
  }
  func.func @transform_1(%arg0: i32) -> (i32, i32) {
    %c0_i32 = arith.constant 0 : i32
    %c0_i32_0 = arith.constant 0 : i32
    %c0_i32_1 = arith.constant 0 : i32
    return %c0_i32, %c0_i32_0 : i32, i32
  }
  func.func @transform_2(%arg0: i32) -> (i32, i32) {
    %c0_i32 = arith.constant 0 : i32
    %c0_i32_0 = arith.constant 0 : i32
    %c0_i32_1 = arith.constant 0 : i32
    return %c0_i32, %c0_i32_0 : i32, i32
  }
  func.func @transform_3(%arg0: i32) -> (i32, i32) {
    %c0_i32 = arith.constant 0 : i32
    %c0_i32_0 = arith.constant 0 : i32
    %c0_i32_1 = arith.constant 0 : i32
    return %c0_i32, %c0_i32_0 : i32, i32
  }
  func.func @transform_4(%arg0: i32) -> (i32, i32) {
    %c0_i32 = arith.constant 0 : i32
    %c0_i32_0 = arith.constant 0 : i32
    %c0_i32_1 = arith.constant 0 : i32
    return %c0_i32, %c0_i32_0 : i32, i32
  }
  func.func @transform_5(%arg0: i32) -> (i32, i32, i32, i32) {
    %c0_i32 = arith.constant 0 : i32
    %c0_i32_0 = arith.constant 0 : i32
    %c0_i32_1 = arith.constant 0 : i32
    %c0_i32_2 = arith.constant 0 : i32
    return %arg0, %c0_i32, %c0_i32_0, %c0_i32_1 : i32, i32, i32, i32
  }
}

</mosaic_0001>

<bundles_post_ra>
// kernel: tpu_custom_call.1
= control target key start
LH: loop header
LB: loop body
LE: loop exit
PB: predicated region body
PF: predicated region fallthrough
CT: control target
= control target key end

     0   :  { %s5789_s18 = smov 0   ;;  %s7895_s0 = inlined_call_operand.vmem [shape: f32[2,16,16,4], index: 0, kind: input, shape index: {}]   ;;  %s7896_s1 = inlined_call_operand.vmem [shape: bf16[36,4], index: 1, kind: input, shape index: {}]   ;;  %s7897_s2 = inlined_call_operand.vmem [shape: f32[1,4], index: 2, kind: input, shape index: {}]   ;;  %s7898_s3 = inlined_call_operand.vmem [shape: bf16[36,4], index: 3, kind: input, shape index: {}]   ;;  %s7899_s4 = inlined_call_operand.vmem [shape: f32[1,4], index: 4, kind: input, shape index: {}]   ;;  %s7900_s5 = inlined_call_operand.vmem [shape: f32[2,16,16,4], index: 5, kind: output, shape index: {}]  }
   0x1 LB: > { %s5066_s19 = sadd.s32 4294967295, %s5732_s18   ;;  %p5070_p0 = scmp.ge.s32.totalorder %s5732_s18, 1  ;;  %s5732_s18 = sphi %s5789_s18, %s15_s18  }
   0x2   : > { %p187_p1 = scmp.lt.s32.totalorder %s5732_s18, 3 }
   0x4   : > { %p188_p2 = pnand %p5070_p0, %p187_p1 }
   0x5   : > { %p5825_p3 = scmp.lt.s32.totalorder (!%p188_p2), %s5066_s19, 1 }
   0x6   : > { %191 = sbr.rel (%p188_p2) target bundleno = 1348 (0x544), region = 40 }
   0xb   : > { %vm229_vm0 = vcmask 24576   ;;  %vm237_vm1 = vsmask.f32 256  ;;  %v239_v0 = vld [vmem:[#allocation2 + $0xc] sm:$0x1]  ;;  %vm226_vm2 = vcmask 27648  }
   0xc   : > { %vm5799_vm3 = vmand %vm229_vm0, %vm237_vm1  ;;  %v242_v2 = vld [vmem:[#allocation2 + $0x18] sm:$0x1]  ;;  %v245_v3 = vld [vmem:[#allocation2 + $0x24] sm:$0x1]  ;;  %vm287_vm4 = vsmask.f32 7938 }
   0xd   : > { %v240_v4 = vsel %vm5799_vm3, 0, %v239_v0  ;;  %v243_v5 = vsel %vm5799_vm3, 0, %v242_v2  ;;  %v246_v6 = vsel %vm5799_vm3, 0, %v245_v3  ;;  %v248_v7 = vld [vmem:[#allocation2 + $0x30] sm:$0x1]  ;;  %v5742_v11 = vmov 0   ;;  %vm5847_vm5 = vmand %vm229_vm0, %vm287_vm4 }
   0xe   : > { %241 = vst [vmem:[#allocation2 + $0xc] sm:$0x1] %v240_v4  ;;  %244 = vst [vmem:[#allocation2 + $0x18] sm:$0x1] %v243_v5  ;;  %v249_v8 = vsel %vm5799_vm3, 0, %v248_v7  ;;  %s7915_s19 = smov (!%p5825_p3, %s5066_s19), 1 }
   0xf   : > { %247 = vst [vmem:[#allocation2 + $0x24] sm:$0x1] %v246_v6  ;;  %v251_v9 = vld [vmem:[#allocation2 + $0x3c] sm:$0x1]  ;;  %v254_v10 = vld [vmem:[#allocation2 + $0x48] sm:$0x1]  ;;  %vm6037_vm7 = vmand %vm226_vm2, %vm287_vm4 }
  0x10   : > { %227 = vst.msk [vmem:[#allocation2] sm:$0xf] %vm226_vm2, %v5742_v11  ;;  %228 = vst.msk [vmem:[#allocation2 + $0x4] sm:$0xf] %vm226_vm2, %v5742_v11  ;;  %v252_v12 = vsel %vm5799_vm3, 0, %v251_v9  ;;  %v255_v13 = vsel %vm5799_vm3, 0, %v254_v10 }
  0x11   : > { %230 = vst.msk [vmem:[#allocation2 + $0x8] sm:$0x1] %vm229_vm0, %v5742_v11  ;;  %234 = vst.msk [vmem:[#allocation2 + $0xd4] sm:$0x1] %vm229_vm0, %v5742_v11  ;;  %v257_v14 = vld [vmem:[#allocation2 + $0x54] sm:$0x1] }
  0x12   : > { %232 = vst.msk [vmem:[#allocation2 + $0xcc] sm:$0xf] %vm226_vm2, %v5742_v11  ;;  %233 = vst.msk [vmem:[#allocation2 + $0xd0] sm:$0xf] %vm226_vm2, %v5742_v11  ;;  %v260_v15 = vld [vmem:[#allocation2 + $0x60] sm:$0x1] }
  0x13   : > { %337 = vst.msk [vmem:[#allocation3] sm:$0xf] %vm226_vm2, %v5742_v11  ;;  %338 = vst.msk [vmem:[#allocation3 + $0x4] sm:$0xf] %vm226_vm2, %v5742_v11  ;;  %v258_v16 = vsel %vm5799_vm3, 0, %v257_v14  ;;  %v261_v17 = vsel %vm5799_vm3, 0, %v260_v15 }
  0x14   : > { %339 = vst.msk [vmem:[#allocation3 + $0x8] sm:$0x1] %vm229_vm0, %v5742_v11  ;;  %343 = vst.msk [vmem:[#allocation3 + $0xd4] sm:$0x1] %vm229_vm0, %v5742_v11  ;;  %v263_v18 = vld [vmem:[#allocation2 + $0x6c] sm:$0x1] }
  0x15   : > { %341 = vst.msk [vmem:[#allocation3 + $0xcc] sm:$0xf] %vm226_vm2, %v5742_v11  ;;  %342 = vst.msk [vmem:[#allocation3 + $0xd0] sm:$0xf] %vm226_vm2, %v5742_v11  ;;  %v266_v19 = vld [vmem:[#allocation2 + $0x78] sm:$0x1] }
  0x16   : > { %250 = vst [vmem:[#allocation2 + $0x30] sm:$0x1] %v249_v8  ;;  %253 = vst [vmem:[#allocation2 + $0x3c] sm:$0x1] %v252_v12  ;;  %v264_v20 = vsel %vm5799_vm3, 0, %v263_v18  ;;  %v267_v21 = vsel %vm5799_vm3, 0, %v266_v19 }
  0x17   : > { %256 = vst [vmem:[#allocation2 + $0x48] sm:$0x1] %v255_v13  ;;  %259 = vst [vmem:[#allocation2 + $0x54] sm:$0x1] %v258_v16  ;;  %v269_v22 = vld [vmem:[#allocation2 + $0x84] sm:$0x1] }
  0x18   : > { %262 = vst [vmem:[#allocation2 + $0x60] sm:$0x1] %v261_v17  ;;  %v272_v23 = vld [vmem:[#allocation2 + $0x90] sm:$0x1]  ;;  %265 = vst [vmem:[#allocation2 + $0x6c] sm:$0x1] %v264_v20 }
  0x19   : > { %268 = vst [vmem:[#allocation2 + $0x78] sm:$0x1] %v267_v21  ;;  %v270_v24 = vsel %vm5799_vm3, 0, %v269_v22  ;;  %v273_v25 = vsel %vm5799_vm3, 0, %v272_v23  ;;  %v275_v26 = vld [vmem:[#allocation2 + $0x9c] sm:$0x1] }
  0x1a   : > { %v278_v27 = vld [vmem:[#allocation2 + $0xa8] sm:$0x1]  ;;  %271 = vst [vmem:[#allocation2 + $0x84] sm:$0x1] %v270_v24  ;;  %274 = vst [vmem:[#allocation2 + $0x90] sm:$0x1] %v273_v25 }
  0x1b   : > { %v276_v29 = vsel %vm5799_vm3, 0, %v275_v26  ;;  %v279_v30 = vsel %vm5799_vm3, 0, %v278_v27  ;;  %v281_v31 = vld [vmem:[#allocation2 + $0xb4] sm:$0x1]  ;;  %v284_v32 = vld [vmem:[#allocation2 + $0xc0] sm:$0x1] }
  0x1c   : > { %277 = vst [vmem:[#allocation2 + $0x9c] sm:$0x1] %v276_v29  ;;  %280 = vst [vmem:[#allocation2 + $0xa8] sm:$0x1] %v279_v30  ;;  %v282_v33 = vsel %vm5799_vm3, 0, %v281_v31  ;;  %v285_v34 = vsel %vm5799_vm3, 0, %v284_v32 }
  0x1d   : > { %v289_v35 = vld [vmem:[#allocation2 + $0x14] sm:$0x1]  ;;  %v292_v36 = vld [vmem:[#allocation2 + $0x20] sm:$0x1]  ;;  %283 = vst [vmem:[#allocation2 + $0xb4] sm:$0x1] %v282_v33 }
  0x1e   : > { %286 = vst [vmem:[#allocation2 + $0xc0] sm:$0x1] %v285_v34  ;;  %v290_v37 = vsel %vm5847_vm5, 0, %v289_v35  ;;  %v293_v38 = vsel %vm5847_vm5, 0, %v292_v36  ;;  %v295_v39 = vld [vmem:[#allocation2 + $0x2c] sm:$0x1] }
  0x1f   : > { %v298_v40 = vld [vmem:[#allocation2 + $0x38] sm:$0x1]  ;;  %291 = vst [vmem:[#allocation2 + $0x14] sm:$0x1] %v290_v37  ;;  %294 = vst [vmem:[#allocation2 + $0x20] sm:$0x1] %v293_v38 }
  0x20   : > { %v296_v41 = vsel %vm5847_vm5, 0, %v295_v39  ;;  %v299_v42 = vsel %vm5847_vm5, 0, %v298_v40  ;;  %v301_v43 = vld [vmem:[#allocation2 + $0x44] sm:$0x1]  ;;  %v304_v44 = vld [vmem:[#allocation2 + $0x50] sm:$0x1] }
  0x21   : > { %297 = vst [vmem:[#allocation2 + $0x2c] sm:$0x1] %v296_v41  ;;  %300 = vst [vmem:[#allocation2 + $0x38] sm:$0x1] %v299_v42  ;;  %v302_v45 = vsel %vm5847_vm5, 0, %v301_v43  ;;  %v305_v46 = vsel %vm5847_vm5, 0, %v304_v44 }
  0x22   : > { %v307_v47 = vld [vmem:[#allocation2 + $0x5c] sm:$0x1]  ;;  %v310_v48 = vld [vmem:[#allocation2 + $0x68] sm:$0x1]  ;;  %303 = vst [vmem:[#allocation2 + $0x44] sm:$0x1] %v302_v45 }
  0x23   : > { %306 = vst [vmem:[#allocation2 + $0x50] sm:$0x1] %v305_v46  ;;  %v308_v49 = vsel %vm5847_vm5, 0, %v307_v47  ;;  %v311_v50 = vsel %vm5847_vm5, 0, %v310_v48  ;;  %v313_v51 = vld [vmem:[#allocation2 + $0x74] sm:$0x1] }
  0x24   : > { %v316_v52 = vld [vmem:[#allocation2 + $0x80] sm:$0x1]  ;;  %309 = vst [vmem:[#allocation2 + $0x5c] sm:$0x1] %v308_v49  ;;  %312 = vst [vmem:[#allocation2 + $0x68] sm:$0x1] %v311_v50 }
  0x25   : > { %v314_v53 = vsel %vm5847_vm5, 0, %v313_v51  ;;  %v317_v54 = vsel %vm5847_vm5, 0, %v316_v52  ;;  %v319_v55 = vld [vmem:[#allocation2 + $0x8c] sm:$0x1]  ;;  %v322_v56 = vld [vmem:[#allocation2 + $0x98] sm:$0x1] }
  0x26   : > { %315 = vst [vmem:[#allocation2 + $0x74] sm:$0x1] %v314_v53  ;;  %318 = vst [vmem:[#allocation2 + $0x80] sm:$0x1] %v317_v54  ;;  %v320_v57 = vsel %vm5847_vm5, 0, %v319_v55  ;;  %v323_v58 = vsel %vm5847_vm5, 0, %v322_v56 }
  0x27   : > { %v325_v59 = vld [vmem:[#allocation2 + $0xa4] sm:$0x1]  ;;  %v328_v60 = vld [vmem:[#allocation2 + $0xb0] sm:$0x1]  ;;  %321 = vst [vmem:[#allocation2 + $0x8c] sm:$0x1] %v320_v57 }
  0x28   : > { %324 = vst [vmem:[#allocation2 + $0x98] sm:$0x1] %v323_v58  ;;  %v326_v61 = vsel %vm5847_vm5, 0, %v325_v59  ;;  %v329_v62 = vsel %vm5847_vm5, 0, %v328_v60  ;;  %v331_v63 = vld [vmem:[#allocation2 + $0xbc] sm:$0x1] }
  0x29   : > { %v334_v0 = vld [vmem:[#allocation2 + $0xc8] sm:$0x1]  ;;  %327 = vst [vmem:[#allocation2 + $0xa4] sm:$0x1] %v326_v61  ;;  %330 = vst [vmem:[#allocation2 + $0xb0] sm:$0x1] %v329_v62 }
  0x2a   : > { %v332_v2 = vsel %vm5847_vm5, 0, %v331_v63  ;;  %v335_v3 = vsel %vm5847_vm5, 0, %v334_v0  ;;  %v5894_v4 = vld [vmem:[%s7896_s1] sm:$0xf]  ;;  %v5899_v5 = vld [vmem:[%s7896_s1 + $0x4] sm:$0xf] }
  0x2b   : > { %333 = vst [vmem:[#allocation2 + $0xbc] sm:$0x1] %v332_v2  ;;  %336 = vst [vmem:[#allocation2 + $0xc8] sm:$0x1] %v335_v3  ;;  %v5904_v6 = vld [vmem:[%s7896_s1 + $0x8] sm:$0xf] }
  0x2c   : > { %v5909_v7 = vld [vmem:[%s7896_s1 + $0xc] sm:$0xf]  ;;  %v5914_v8 = vld [vmem:[%s7896_s1 + $0x10] sm:$0x3]  ;;  %v5919_v9 = vld [vmem:[%s7897_s2] ss:$0 sm:$0xff] }
  0x2d   : > { %v5924_v10 = vld [vmem:[%s7898_s3] sm:$0xf]  ;;  %v5929_v11 = vld [vmem:[%s7898_s3 + $0x4] sm:$0xf]  ;;  %v5934_v12 = vld [vmem:[%s7898_s3 + $0x8] sm:$0xf] }
  0x2e   : > { %v5939_v13 = vld [vmem:[%s7898_s3 + $0xc] sm:$0xf]  ;;  %v5944_v14 = vld [vmem:[%s7898_s3 + $0x10] sm:$0x3]  ;;  %v5949_v15 = vld [vmem:[%s7899_s4] ss:$0 sm:$0xff] }
  0x2f   : > { %v345_v16 = vld [vmem:[#allocation3 + $0xc] sm:$0x1]  ;;  %v348_v17 = vld [vmem:[#allocation3 + $0x18] sm:$0x1]  ;;  %v351_v20 = vld [vmem:[#allocation3 + $0x24] sm:$0x1] }
  0x30   : > { %v346_v18 = vsel %vm5799_vm3, 0, %v345_v16  ;;  %v349_v19 = vsel %vm5799_vm3, 0, %v348_v17  ;;  %v354_v21 = vld [vmem:[#allocation3 + $0x30] sm:$0x1]  ;;  %v352_v22 = vsel %vm5799_vm3, 0, %v351_v20  ;;  %s5526_s23 = sshll.u32 %s7915_s19, 8 }
  0x31   : > { %347 = vst [vmem:[#allocation3 + $0xc] sm:$0x1] %v346_v18  ;;  %350 = vst [vmem:[#allocation3 + $0x18] sm:$0x1] %v349_v19  ;;  %v355_v23 = vsel %vm5799_vm3, 0, %v354_v21  ;;  %s6022_s26 = scalar_lea.vmem %s7895_s0, %s5526_s23  ;;  %s6027_s29 = scalar_lea.vmem %s7900_s5, %s5526_s23 }
  0x32   : > { %v357_v24 = vld [vmem:[#allocation3 + $0x3c] sm:$0x1]  ;;  %v360_v25 = vld [vmem:[#allocation3 + $0x48] sm:$0x1]  ;;  %353 = vst [vmem:[#allocation3 + $0x24] sm:$0x1] %v352_v22 }
  0x33   : > { %356 = vst [vmem:[#allocation3 + $0x30] sm:$0x1] %v355_v23  ;;  %v358_v26 = vsel %vm5799_vm3, 0, %v357_v24  ;;  %v361_v27 = vsel %vm5799_vm3, 0, %v360_v25  ;;  %v363_v29 = vld [vmem:[#allocation3 + $0x54] sm:$0x1] }
  0x34   : > { %v366_v30 = vld [vmem:[#allocation3 + $0x60] sm:$0x1]  ;;  %359 = vst [vmem:[#allocation3 + $0x3c] sm:$0x1] %v358_v26  ;;  %362 = vst [vmem:[#allocation3 + $0x48] sm:$0x1] %v361_v27 }
  0x35   : > { %v364_v31 = vsel %vm5799_vm3, 0, %v363_v29  ;;  %v367_v32 = vsel %vm5799_vm3, 0, %v366_v30  ;;  %v369_v33 = vld [vmem:[#allocation3 + $0x6c] sm:$0x1]  ;;  %v372_v34 = vld [vmem:[#allocation3 + $0x78] sm:$0x1] }
  0x36   : > { %365 = vst [vmem:[#allocation3 + $0x54] sm:$0x1] %v364_v31  ;;  %368 = vst [vmem:[#allocation3 + $0x60] sm:$0x1] %v367_v32  ;;  %v370_v35 = vsel %vm5799_vm3, 0, %v369_v33  ;;  %v373_v36 = vsel %vm5799_vm3, 0, %v372_v34 }
  0x37   : > { %v375_v37 = vld [vmem:[#allocation3 + $0x84] sm:$0x1]  ;;  %v378_v38 = vld [vmem:[#allocation3 + $0x90] sm:$0x1]  ;;  %371 = vst [vmem:[#allocation3 + $0x6c] sm:$0x1] %v370_v35 }
  0x38   : > { %374 = vst [vmem:[#allocation3 + $0x78] sm:$0x1] %v373_v36  ;;  %v376_v39 = vsel %vm5799_vm3, 0, %v375_v37  ;;  %v379_v40 = vsel %vm5799_vm3, 0, %v378_v38  ;;  %v381_v41 = vld [vmem:[#allocation3 + $0x9c] sm:$0x1] }
  0x39   : > { %v384_v42 = vld [vmem:[#allocation3 + $0xa8] sm:$0x1]  ;;  %377 = vst [vmem:[#allocation3 + $0x84] sm:$0x1] %v376_v39  ;;  %380 = vst [vmem:[#allocation3 + $0x90] sm:$0x1] %v379_v40 }
  0x3a   : > { %v382_v43 = vsel %vm5799_vm3, 0, %v381_v41  ;;  %v385_v44 = vsel %vm5799_vm3, 0, %v384_v42  ;;  %v387_v45 = vld [vmem:[#allocation3 + $0xb4] sm:$0x1]  ;;  %v390_v46 = vld [vmem:[#allocation3 + $0xc0] sm:$0x1] }
  0x3b   : > { %383 = vst [vmem:[#allocation3 + $0x9c] sm:$0x1] %v382_v43  ;;  %386 = vst [vmem:[#allocation3 + $0xa8] sm:$0x1] %v385_v44  ;;  %v388_v47 = vsel %vm5799_vm3, 0, %v387_v45  ;;  %v391_v48 = vsel %vm5799_vm3, 0, %v390_v46 }
  0x3c   : > { %v393_v49 = vld [vmem:[#allocation3 + $0x14] sm:$0x1]  ;;  %v396_v50 = vld [vmem:[#allocation3 + $0x20] sm:$0x1]  ;;  %389 = vst [vmem:[#allocation3 + $0xb4] sm:$0x1] %v388_v47 }
  0x3d   : > { %392 = vst [vmem:[#allocation3 + $0xc0] sm:$0x1] %v391_v48  ;;  %v394_v51 = vsel %vm5847_vm5, 0, %v393_v49  ;;  %v397_v52 = vsel %vm5847_vm5, 0, %v396_v50  ;;  %v399_v53 = vld [vmem:[#allocation3 + $0x2c] sm:$0x1] }
  0x3e   : > { %v402_v54 = vld [vmem:[#allocation3 + $0x38] sm:$0x1]  ;;  %395 = vst [vmem:[#allocation3 + $0x14] sm:$0x1] %v394_v51  ;;  %398 = vst [vmem:[#allocation3 + $0x20] sm:$0x1] %v397_v52 }
  0x3f   : > { %v400_v55 = vsel %vm5847_vm5, 0, %v399_v53  ;;  %v403_v56 = vsel %vm5847_vm5, 0, %v402_v54  ;;  %v405_v57 = vld [vmem:[#allocation3 + $0x44] sm:$0x1]  ;;  %v408_v58 = vld [vmem:[#allocation3 + $0x50] sm:$0x1] }
  0x40   : > { %401 = vst [vmem:[#allocation3 + $0x2c] sm:$0x1] %v400_v55  ;;  %404 = vst [vmem:[#allocation3 + $0x38] sm:$0x1] %v403_v56  ;;  %v406_v59 = vsel %vm5847_vm5, 0, %v405_v57  ;;  %v409_v60 = vsel %vm5847_vm5, 0, %v408_v58 }
  0x41   : > { %v411_v61 = vld [vmem:[#allocation3 + $0x5c] sm:$0x1]  ;;  %v414_v62 = vld [vmem:[#allocation3 + $0x68] sm:$0x1]  ;;  %407 = vst [vmem:[#allocation3 + $0x44] sm:$0x1] %v406_v59 }
  0x42   : > { %410 = vst [vmem:[#allocation3 + $0x50] sm:$0x1] %v409_v60  ;;  %v412_v63 = vsel %vm5847_vm5, 0, %v411_v61  ;;  %v415_v0 = vsel %vm5847_vm5, 0, %v414_v62  ;;  %v417_v2 = vld [vmem:[#allocation3 + $0x74] sm:$0x1] }
  0x43   : > { %v420_v3 = vld [vmem:[#allocation3 + $0x80] sm:$0x1]  ;;  %413 = vst [vmem:[#allocation3 + $0x5c] sm:$0x1] %v412_v63  ;;  %416 = vst [vmem:[#allocation3 + $0x68] sm:$0x1] %v415_v0 }
  0x44   : > { %v418_v16 = vsel %vm5847_vm5, 0, %v417_v2  ;;  %v421_v17 = vsel %vm5847_vm5, 0, %v420_v3  ;;  %v423_v18 = vld [vmem:[#allocation3 + $0x8c] sm:$0x1]  ;;  %v426_v19 = vld [vmem:[#allocation3 + $0x98] sm:$0x1] }
  0x45   : > { %419 = vst [vmem:[#allocation3 + $0x74] sm:$0x1] %v418_v16  ;;  %422 = vst [vmem:[#allocation3 + $0x80] sm:$0x1] %v421_v17  ;;  %v424_v20 = vsel %vm5847_vm5, 0, %v423_v18  ;;  %v427_v21 = vsel %vm5847_vm5, 0, %v426_v19 }
  0x46   : > { %v429_v22 = vld [vmem:[#allocation3 + $0xa4] sm:$0x1]  ;;  %v432_v23 = vld [vmem:[#allocation3 + $0xb0] sm:$0x1]  ;;  %425 = vst [vmem:[#allocation3 + $0x8c] sm:$0x1] %v424_v20 }
  0x47   : > { %428 = vst [vmem:[#allocation3 + $0x98] sm:$0x1] %v427_v21  ;;  %v430_v24 = vsel %vm5847_vm5, 0, %v429_v22  ;;  %v433_v25 = vsel %vm5847_vm5, 0, %v432_v23  ;;  %v435_v26 = vld [vmem:[#allocation3 + $0xbc] sm:$0x1] }
  0x48   : > { %v438_v27 = vld [vmem:[#allocation3 + $0xc8] sm:$0x1]  ;;  %431 = vst [vmem:[#allocation3 + $0xa4] sm:$0x1] %v430_v24  ;;  %434 = vst [vmem:[#allocation3 + $0xb0] sm:$0x1] %v433_v25 }
  0x49   : > { %v436_v29 = vsel %vm5847_vm5, 0, %v435_v26  ;;  %v439_v30 = vsel %vm5847_vm5, 0, %v438_v27  ;;  %v441_v28 = vld [vmem:[%s6022_s26] sm:$0xff]  ;;  %v442_v31 = vld [vmem:[%s6022_s26 + $0x8] sm:$0xff]  ;;  %v443_v32 = vld [vmem:[%s6022_s26 + $0x10] sm:$0xff]  ;;  %s6185_s19 = smov 0  }
  0x4a   : > { %437 = vst [vmem:[#allocation3 + $0xbc] sm:$0x1] %v436_v29  ;;  %440 = vst [vmem:[#allocation3 + $0xc8] sm:$0x1] %v439_v30  ;;  %v5528_v33 = vpack.c.bf16 %v441_v28, %v441_v28  ;;  %v5529_v34 = vpack.c.bf16 %v442_v31, %v442_v31  ;;  %v5530_v35 = vpack.c.bf16 %v443_v32, %v443_v32  ;;  %v444_v36 = vld [vmem:[%s6022_s26 + $0x18] sm:$0xff]  ;;  %v445_v37 = vld [vmem:[%s6022_s26 + $0x20] sm:$0xff] }
  0x4b   : > { %v446_v38 = vld [vmem:[%s6022_s26 + $0x28] sm:$0xff]  ;;  %vm569_vm6 = vsmask.f32 4368  ;;  %v5531_v39 = vpack.c.bf16 %v444_v36, %v444_v36  ;;  %v5532_v40 = vpack.c.bf16 %v445_v37, %v445_v37  ;;  %v897_v57 = vld [vmem:[#allocation2 + $0x14] sm:$0x1]  ;;  %v448_v22 = vld [vmem:[%s6022_s26 + $0x38] sm:$0xff] }
  0x4c   : > { %v5533_v41 = vpack.c.bf16 %v446_v38, %v446_v38  ;;  %v572_v42 = vshrl.u32 %v5528_v33, 16  ;;  %v575_v43 = vshll.u32 %v5528_v33, 16  ;;  %v580_v44 = vshrl.u32 %v5529_v34, 16  ;;  %v893_v52 = vld [vmem:[#allocation2 + $0xc] sm:$0xf]  ;;  %vm6043_vm8 = vmor %vm237_vm1, %vm569_vm6  ;;  %v447_v21 = vld [vmem:[%s6022_s26 + $0x30] sm:$0xff] }
  0x4d   : > { %v583_v45 = vshll.u32 %v5529_v34, 16  ;;  %v589_v46 = vshrl.u32 %v5530_v35, 16  ;;  %v592_v47 = vshll.u32 %v5530_v35, 16  ;;  %v597_v48 = vshrl.u32 %v5531_v39, 16  ;;  %v900_v3 = vld [vmem:[#allocation2 + $0x18] sm:$0xf] }
  0x4e   : > { %v600_v49 = vshll.u32 %v5531_v39, 16  ;;  %v574_v50 = vrot.slane %v572_v42, 7  ;;  %v582_v53 = vrot.slane %v580_v44, 7  ;;  %v606_v54 = vshrl.u32 %v5532_v40, 16  ;;  %v904_v16 = vld [vmem:[#allocation2 + $0x20] sm:$0x1] }
  0x4f   : > { %v609_v55 = vshll.u32 %v5532_v40, 16  ;;  %v591_v58 = vrot.slane %v589_v46, 7  ;;  %v599_v59 = vrot.slane %v597_v48, 7  ;;  %v614_v60 = vshrl.u32 %v5533_v41, 16  ;;  %v449_v27 = vld [vmem:[%s6022_s26 + $0x40] sm:$0xff]  ;;  %v450_v29 = vld [vmem:[%s6022_s26 + $0x48] sm:$0xff] }
  0x50   : > { %v617_v61 = vshll.u32 %v5533_v41, 16  ;;  %v577_v62 = vor.u32 %v575_v43, %v574_v50  ;;  %v578_v63 = vrot.slane %v574_v50, 4  ;;  %v585_v0 = vor.u32 %v583_v45, %v582_v53  ;;  %v907_v32 = vld [vmem:[#allocation2 + $0x24] sm:$0xf]  ;;  %v911_v36 = vld [vmem:[#allocation2 + $0x2c] sm:$0x1] }
  0x51   : > { %v587_v2 = vrot.slane %v582_v53, 4  ;;  %v594_v17 = vor.u32 %v592_v47, %v591_v58  ;;  %v595_v18 = vrot.slane %v591_v58, 4  ;;  %v602_v19 = vor.u32 %v600_v49, %v599_v59  ;;  %v451_v47 = vld [vmem:[%s6022_s26 + $0x50] sm:$0xff]  ;;  %v452_v48 = vld [vmem:[%s6022_s26 + $0x58] sm:$0xff] }
  0x52   : > { %v604_v20 = vrot.slane %v599_v59, 4  ;;  %v894_v23 = vsel %vm6037_vm7, %v577_v62, %v893_v52  ;;  %v586_v24 = vsel %vm6043_vm8, %v578_v63, %v585_v0  ;;  %v608_v26 = vrot.slane %v606_v54, 7  ;;  %v914_v59 = vld [vmem:[#allocation2 + $0x30] sm:$0xf] }
  0x53   : > { %v898_v25 = vsel %vm5799_vm3, %v587_v2, %v897_v57  ;;  %895 = vst [vmem:[#allocation2 + $0xc] sm:$0xf] %v894_v23  ;;  %896 = vst.msk [vmem:[#allocation2 + $0x10] sm:$0xf] %vm226_vm2, %v586_v24  ;;  %v901_v30 = vsel %vm6037_vm7, %v594_v17, %v900_v3  ;;  %v603_v28 = vsel %vm6043_vm8, %v595_v18, %v602_v19  ;;  %v616_v33 = vrot.slane %v614_v60, 7  ;;  %v453_v23 = vld [vmem:[%s6022_s26 + $0x60] sm:$0xff] }
  0x54   : > { %899 = vst [vmem:[#allocation2 + $0x14] sm:$0x1] %v898_v25  ;;  %v905_v31 = vsel %vm5799_vm3, %v604_v20, %v904_v16  ;;  %902 = vst [vmem:[#allocation2 + $0x18] sm:$0xf] %v901_v30  ;;  %v611_v34 = vor.u32 %v609_v55, %v608_v26  ;;  %v612_v35 = vrot.slane %v608_v26, 4  ;;  %v5534_v37 = vpack.c.bf16 %v447_v21, %v447_v21  ;;  %v454_v24 = vld [vmem:[%s6022_s26 + $0x68] sm:$0xff] }
  0x55   : > { %903 = vst.msk [vmem:[#allocation2 + $0x1c] sm:$0xf] %vm226_vm2, %v603_v28  ;;  %906 = vst [vmem:[#allocation2 + $0x20] sm:$0x1] %v905_v31  ;;  %v5535_v38 = vpack.c.bf16 %v448_v22, %v448_v22  ;;  %v619_v39 = vor.u32 %v617_v61, %v616_v33  ;;  %v621_v40 = vrot.slane %v616_v33, 4  ;;  %v5536_v41 = vpack.c.bf16 %v449_v27, %v449_v27 }
  0x56   : > { %v5537_v42 = vpack.c.bf16 %v450_v29, %v450_v29  ;;  %v908_v43 = vsel %vm6037_vm7, %v611_v34, %v907_v32  ;;  %v623_v44 = vshrl.u32 %v5534_v37, 16  ;;  %v626_v45 = vshll.u32 %v5534_v37, 16  ;;  %v918_v60 = vld [vmem:[#allocation2 + $0x38] sm:$0x1]  ;;  %v921_v18 = vld [vmem:[#allocation2 + $0x3c] sm:$0xf] }
  0x57   : > { %v631_v46 = vshrl.u32 %v5535_v38, 16  ;;  %909 = vst [vmem:[#allocation2 + $0x24] sm:$0xf] %v908_v43  ;;  %v620_v49 = vsel %vm6043_vm8, %v612_v35, %v619_v39  ;;  %v912_v50 = vsel %vm5799_vm3, %v621_v40, %v911_v36  ;;  %v634_v52 = vshll.u32 %v5535_v38, 16  ;;  %v925_v29 = vld [vmem:[#allocation2 + $0x44] sm:$0x1] }
  0x58   : > { %v640_v53 = vshrl.u32 %v5536_v41, 16  ;;  %910 = vst.msk [vmem:[#allocation2 + $0x28] sm:$0xf] %vm226_vm2, %v620_v49  ;;  %913 = vst [vmem:[#allocation2 + $0x2c] sm:$0x1] %v912_v50  ;;  %v625_v54 = vrot.slane %v623_v44, 7  ;;  %v5538_v63 = vpack.c.bf16 %v451_v47, %v451_v47  ;;  %v5539_v0 = vpack.c.bf16 %v452_v48, %v452_v48 }
  0x59   : > { %v633_v55 = vrot.slane %v631_v46, 7  ;;  %v643_v57 = vshll.u32 %v5536_v41, 16  ;;  %v648_v58 = vshrl.u32 %v5537_v42, 16  ;;  %v651_v62 = vshll.u32 %v5537_v42, 16  ;;  %v928_v34 = vld [vmem:[#allocation2 + $0x48] sm:$0xf] }
  0x5a   : > { %v642_v61 = vrot.slane %v640_v53, 7  ;;  %v628_v2 = vor.u32 %v626_v45, %v625_v54  ;;  %v629_v3 = vrot.slane %v625_v54, 4  ;;  %v657_v22 = vshrl.u32 %v5538_v63, 16  ;;  %v455_v39 = vld [vmem:[%s6022_s26 + $0x70] sm:$0xff]  ;;  %v456_v40 = vld [vmem:[%s6022_s26 + $0x78] sm:$0xff] }
  0x5b   : > { %v636_v16 = vor.u32 %v634_v52, %v633_v55  ;;  %v638_v17 = vrot.slane %v633_v55, 4  ;;  %v650_v21 = vrot.slane %v648_v58, 7  ;;  %v660_v30 = vshll.u32 %v5538_v63, 16  ;;  %v932_v50 = vld [vmem:[#allocation2 + $0x50] sm:$0x1] }
  0x5c   : > { %v645_v19 = vor.u32 %v643_v57, %v642_v61  ;;  %v646_v20 = vrot.slane %v642_v61, 4  ;;  %v915_v25 = vsel %vm6037_vm7, %v628_v2, %v914_v59  ;;  %v659_v33 = vrot.slane %v657_v22, 7  ;;  %v935_v59 = vld [vmem:[#allocation2 + $0x54] sm:$0xf]  ;;  %v457_v61 = vld [vmem:[%s6022_s26 + $0x80] sm:$0xff] }
  0x5d   : > { %v637_v26 = vsel %vm6043_vm8, %v629_v3, %v636_v16  ;;  %v919_v27 = vsel %vm5799_vm3, %v638_v17, %v918_v60  ;;  %916 = vst [vmem:[#allocation2 + $0x30] sm:$0xf] %v915_v25  ;;  %v653_v31 = vor.u32 %v651_v62, %v650_v21  ;;  %v655_v32 = vrot.slane %v650_v21, 4  ;;  %v458_v3 = vld [vmem:[%s6022_s26 + $0x88] sm:$0xff]  ;;  %v459_v16 = vld [vmem:[%s6022_s26 + $0x90] sm:$0xff] }
  0x5e   : > { %917 = vst.msk [vmem:[#allocation2 + $0x34] sm:$0xf] %vm226_vm2, %v637_v26  ;;  %920 = vst [vmem:[#allocation2 + $0x38] sm:$0x1] %v919_v27  ;;  %v922_v28 = vsel %vm6037_vm7, %v645_v19, %v921_v18  ;;  %v665_v35 = vshrl.u32 %v5539_v0, 16  ;;  %v668_v36 = vshll.u32 %v5539_v0, 16  ;;  %v5540_v37 = vpack.c.bf16 %v453_v23, %v453_v23 }
  0x5f   : > { %923 = vst [vmem:[#allocation2 + $0x3c] sm:$0xf] %v922_v28  ;;  %v5541_v38 = vpack.c.bf16 %v454_v24, %v454_v24  ;;  %v654_v41 = vsel %vm6043_vm8, %v646_v20, %v653_v31  ;;  %v926_v42 = vsel %vm5799_vm3, %v655_v32, %v925_v29  ;;  %v662_v43 = vor.u32 %v660_v30, %v659_v33  ;;  %v939_v21 = vld [vmem:[#allocation2 + $0x5c] sm:$0x1]  ;;  %v942_v27 = vld [vmem:[#allocation2 + $0x60] sm:$0xf] }
  0x60   : > { %v663_v44 = vrot.slane %v659_v33, 4  ;;  %924 = vst.msk [vmem:[#allocation2 + $0x40] sm:$0xf] %vm226_vm2, %v654_v41  ;;  %927 = vst [vmem:[#allocation2 + $0x44] sm:$0x1] %v926_v42  ;;  %v667_v45 = vrot.slane %v665_v35, 7  ;;  %v5542_v53 = vpack.c.bf16 %v455_v39, %v455_v39  ;;  %v5543_v54 = vpack.c.bf16 %v456_v40, %v456_v40 }
  0x61   : > { %v674_v46 = vshrl.u32 %v5540_v37, 16  ;;  %v677_v47 = vshll.u32 %v5540_v37, 16  ;;  %v682_v48 = vshrl.u32 %v5541_v38, 16  ;;  %v929_v49 = vsel %vm6037_vm7, %v662_v43, %v928_v34  ;;  %v946_v35 = vld [vmem:[#allocation2 + $0x68] sm:$0x1]  ;;  %v460_v40 = vld [vmem:[%s6022_s26 + $0x98] sm:$0xff] }
  0x62   : > { %v685_v52 = vshll.u32 %v5541_v38, 16  ;;  %930 = vst [vmem:[#allocation2 + $0x48] sm:$0xf] %v929_v49  ;;  %v670_v55 = vor.u32 %v668_v36, %v667_v45  ;;  %v672_v57 = vrot.slane %v667_v45, 4  ;;  %v691_v62 = vshrl.u32 %v5542_v53, 16  ;;  %v461_v41 = vld [vmem:[%s6022_s26 + $0xa0] sm:$0xff] }
  0x63   : > { %v676_v58 = vrot.slane %v674_v46, 7  ;;  %v684_v60 = vrot.slane %v682_v48, 7  ;;  %v694_v63 = vshll.u32 %v5542_v53, 16  ;;  %v699_v0 = vshrl.u32 %v5543_v54, 16  ;;  %v462_v46 = vld [vmem:[%s6022_s26 + $0xa8] sm:$0xff] }
  0x64   : > { %v702_v2 = vshll.u32 %v5543_v54, 16  ;;  %v671_v17 = vsel %vm6043_vm8, %v663_v44, %v670_v55  ;;  %v933_v18 = vsel %vm5799_vm3, %v672_v57, %v932_v50  ;;  %v693_v24 = vrot.slane %v691_v62, 7  ;;  %v949_v53 = vld [vmem:[#allocation2 + $0x6c] sm:$0xf]  ;;  %v956_v62 = vld [vmem:[#allocation2 + $0x78] sm:$0xf] }
  0x65   : > { %v679_v19 = vor.u32 %v677_v47, %v676_v58  ;;  %v680_v20 = vrot.slane %v676_v58, 4  ;;  %931 = vst.msk [vmem:[#allocation2 + $0x4c] sm:$0xf] %vm226_vm2, %v671_v17  ;;  %934 = vst [vmem:[#allocation2 + $0x50] sm:$0x1] %v933_v18  ;;  %v687_v22 = vor.u32 %v685_v52, %v684_v60  ;;  %v689_v23 = vrot.slane %v684_v60, 4 }
  0x66   : > { %v701_v25 = vrot.slane %v699_v0, 7  ;;  %v5544_v29 = vpack.c.bf16 %v457_v61, %v457_v61  ;;  %v5545_v30 = vpack.c.bf16 %v458_v3, %v458_v3  ;;  %v5546_v28 = vpack.c.bf16 %v459_v16, %v459_v16  ;;  %v463_v47 = vld [vmem:[%s6022_s26 + $0xb0] sm:$0xff] }
  0x67   : > { %v936_v26 = vsel %vm6037_vm7, %v679_v19, %v935_v59  ;;  %v688_v31 = vsel %vm6043_vm8, %v680_v20, %v687_v22  ;;  %v940_v32 = vsel %vm5799_vm3, %v689_v23, %v939_v21  ;;  %v696_v33 = vor.u32 %v694_v63, %v693_v24  ;;  %v953_v61 = vld [vmem:[#allocation2 + $0x74] sm:$0x1]  ;;  %v464_v22 = vld [vmem:[%s6022_s26 + $0xb8] sm:$0xff]  ;;  %v465_v23 = vld [vmem:[%s6022_s26 + $0xc0] sm:$0xff] }
  0x68   : > { %937 = vst [vmem:[#allocation2 + $0x54] sm:$0xf] %v936_v26  ;;  %v697_v34 = vrot.slane %v693_v24, 4  ;;  %938 = vst.msk [vmem:[#allocation2 + $0x58] sm:$0xf] %vm226_vm2, %v688_v31  ;;  %v704_v36 = vor.u32 %v702_v2, %v701_v25  ;;  %v706_v37 = vrot.slane %v701_v25, 4  ;;  %v5547_v57 = vpack.c.bf16 %v460_v40, %v460_v40 }
  0x69   : > { %941 = vst [vmem:[#allocation2 + $0x5c] sm:$0x1] %v940_v32  ;;  %v708_v38 = vshrl.u32 %v5544_v29, 16  ;;  %v711_v39 = vshll.u32 %v5544_v29, 16  ;;  %v943_v42 = vsel %vm6037_vm7, %v696_v33, %v942_v27  ;;  %v716_v43 = vshrl.u32 %v5545_v30, 16 }
  0x6a   : > { %v719_v44 = vshll.u32 %v5545_v30, 16  ;;  %v725_v45 = vshrl.u32 %v5546_v28, 16  ;;  %944 = vst [vmem:[#allocation2 + $0x60] sm:$0xf] %v943_v42  ;;  %v705_v48 = vsel %vm6043_vm8, %v697_v34, %v704_v36  ;;  %v947_v49 = vsel %vm5799_vm3, %v706_v37, %v946_v35  ;;  %v960_v32 = vld [vmem:[#allocation2 + $0x80] sm:$0x1] }
  0x6b   : > { %v710_v50 = vrot.slane %v708_v38, 7  ;;  %v728_v52 = vshll.u32 %v5546_v28, 16  ;;  %945 = vst.msk [vmem:[#allocation2 + $0x64] sm:$0xf] %vm226_vm2, %v705_v48  ;;  %948 = vst [vmem:[#allocation2 + $0x68] sm:$0x1] %v947_v49  ;;  %v5548_v58 = vpack.c.bf16 %v461_v41, %v461_v41  ;;  %v5549_v63 = vpack.c.bf16 %v462_v46, %v462_v46 }
  0x6c   : > { %v718_v54 = vrot.slane %v716_v43, 7  ;;  %v727_v55 = vrot.slane %v725_v45, 7  ;;  %v5550_v0 = vpack.c.bf16 %v463_v47, %v463_v47  ;;  %v733_v19 = vshrl.u32 %v5547_v57, 16  ;;  %v963_v33 = vld [vmem:[#allocation2 + $0x84] sm:$0xf]  ;;  %v466_v46 = vld [vmem:[%s6022_s26 + $0xc8] sm:$0xff] }
  0x6d   : > { %v713_v59 = vor.u32 %v711_v39, %v710_v50  ;;  %v714_v60 = vrot.slane %v710_v50, 4  ;;  %v736_v20 = vshll.u32 %v5547_v57, 16  ;;  %v742_v21 = vshrl.u32 %v5548_v58, 16  ;;  %v967_v50 = vld [vmem:[#allocation2 + $0x8c] sm:$0x1] }
  0x6e   : > { %v721_v2 = vor.u32 %v719_v44, %v718_v54  ;;  %v723_v3 = vrot.slane %v718_v54, 4  ;;  %v730_v16 = vor.u32 %v728_v52, %v727_v55  ;;  %v731_v17 = vrot.slane %v727_v55, 4  ;;  %v970_v52 = vld [vmem:[#allocation2 + $0x90] sm:$0xf] }
  0x6f   : > { %v950_v18 = vsel %vm6037_vm7, %v713_v59, %v949_v53  ;;  %v745_v27 = vshll.u32 %v5548_v58, 16  ;;  %v735_v29 = vrot.slane %v733_v19, 7  ;;  %v744_v30 = vrot.slane %v742_v21, 7  ;;  %v467_v54 = vld [vmem:[%s6022_s26 + $0xd0] sm:$0xff]  ;;  %v468_v19 = vld [vmem:[%s6022_s26 + $0xd8] sm:$0xff] }
  0x70   : > { %951 = vst [vmem:[#allocation2 + $0x6c] sm:$0xf] %v950_v18  ;;  %v722_v24 = vsel %vm6043_vm8, %v714_v60, %v721_v2  ;;  %v954_v25 = vsel %vm5799_vm3, %v723_v3, %v953_v61  ;;  %v957_v26 = vsel %vm6037_vm7, %v730_v16, %v956_v62  ;;  %v750_v28 = vshrl.u32 %v5549_v63, 16  ;;  %v974_v16 = vld [vmem:[#allocation2 + $0x98] sm:$0x1] }
  0x71   : > { %952 = vst.msk [vmem:[#allocation2 + $0x70] sm:$0xf] %vm226_vm2, %v722_v24  ;;  %955 = vst [vmem:[#allocation2 + $0x74] sm:$0x1] %v954_v25  ;;  %v753_v31 = vshll.u32 %v5549_v63, 16  ;;  %v759_v34 = vshrl.u32 %v5550_v0, 16  ;;  %v5551_v36 = vpack.c.bf16 %v464_v22, %v464_v22  ;;  %v5552_v37 = vpack.c.bf16 %v465_v23, %v465_v23 }
  0x72   : > { %958 = vst [vmem:[#allocation2 + $0x78] sm:$0xf] %v957_v26  ;;  %v762_v35 = vshll.u32 %v5550_v0, 16  ;;  %v738_v38 = vor.u32 %v736_v20, %v735_v29  ;;  %v740_v39 = vrot.slane %v735_v29, 4  ;;  %v747_v40 = vor.u32 %v745_v27, %v744_v30  ;;  %v469_v24 = vld [vmem:[%s6022_s26 + $0xe0] sm:$0xff]  ;;  %v470_v25 = vld [vmem:[%s6022_s26 + $0xe8] sm:$0xff] }
  0x73   : > { %v748_v41 = vrot.slane %v744_v30, 4  ;;  %v752_v42 = vrot.slane %v750_v28, 7  ;;  %v761_v43 = vrot.slane %v759_v34, 7  ;;  %v767_v44 = vshrl.u32 %v5551_v36, 16  ;;  %v471_v28 = vld [vmem:[%s6022_s26 + $0xf0] sm:$0xff] }
  0x74   : > { %v770_v45 = vshll.u32 %v5551_v36, 16  ;;  %v739_v47 = vsel %vm6043_vm8, %v731_v17, %v738_v38  ;;  %v961_v48 = vsel %vm5799_vm3, %v740_v39, %v960_v32  ;;  %v964_v49 = vsel %vm6037_vm7, %v747_v40, %v963_v33  ;;  %v977_v17 = vld [vmem:[#allocation2 + $0x9c] sm:$0xf]  ;;  %v981_v40 = vld [vmem:[#allocation2 + $0xa4] sm:$0x1] }
  0x75   : > { %v776_v53 = vshrl.u32 %v5552_v37, 16  ;;  %959 = vst.msk [vmem:[#allocation2 + $0x7c] sm:$0xf] %vm226_vm2, %v739_v47  ;;  %962 = vst [vmem:[#allocation2 + $0x80] sm:$0x1] %v961_v48  ;;  %v755_v55 = vor.u32 %v753_v31, %v752_v42  ;;  %v757_v57 = vrot.slane %v752_v42, 4  ;;  %v764_v58 = vor.u32 %v762_v35, %v761_v43 }
  0x76   : > { %965 = vst [vmem:[#allocation2 + $0x84] sm:$0xf] %v964_v49  ;;  %v765_v59 = vrot.slane %v761_v43, 4  ;;  %v769_v60 = vrot.slane %v767_v44, 7  ;;  %v779_v62 = vshll.u32 %v5552_v37, 16  ;;  %v5553_v63 = vpack.c.bf16 %v466_v46, %v466_v46  ;;  %v472_v31 = vld [vmem:[%s6022_s26 + $0xf8] sm:$0xff] }
  0x77   : > { %v778_v61 = vrot.slane %v776_v53, 7  ;;  %v756_v0 = vsel %vm6043_vm8, %v748_v41, %v755_v55  ;;  %v968_v2 = vsel %vm5799_vm3, %v757_v57, %v967_v50  ;;  %v971_v3 = vsel %vm6037_vm7, %v764_v58, %v970_v52  ;;  %v984_v41 = vld [vmem:[#allocation2 + $0xa8] sm:$0xf] }
  0x78   : > { %v5554_v18 = vpack.c.bf16 %v467_v54, %v467_v54  ;;  %966 = vst.msk [vmem:[#allocation2 + $0x88] sm:$0xf] %vm226_vm2, %v756_v0  ;;  %969 = vst [vmem:[#allocation2 + $0x8c] sm:$0x1] %v968_v2  ;;  %v772_v20 = vor.u32 %v770_v45, %v769_v60  ;;  %v774_v21 = vrot.slane %v769_v60, 4  ;;  %v784_v26 = vshrl.u32 %v5553_v63, 16 }
  0x79   : > { %972 = vst [vmem:[#allocation2 + $0x90] sm:$0xf] %v971_v3  ;;  %v781_v22 = vor.u32 %v779_v62, %v778_v61  ;;  %v782_v23 = vrot.slane %v778_v61, 4  ;;  %v787_v27 = vshll.u32 %v5553_v63, 16  ;;  %v5555_v35 = vpack.c.bf16 %v468_v19, %v468_v19  ;;  %v991_v2 = vld [vmem:[#allocation2 + $0xb4] sm:$0xf] }
  0x7a   : > { %v793_v29 = vshrl.u32 %v5554_v18, 16  ;;  %v796_v30 = vshll.u32 %v5554_v18, 16  ;;  %v773_v32 = vsel %vm6043_vm8, %v765_v59, %v772_v20  ;;  %v975_v33 = vsel %vm5799_vm3, %v774_v21, %v974_v16  ;;  %v988_v59 = vld [vmem:[#allocation2 + $0xb0] sm:$0x1] }
  0x7b   : > { %v978_v34 = vsel %vm6037_vm7, %v781_v22, %v977_v17  ;;  %973 = vst.msk [vmem:[#allocation2 + $0x94] sm:$0xf] %vm226_vm2, %v773_v32  ;;  %976 = vst [vmem:[#allocation2 + $0x98] sm:$0x1] %v975_v33  ;;  %v786_v36 = vrot.slane %v784_v26, 7  ;;  %v5556_v38 = vpack.c.bf16 %v469_v24, %v469_v24  ;;  %v5557_v39 = vpack.c.bf16 %v470_v25, %v470_v25 }
  0x7c   : > { %979 = vst [vmem:[#allocation2 + $0x9c] sm:$0xf] %v978_v34  ;;  %v795_v37 = vrot.slane %v793_v29, 7  ;;  %v801_v42 = vshrl.u32 %v5555_v35, 16  ;;  %v804_v43 = vshll.u32 %v5555_v35, 16  ;;  %v5558_v44 = vpack.c.bf16 %v471_v28, %v471_v28 }
  0x7d   : > { %v5559_v45 = vpack.c.bf16 %v472_v31, %v472_v31  ;;  %v789_v46 = vor.u32 %v787_v27, %v786_v36  ;;  %v791_v47 = vrot.slane %v786_v36, 4  ;;  %v810_v52 = vshrl.u32 %v5556_v38, 16  ;;  %v1002_v34 = vld [vmem:[#allocation2 + $0xc8] sm:$0x1] }
  0x7e   : > { %v798_v48 = vor.u32 %v796_v30, %v795_v37  ;;  %v799_v49 = vrot.slane %v795_v37, 4  ;;  %v803_v50 = vrot.slane %v801_v42, 7  ;;  %v813_v53 = vshll.u32 %v5556_v38, 16  ;;  %v998_v30 = vld [vmem:[#allocation2 + $0xc0] sm:$0xf] }
  0x7f   : > { %v818_v54 = vshrl.u32 %v5557_v39, 16  ;;  %v790_v55 = vsel %vm6043_vm8, %v782_v23, %v789_v46  ;;  %v982_v57 = vsel %vm5799_vm3, %v791_v47, %v981_v40  ;;  %v821_v60 = vshll.u32 %v5557_v39, 16  ;;  %v995_v23 = vld [vmem:[#allocation2 + $0xbc] sm:$0x1] }
  0x80   : > { %v985_v58 = vsel %vm6037_vm7, %v798_v48, %v984_v41  ;;  %980 = vst.msk [vmem:[#allocation2 + $0xa0] sm:$0xf] %vm226_vm2, %v790_v55  ;;  %983 = vst [vmem:[#allocation2 + $0xa4] sm:$0x1] %v982_v57  ;;  %v806_v61 = vor.u32 %v804_v43, %v803_v50  ;;  %v808_v62 = vrot.slane %v803_v50, 4  ;;  %v812_v63 = vrot.slane %v810_v52, 7 }
  0x81   : > { %986 = vst [vmem:[#allocation2 + $0xa8] sm:$0xf] %v985_v58  ;;  %v820_v0 = vrot.slane %v818_v54, 7  ;;  %v827_v3 = vshrl.u32 %v5558_v44, 16  ;;  %v830_v16 = vshll.u32 %v5558_v44, 16  ;;  %v835_v17 = vshrl.u32 %v5559_v45, 16 }
  0x82   : > { %v838_v18 = vshll.u32 %v5559_v45, 16  ;;  %v807_v19 = vsel %vm6043_vm8, %v799_v49, %v806_v61  ;;  %v989_v20 = vsel %vm5799_vm3, %v808_v62, %v988_v59  ;;  %v815_v21 = vor.u32 %v813_v53, %v812_v63 }
  0x83   : > { %v816_v22 = vrot.slane %v812_v63, 4  ;;  %987 = vst.msk [vmem:[#allocation2 + $0xac] sm:$0xf] %vm226_vm2, %v807_v19  ;;  %990 = vst [vmem:[#allocation2 + $0xb0] sm:$0x1] %v989_v20  ;;  %v823_v24 = vor.u32 %v821_v60, %v820_v0  ;;  %v825_v25 = vrot.slane %v820_v0, 4 }
  0x84   : > { %v829_v26 = vrot.slane %v827_v3, 7  ;;  %v837_v27 = vrot.slane %v835_v17, 7  ;;  %v992_v29 = vsel %vm6037_vm7, %v815_v21, %v991_v2 }
  0x85   : > { %993 = vst [vmem:[#allocation2 + $0xb4] sm:$0xf] %v992_v29  ;;  %v824_v28 = vsel %vm6043_vm8, %v816_v22, %v823_v24  ;;  %v996_v31 = vsel %vm5799_vm3, %v825_v25, %v995_v23 }
  0x86   : > { %v832_v32 = vor.u32 %v830_v16, %v829_v26  ;;  %v833_v33 = vrot.slane %v829_v26, 4  ;;  %994 = vst.msk [vmem:[#allocation2 + $0xb8] sm:$0xf] %vm226_vm2, %v824_v28  ;;  %997 = vst [vmem:[#allocation2 + $0xbc] sm:$0x1] %v996_v31  ;;  %v840_v35 = vor.u32 %v838_v18, %v837_v27  ;;  %v842_v36 = vrot.slane %v837_v27, 4 }
  0x88   : > { %v999_v37 = vsel %vm6037_vm7, %v832_v32, %v998_v30  ;;  %v841_v38 = vsel %vm6043_vm8, %v833_v33, %v840_v35  ;;  %v1003_v39 = vsel %vm5799_vm3, %v842_v36, %v1002_v34 }
  0x89   : > { %1000 = vst [vmem:[#allocation2 + $0xc0] sm:$0xf] %v999_v37  ;;  %1001 = vst.msk [vmem:[#allocation2 + $0xc4] sm:$0xf] %vm226_vm2, %v841_v38 }
  0x8a   : > { %1004 = vst [vmem:[#allocation2 + $0xc8] sm:$0x1] %v1003_v39 }
  0x8b LB: >> { %s5560_s20 = smul.u32 96, %s5736_s19  ;;  %vm1083_vm9 = vsmask.f32 3328  ;;  %vm1084_vm10 = vsmask.f32 7440  ;;  %s5743_s6 = smov 4   ;;  %s5736_s19 = sphi %s6185_s19, %s1022_s19  }
  0x8c   : >> { %vm6204_vm11 = vmor %vm1083_vm9, %vm1084_vm10  ;;  %vm1391_vm12 = vcmask 1042432   ;;  %vm1392_vm13 = vcmask 1046532   ;;  %s5744_s7 = smov 8   ;;  %s5745_s8 = smov 12   ;;  %vm1326_vm15 = vcmask 60448   ;;  %vm2719_vm0 = vcmask 1041408  }
  0x8d   : >> { %s6193_s30 = scalar_lea.vmem [#allocation2], %s5560_s20  ;;  %vm6237_vm14 = vmor %vm1391_vm12, %vm1392_vm13  ;;  %s5746_s9 = smov 16   ;;  %vm1498_vm1 = vcmask 93248   ;;  %vm1599_vm4 = vcmask 126048   ;;  %vm1880_vm5 = vcmask 158848   ;;  %vm2049_vm6 = vcmask 191648  }
  0x8e   : >> { %s5747_s10 = smov 20   ;;  %s5748_s11 = smov 24   ;;  %vm2150_vm9 = vcmask 224448   ;;  %vm2431_vm10 = vcmask 257248   ;;  %vm2600_vm12 = vcmask 290048   ;;  %vm2694_vm13 = vcmask 293888  }
  0x8f   : >> { %s5749_s12 = smov 28   ;;  %s5750_s13 = smov 32  }
  0x90   : >> { %s6956_s14 = scalar_lea.vmem [#allocation3], %s5560_s20  ;;  %s1022_s19 = sadd.s32 1, %s5736_s19  }
  0x91   : >> { %v1071_v40 = vld [vmem:[%s6193_s30 + $0x30] sm:$0xf]  ;;  %v1072_v41 = vld [vmem:[%s6193_s30 + $0x34] sm:$0xf]  ;;  %v1059_v42 = vld [vmem:[%s6193_s30] sm:$0xf] }
  0x92   : >> { %v1183_v43 = vshrl.u32 %v1071_v40, 16  ;;  %v1186_v44 = vshll.u32 %v1071_v40, 16  ;;  %v1192_v45 = vshll.u32 %v1072_v41, 16  ;;  %v1196_v46 = vshrl.u32 %v1072_v41, 16  ;;  %v1060_v47 = vld [vmem:[%s6193_s30 + $0x4] sm:$0xf] }
  0x93   : >> { %v1087_v48 = vshrl.u32 %v1059_v42, 16  ;;  %v1090_v49 = vshll.u32 %v1059_v42, 16  ;;  %v1096_v50 = vshll.u32 %v1060_v47, 16  ;;  %v1100_v52 = vshrl.u32 %v1060_v47, 16  ;;  %v1073_v53 = vld [vmem:[%s6193_s30 + $0x38] sm:$0x1] }
  0x94   : >> { %v1185_v54 = vrot.slane %v1183_v43, 4  ;;  %v1188_v55 = vrot.slane %v1186_v44, 5  ;;  %v1194_v57 = vrot.slane %v1192_v45, 5  ;;  %v1198_v58 = vrot.slane %v1196_v46, 4  ;;  %v1061_v59 = vld [vmem:[%s6193_s30 + $0x8] sm:$0x1] }
  0x95   : >> { %v1089_v60 = vrot.slane %v1087_v48, 4  ;;  %v1092_v61 = vrot.slane %v1090_v49, 5  ;;  %v1098_v62 = vrot.slane %v1096_v50, 5  ;;  %v1102_v63 = vrot.slane %v1100_v52, 4  ;;  %v1063_v0 = vld [vmem:[%s6193_s30 + $0x10] sm:$0xf] }
  0x96   : >> { %v1189_v2 = vor.u32 %v1188_v55, %v1185_v54  ;;  %v1199_v3 = vor.u32 %v1198_v58, %v1194_v57  ;;  %v1202_v16 = vshll.u32 %v1073_v53, 16  ;;  %v1106_v17 = vshll.u32 %v1061_v59, 16  ;;  %v1064_v21 = vld [vmem:[%s6193_s30 + $0x14] sm:$0x1]  ;;  %v1062_v24 = vld [vmem:[%s6193_s30 + $0xc] sm:$0xf] }
  0x97   : >> { %v1093_v19 = vor.u32 %v1092_v61, %v1089_v60  ;;  %v1103_v20 = vor.u32 %v1102_v63, %v1098_v62  ;;  %v1120_v22 = vshll.u32 %v1063_v0, 16  ;;  %v1124_v23 = vshrl.u32 %v1063_v0, 16  ;;  %v1075_v33 = vld [vmem:[%s6193_s30 + $0x40] sm:$0xf]  ;;  %v1076_v38 = vld [vmem:[%s6193_s30 + $0x44] sm:$0x1] }
  0x98   : >> { %v1190_v25 = vrot.slane %v1189_v2, 4  ;;  %v1200_v26 = vrot.slane %v1199_v3, 4  ;;  %v1204_v27 = vrot.slane %v1202_v16, 5  ;;  %v1108_v29 = vrot.slane %v1106_v17, 5  ;;  %v1074_v39 = vld [vmem:[%s6193_s30 + $0x3c] sm:$0xf] }
  0x99   : >> { %v1094_v30 = vrot.slane %v1093_v19, 4  ;;  %v1104_v28 = vrot.slane %v1103_v20, 4  ;;  %v1122_v31 = vrot.slane %v1120_v22, 5  ;;  %v1126_v32 = vrot.slane %v1124_v23, 4  ;;  %v1344_v48 = vld [vmem:[%s6193_s30 + $0x4] sm:$0xf] }
  0x9a   : >> { %v1195_v34 = vsel %vm6204_vm11, %v1190_v25, %v1194_v57  ;;  %v1205_v35 = vsel %vm6204_vm11, %v1200_v26, %v1204_v27  ;;  %v1130_v36 = vshll.u32 %v1064_v21, 16  ;;  %v1111_v37 = vshrl.u32 %v1062_v24, 16  ;;  %v1345_v3 = vld [vmem:[%s6193_s30 + $0x8] sm:$0x1]  ;;  %v1356_v16 = vld [vmem:[%s6193_s30 + $0x34] sm:$0xf] }
  0x9b   : >> { %1294 = vrot.lane.b32.xlu1 %v1195_v34, %s5743_s6  ;;  %v1099_v40 = vsel %vm6204_vm11, %v1094_v30, %v1098_v62  ;;  %v1109_v41 = vsel %vm6204_vm11, %v1104_v28, %v1108_v29  ;;  %v1127_v42 = vor.u32 %v1126_v32, %v1122_v31  ;;  %v1114_v43 = vshll.u32 %v1062_v24, 16  ;;  %v1343_v20 = vld [vmem:[%s6193_s30] sm:$0xe]  ;;  %v1357_v30 = vld [vmem:[%s6193_s30 + $0x38] sm:$0x1]  ;;  %p1019_p4 = scmp.ge.s32.totalorder %s1022_s19, 2  }
  0x9c   : >> { %1278 = vrot.lane.b32.xlu0 %v1099_v40, %s5743_s6  ;;  %v1132_v44 = vrot.slane %v1130_v36, 5  ;;  %v1113_v45 = vrot.slane %v1111_v37, 4  ;;  %v1216_v46 = vshll.u32 %v1075_v33, 16  ;;  %v1220_v47 = vshrl.u32 %v1075_v33, 16  ;;  %v1347_v28 = vld [vmem:[%s6193_s30 + $0x10] sm:$0xf] }
  0x9d   : >> { %v1128_v49 = vrot.slane %v1127_v42, 4  ;;  %v1116_v50 = vrot.slane %v1114_v43, 5  ;;  %v1226_v52 = vshll.u32 %v1076_v38, 16  ;;  %v1207_v53 = vshrl.u32 %v1074_v39, 16  ;;  %v1355_v32 = vld [vmem:[%s6193_s30 + $0x30] sm:$0xe] }
  0x9e   : >> { %v1218_v54 = vrot.slane %v1216_v46, 5  ;;  %v1222_v55 = vrot.slane %v1220_v47, 4  ;;  %v1210_v57 = vshll.u32 %v1074_v39, 16  ;;  %v1396_v60 = vrot.slane %v1344_v48, 5  ;;  %v1348_v39 = vld [vmem:[%s6193_s30 + $0x14] sm:$0x1] }
  0x9f   : >> { %1296 = vrot.lane.b32.xlu1 %v1205_v35, %s5743_s6  ;;  %v1117_v58 = vor.u32 %v1116_v50, %v1113_v45  ;;  %v1209_v59 = vrot.slane %v1207_v53, 4  ;;  %v1133_v61 = vsel %vm6204_vm11, %v1128_v49, %v1132_v44  ;;  %v1228_v63 = vrot.slane %v1226_v52, 5  ;;  %v1359_v40 = vld [vmem:[%s6193_s30 + $0x40] sm:$0xf]  ;;  %v1360_v48 = vld [vmem:[%s6193_s30 + $0x44] sm:$0x1] }
  0xa0   : >> { %1280 = vrot.lane.b32.xlu0 %v1109_v41, %s5743_s6  ;;  %v1223_v62 = vor.u32 %v1222_v55, %v1218_v54  ;;  %v1212_v0 = vrot.slane %v1210_v57, 5  ;;  %v1398_v22 = vrot.slane %v1396_v60, 4  ;;  %v1399_v25 = vrot.slane %v1345_v3, 5  ;;  %v1346_v41 = vld [vmem:[%s6193_s30 + $0xc] sm:$0xe]  ;;  %s7067_s15 = smov (%p1019_p4), 0  }
  0xa1   : >> { %v1118_v2 = vrot.slane %v1117_v58, 4  ;;  %v1424_v26 = vrot.slane %v1356_v16, 5  ;;  %v5110_v29 = vrot.slane %v1343_v20, 9  ;;  %v1427_v35 = vrot.slane %v1357_v30, 5  ;;  %v1358_v49 = vld [vmem:[%s6193_s30 + $0x3c] sm:$0xe] }
  0xa2   : >> { %v1224_v17 = vrot.slane %v1223_v62, 4  ;;  %v1213_v19 = vor.u32 %v1212_v0, %v1209_v59  ;;  %v1400_v33 = vsel %vm6237_vm14, %v1398_v22, %v1399_v25  ;;  %v1403_v36 = vrot.slane %v1347_v28, 5  ;;  %v5137_v57 = vld [vmem:[%s6193_s30 + $0x10] sm:$0xf]  ;;  %v5136_v59 = vld [vmem:[%s6193_s30 + $0xc] sm:$0xf] }
  0xa3   : >> { %1284 = vrot.lane.b32.xlu1 %v1133_v61, %s5743_s6  ;;  %v1123_v21 = vsel %vm6204_vm11, %v1118_v2, %v1122_v31  ;;  %v1426_v34 = vrot.slane %v1424_v26, 4  ;;  %v1397_v37 = vsel %vm6237_vm14, %v5110_v29, %v1396_v60  ;;  %v5114_v38 = vrot.slane %v1355_v32, 9  ;;  %v5149_v2 = vld [vmem:[%s6193_s30 + $0x40] sm:$0xf]  ;;  %v5121_v3 = vld [vmem:[%s6193_s30 + $0x10] sm:$0xf] }
  0xa4   : >> { %1282 = vrot.lane.b32.xlu0 %v1123_v21, %s5743_s6  ;;  %v1229_v23 = vsel %vm6204_vm11, %v1224_v17, %v1228_v63  ;;  %v1214_v24 = vrot.slane %v1213_v19, 4  ;;  %v1405_v43 = vrot.slane %v1403_v36, 4  ;;  %v1406_v44 = vrot.slane %v1348_v39, 5  ;;  %v5120_v16 = vld [vmem:[%s6193_s30 + $0xc] sm:$0xf] }
  0xa5   : >> { %v1428_v42 = vsel %vm6237_vm14, %v1426_v34, %v1427_v35  ;;  %v1431_v45 = vrot.slane %v1359_v40, 5  ;;  %v1425_v46 = vsel %vm6237_vm14, %v5114_v38, %v1424_v26  ;;  %v5111_v47 = vrot.slane %v1346_v41, 9  ;;  %v5148_v17 = vld [vmem:[%s6193_s30 + $0x3c] sm:$0xf]  ;;  %v5138_v21 = vld [vmem:[%s6193_s30 + $0x14] sm:$0x1] }
  0xa6   : >> { %v1219_v31 = vsel %vm6204_vm11, %v1214_v24, %v1218_v54  ;;  %v1407_v50 = vsel %vm6237_vm14, %v1405_v43, %v1406_v44  ;;  %v1434_v53 = vrot.slane %v1360_v48, 5  ;;  %v5115_v55 = vrot.slane %v1358_v49, 9  ;;  %v5129_v26 = vld [vmem:[%s6193_s30 + $0x40] sm:$0xf]  ;;  %v5140_v28 = vld [vmem:[%s6193_s30 + $0x1c] sm:$0xf] }
  0xa7   : >> { %1300 = vrot.lane.b32.xlu1 %v1229_v23, %s5743_s6  ;;  %v1433_v52 = vrot.slane %v1431_v45, 4  ;;  %v1404_v54 = vsel %vm6237_vm14, %v5111_v47, %v1403_v36  ;;  %v1650_v61 = vshll.u32 %v5137_v57, 16  ;;  %v1654_v62 = vshrl.u32 %v5137_v57, 16  ;;  %v5139_v34 = vld [vmem:[%s6193_s30 + $0x18] sm:$0xf] }
  0xa8   : >> { %1298 = vrot.lane.b32.xlu0 %v1219_v31, %s5743_s6  ;;  %v1432_v60 = vsel %vm6237_vm14, %v5115_v55, %v1431_v45  ;;  %v1641_v63 = vshrl.u32 %v5136_v59, 16  ;;  %v1644_v0 = vshll.u32 %v5136_v59, 16  ;;  %v1746_v20 = vshll.u32 %v5149_v2, 16  ;;  %v5128_v31 = vld [vmem:[%s6193_s30 + $0x3c] sm:$0xf] }
  0xa9   : >> { %v1435_v58 = vsel %vm6237_vm14, %v1433_v52, %v1434_v53  ;;  %v6283_v19 = vrot.slane %v1650_v61, 5  ;;  %v1656_v22 = vrot.slane %v1654_v62, 4  ;;  %v1750_v25 = vshrl.u32 %v5149_v2, 16  ;;  %v5123_v40 = vld [vmem:[%s6193_s30 + $0x1c] sm:$0xf] }
  0xaa   : >> { %v1643_v23 = vrot.slane %v1641_v63, 4  ;;  %v1646_v24 = vrot.slane %v1644_v0, 5  ;;  %v1737_v29 = vshrl.u32 %v5148_v17, 16  ;;  %v1740_v30 = vshll.u32 %v5148_v17, 16  ;;  %v5122_v44 = vld [vmem:[%s6193_s30 + $0x18] sm:$0xf] }
  0xab   : >> { %1452 = vrot.lane.b32.xlu1 %v1400_v33, %s5744_s7  ;;  %v1660_v32 = vshll.u32 %v5138_v21, 16  ;;  %v6291_v33 = vrot.slane %v1746_v20, 5  ;;  %v1657_v35 = vor.u32 %v1656_v22, %v6283_v19  ;;  %v1752_v38 = vrot.slane %v1750_v25, 4  ;;  %v5152_v47 = vld [vmem:[%s6193_s30 + $0x4c] sm:$0xf] }
  0xac   : >> { %1450 = vrot.lane.b32.xlu0 %v1397_v37, %s5744_s7  ;;  %v1647_v36 = vor.u32 %v1646_v24, %v1643_v23  ;;  %v5150_v37 = vld [vmem:[%s6193_s30 + $0x44] sm:$0x1]  ;;  %v1674_v39 = vshll.u32 %v5140_v28, 16  ;;  %v1739_v41 = vrot.slane %v1737_v29, 4  ;;  %v1678_v43 = vshrl.u32 %v5140_v28, 16 }
  0xad   : >> { %v1665_v45 = vshrl.u32 %v5139_v34, 16  ;;  %v1662_v48 = vrot.slane %v1660_v32, 5  ;;  %v1756_v49 = vshll.u32 %v5150_v37, 16  ;;  %v5131_v52 = vld [vmem:[%s6193_s30 + $0x4c] sm:$0xf]  ;;  %v1658_v53 = vrot.slane %v1657_v35, 4 }
  0xae   : >> { %v1753_v55 = vor.u32 %v1752_v38, %v6291_v33  ;;  %v1676_v57 = vrot.slane %v1674_v39, 5  ;;  %v5141_v59 = vld [vmem:[%s6193_s30 + $0x20] sm:$0x1]  ;;  %v1770_v61 = vshll.u32 %v5152_v47, 16  ;;  %v1774_v62 = vshrl.u32 %v5152_v47, 16 }
  0xaf   : >> { %1468 = vrot.lane.b32.xlu1 %v1428_v42, %s5744_s7  ;;  %v1742_v42 = vrot.slane %v1740_v30, 5  ;;  %v5130_v63 = vld [vmem:[%s6193_s30 + $0x48] sm:$0xf]  ;;  %v1667_v0 = vrot.slane %v1665_v45, 4  ;;  %v1663_v17 = vsel %vm6204_vm11, %v1658_v53, %v1662_v48  ;;  %v1758_v21 = vrot.slane %v1756_v49, 5 }
  0xb0   : >> { %1466 = vrot.lane.b32.xlu0 %v1425_v46, %s5744_s7  ;;  %v1668_v46 = vshll.u32 %v5139_v34, 16  ;;  %v1754_v20 = vrot.slane %v1753_v55, 4  ;;  %v1684_v22 = vshll.u32 %v5141_v59, 16  ;;  %v5153_v25 = vld [vmem:[%s6193_s30 + $0x50] sm:$0x1]  ;;  %v1776_v29 = vrot.slane %v1774_v62, 4 }
  0xb1   : >> { %v1035_v34 = vld [vmem:[%s6193_s30 + $0x30] sm:$0xf]  ;;  %v1027_v35 = vld [vmem:[%s6193_s30] sm:$0xf]  ;;  %v1780_v39 = vshll.u32 %v5153_v25, 16 }
  0xb2   : >> { %v1670_v2 = vrot.slane %v1668_v46, 5  ;;  %1051 = vst.msk [vmem:[#allocation4 + $0x20] sm:$0xf] %vm226_vm2, %v1035_v34  ;;  %1043 = vst.msk [vmem:[#allocation4] sm:$0xf] %vm226_vm2, %v1027_v35 }
  0xb3   : >> { %1456 = vrot.lane.b32.xlu1 %v1407_v50, %s5744_s7  ;;  %v5151_v50 = vld [vmem:[%s6193_s30 + $0x48] sm:$0xf]  ;;  %v1028_v45 = vld [vmem:[%s6193_s30 + $0x4] sm:$0xf]  ;;  %v1782_v47 = vrot.slane %v1780_v39, 5 }
  0xb4   : >> { %1454 = vrot.lane.b32.xlu0 %v1404_v54, %s5744_s7  ;;  %v1648_v54 = vrot.slane %v1647_v36, 4  ;;  %v1671_v28 = vor.u32 %v1670_v2, %v1667_v0  ;;  %v1686_v36 = vrot.slane %v1684_v22, 5  ;;  %1044 = vst.msk [vmem:[#allocation4 + $0x4] sm:$0xf] %vm226_vm2, %v1028_v45  ;;  %v5173_v53 = vld [vmem:[%s6193_s30 + $0x40] sm:$0xf] }
  0xb5   : >> { %v1030_v55 = vld [vmem:[%s6193_s30 + $0x10] sm:$0xf]  ;;  %v5174_v0 = vld [vmem:[%s6193_s30 + $0x44] sm:$0x1]  ;;  %v5164_v2 = vld [vmem:[%s6193_s30 + $0x1c] sm:$0xf] }
  0xb6   : >> { %v1653_v23 = vsel %vm6204_vm11, %v1648_v54, %v6283_v19  ;;  %v1759_v19 = vsel %vm6204_vm11, %v1754_v20, %v1758_v21  ;;  %v5160_v54 = vld [vmem:[%s6193_s30 + $0xc] sm:$0xe]  ;;  %1046 = vst.msk [vmem:[#allocation4 + $0xc] sm:$0xf] %vm226_vm2, %v1030_v55  ;;  %v1978_v22 = vrot.slane %v5174_v0, 5 }
  0xb7   : >> { %1472 = vrot.lane.b32.xlu1 %v1435_v58, %s5744_s7  ;;  %v1743_v58 = vor.u32 %v1742_v42, %v1739_v41  ;;  %v1672_v41 = vrot.slane %v1671_v28, 4 }
  0xb8   : >> { %1470 = vrot.lane.b32.xlu0 %v1432_v60, %s5744_s7  ;;  %v1680_v60 = vrot.slane %v1678_v43, 4  ;;  %v5161_v43 = vld [vmem:[%s6193_s30 + $0x10] sm:$0xf] }
  0xb9   : >> { %v1744_v30 = vrot.slane %v1743_v58, 4  ;;  %v1947_v48 = vrot.slane %v5161_v43, 5  ;;  %v1677_v49 = vsel %vm6204_vm11, %v1672_v41, %v1676_v57  ;;  %v1029_v58 = vld [vmem:[%s6193_s30 + $0xc] sm:$0xf]  ;;  %v5211_v43 = vld [vmem:[%s6193_s30 + $0x1c] sm:$0xf] }
  0xba   : >> { %v1681_v24 = vor.u32 %v1680_v60, %v1676_v57  ;;  %1045 = vst.msk [vmem:[#allocation4 + $0x8] sm:$0xf] %vm226_vm2, %v1029_v58  ;;  %v5212_v58 = vld [vmem:[%s6193_s30 + $0x20] sm:$0x1] }
  0xbb   : >> { %1553 = vrot.lane.b32.xlu1 %v5121_v3, %s5745_s8  ;;  %v1761_v3 = vshrl.u32 %v5151_v50, 16  ;;  %v1949_v59 = vrot.slane %v1947_v48, 4 }
  0xbc   : >> { %1551 = vrot.lane.b32.xlu0 %v5120_v16, %s5745_s8  ;;  %v1764_v16 = vshll.u32 %v5151_v50, 16  ;;  %v1682_v37 = vrot.slane %v1681_v24, 4 }
  0xbe   : >> { %v1766_v32 = vrot.slane %v1764_v16, 5  ;;  %v1687_v46 = vsel %vm6204_vm11, %v1682_v37, %v1686_v36  ;;  %v1038_v16 = vld [vmem:[%s6193_s30 + $0x40] sm:$0xf]  ;;  %v5175_v37 = vld [vmem:[%s6193_s30 + $0x48] sm:$0xe] }
  0xbf   : >> { %1569 = vrot.lane.b32.xlu1 %v5129_v26, %s5745_s8  ;;  %v1772_v26 = vrot.slane %v1770_v61, 5  ;;  %v1975_v61 = vrot.slane %v5173_v53, 5  ;;  %1054 = vst.msk [vmem:[#allocation4 + $0x2c] sm:$0xf] %vm226_vm2, %v1038_v16  ;;  %v5222_v53 = vld [vmem:[%s6193_s30 + $0x48] sm:$0xf] }
  0xc0   : >> { %1567 = vrot.lane.b32.xlu0 %v5128_v31, %s5745_s8  ;;  %v1763_v31 = vrot.slane %v1761_v3, 4  ;;  %v5172_v3 = vld [vmem:[%s6193_s30 + $0x3c] sm:$0xe]  ;;  %v5214_v16 = vld [vmem:[%s6193_s30 + $0x28] sm:$0xf] }
  0xc1   : >> { %v1777_v38 = vor.u32 %v1776_v29, %v1772_v26  ;;  %v1977_v21 = vrot.slane %v1975_v61, 4  ;;  %v5188_v25 = vrot.slane %v5172_v3, 9  ;;  %v5176_v29 = vld [vmem:[%s6193_s30 + $0x4c] sm:$0xf]  ;;  %v5202_v3 = vld [vmem:[%s6193_s30 + $0x48] sm:$0xf] }
  0xc2   : >> { %v1767_v42 = vor.u32 %v1766_v32, %v1763_v31  ;;  %v1982_v34 = vrot.slane %v5176_v29, 5 }
  0xc3   : >> { %1557 = vrot.lane.b32.xlu1 %v5123_v40, %s5745_s8  ;;  %v1749_v40 = vsel %vm6204_vm11, %v1744_v30, %v6291_v33  ;;  %v1778_v33 = vrot.slane %v1777_v38, 4  ;;  %v5163_v30 = vld [vmem:[%s6193_s30 + $0x18] sm:$0xe]  ;;  %v1979_v28 = vsel %vm6237_vm14, %v1977_v21, %v1978_v22  ;;  %v1976_v35 = vsel %vm6237_vm14, %v5188_v25, %v1975_v61  ;;  %v5213_v21 = vld [vmem:[%s6193_s30 + $0x24] sm:$0xf] }
  0xc4   : >> { %1555 = vrot.lane.b32.xlu0 %v5122_v44, %s5745_s8  ;;  %v1036_v44 = vld [vmem:[%s6193_s30 + $0x34] sm:$0xf]  ;;  %v1768_v50 = vrot.slane %v1767_v42, 4  ;;  %v5185_v36 = vrot.slane %v5163_v30, 9  ;;  %v1984_v39 = vrot.slane %v1982_v34, 4  ;;  %v5189_v42 = vrot.slane %v5175_v37, 9 }
  0xc5   : >> { %1052 = vst.msk [vmem:[#allocation4 + $0x24] sm:$0xf] %vm226_vm2, %v1036_v44  ;;  %v1783_v57 = vsel %vm6204_vm11, %v1778_v33, %v1782_v47  ;;  %v2201_v33 = vshll.u32 %v5211_v43, 16  ;;  %v5195_v47 = vld [vmem:[%s6193_s30 + $0x1c] sm:$0xf]  ;;  %v2288_v61 = vshrl.u32 %v5222_v53, 16 }
  0xc6   : >> { %v1773_v62 = vsel %vm6204_vm11, %v1768_v50, %v1772_v26  ;;  %v5165_v26 = vld [vmem:[%s6193_s30 + $0x20] sm:$0x1]  ;;  %v1983_v45 = vsel %vm6237_vm14, %v5189_v42, %v1982_v34  ;;  %v5196_v34 = vld [vmem:[%s6193_s30 + $0x24] sm:$0xf] }
  0xc7   : >> { %1573 = vrot.lane.b32.xlu1 %v5131_v52, %s5745_s8  ;;  %v5162_v52 = vld [vmem:[%s6193_s30 + $0x14] sm:$0x1]  ;;  %v1957_v32 = vrot.slane %v5165_v26, 5  ;;  %v6395_v55 = vrot.slane %v2201_v33, 5  ;;  %v2290_v26 = vrot.slane %v2288_v61, 4 }
  0xc8   : >> { %1571 = vrot.lane.b32.xlu0 %v5130_v63, %s5745_s8  ;;  %v1950_v60 = vrot.slane %v5162_v52, 5  ;;  %v5184_v63 = vrot.slane %v5160_v54, 9  ;;  %v5223_v52 = vld [vmem:[%s6193_s30 + $0x4c] sm:$0xf]  ;;  %v5194_v54 = vld [vmem:[%s6193_s30 + $0x18] sm:$0xf] }
  0xca   : >> { %v1951_v20 = vsel %vm6237_vm14, %v1949_v59, %v1950_v60  ;;  %v1948_v24 = vsel %vm6237_vm14, %v5184_v63, %v1947_v48  ;;  %v2205_v48 = vshrl.u32 %v5211_v43, 16  ;;  %v2297_v59 = vshll.u32 %v5223_v52, 16 }
  0xcb   : >> { %1834 = vrot.lane.b32.xlu1 %v1663_v17, %s5746_s9  ;;  %v1037_v17 = vld [vmem:[%s6193_s30 + $0x3c] sm:$0xf]  ;;  %v2301_v60 = vshrl.u32 %v5223_v52, 16 }
  0xcc   : >> { %1832 = vrot.lane.b32.xlu0 %v1653_v23, %s5746_s9  ;;  %v1954_v23 = vrot.slane %v5164_v2, 5  ;;  %1053 = vst.msk [vmem:[#allocation4 + $0x28] sm:$0xf] %vm226_vm2, %v1037_v17  ;;  %v2291_v2 = vshll.u32 %v5222_v53, 16  ;;  %v5197_v17 = vld [vmem:[%s6193_s30 + $0x28] sm:$0xf] }
  0xcd   : >> { %v2303_v25 = vrot.slane %v2301_v60, 4 }
  0xce   : >> { %v1956_v31 = vrot.slane %v1954_v23, 4  ;;  %v1955_v41 = vsel %vm6237_vm14, %v5185_v36, %v1954_v23  ;;  %v5224_v23 = vld [vmem:[%s6193_s30 + $0x50] sm:$0x1]  ;;  %v2293_v30 = vrot.slane %v2291_v2, 5  ;;  %v2219_v36 = vshll.u32 %v5213_v21, 16 }
  0xcf   : >> { %1850 = vrot.lane.b32.xlu1 %v1759_v19, %s5746_s9  ;;  %v5177_v19 = vld [vmem:[%s6193_s30 + $0x50] sm:$0x1]  ;;  %v2307_v37 = vshll.u32 %v5224_v23, 16 }
  0xd0   : >> { %1848 = vrot.lane.b32.xlu0 %v1749_v40, %s5746_s9  ;;  %v1958_v38 = vsel %vm6237_vm14, %v1956_v31, %v1957_v32  ;;  %v1985_v40 = vrot.slane %v5177_v19, 5  ;;  %v2229_v31 = vshrl.u32 %v5214_v16, 16  ;;  %v5226_v32 = vld [vmem:[%s6193_s30 + $0x58] sm:$0xf] }
  0xd1   : >> { %v2321_v42 = vshll.u32 %v5226_v32, 16  ;;  %v2325_v43 = vshrl.u32 %v5226_v32, 16  ;;  %v1065_v32 = vld [vmem:[%s6193_s30 + $0x18] sm:$0xf] }
  0xd2   : >> { %v1986_v44 = vsel %vm6237_vm14, %v1984_v39, %v1985_v40  ;;  %v5205_v39 = vld [vmem:[%s6193_s30 + $0x58] sm:$0xf] }
  0xd3   : >> { %1838 = vrot.lane.b32.xlu1 %v1687_v46, %s5746_s9  ;;  %v5210_v46 = vld [vmem:[%s6193_s30 + $0x18] sm:$0xf] }
  0xd4   : >> { %1836 = vrot.lane.b32.xlu0 %v1677_v49, %s5746_s9  ;;  %v2192_v49 = vshrl.u32 %v5210_v46, 16  ;;  %v2195_v50 = vshll.u32 %v5210_v46, 16  ;;  %v2294_v46 = vor.u32 %v2293_v30, %v2290_v26 }
  0xd6   : >> { %v2194_v63 = vrot.slane %v2192_v49, 4  ;;  %v2197_v0 = vrot.slane %v2195_v50, 5  ;;  %v2221_v50 = vrot.slane %v2219_v36, 5  ;;  %v2295_v2 = vrot.slane %v2294_v46, 4  ;;  %v5236_v36 = vld [vmem:[%s6193_s30 + $0x20] sm:$0x1] }
  0xd7   : >> { %1854 = vrot.lane.b32.xlu1 %v1783_v57, %s5746_s9  ;;  %v2207_v57 = vrot.slane %v2205_v48, 4  ;;  %v5215_v48 = vld [vmem:[%s6193_s30 + $0x2c] sm:$0x1]  ;;  %v2501_v46 = vrot.slane %v5236_v36, 5  ;;  %v1032_v36 = vld [vmem:[%s6193_s30 + $0x1c] sm:$0xf] }
  0xd8   : >> { %1852 = vrot.lane.b32.xlu0 %v1773_v62, %s5746_s9  ;;  %v5203_v62 = vld [vmem:[%s6193_s30 + $0x4c] sm:$0xf]  ;;  %v2198_v29 = vor.u32 %v2197_v0, %v2194_v63  ;;  %v2235_v63 = vshll.u32 %v5215_v48, 16  ;;  %v5227_v0 = vld [vmem:[%s6193_s30 + $0x5c] sm:$0x1] }
  0xd9   : >> { %v2208_v22 = vor.u32 %v2207_v57, %v6395_v55  ;;  %v6423_v57 = vrot.slane %v2321_v42, 5  ;;  %v5247_v42 = vld [vmem:[%s6193_s30 + $0x4c] sm:$0xf]  ;;  %v5248_v48 = vld [vmem:[%s6193_s30 + $0x50] sm:$0x1] }
  0xda   : >> { %1048 = vst.msk [vmem:[#allocation4 + $0x14] sm:$0xf] %vm226_vm2, %v1032_v36 }
  0xdb   : >> { %2003 = vrot.lane.b32.xlu1 %v1951_v20, %s5747_s10  ;;  %v2211_v20 = vshll.u32 %v5212_v58, 16  ;;  %v2209_v40 = vrot.slane %v2208_v22, 4  ;;  %v2309_v58 = vrot.slane %v2307_v37, 5  ;;  %v5235_v22 = vld [vmem:[%s6193_s30 + $0x1c] sm:$0xf] }
  0xdc   : >> { %2001 = vrot.lane.b32.xlu0 %v1948_v24, %s5747_s10  ;;  %v6408_v24 = vrot.slane %v2297_v59, 5  ;;  %v2327_v59 = vrot.slane %v2325_v43, 4  ;;  %v1135_v43 = vshrl.u32 %v1065_v32, 16 }
  0xdd   : >> { %v2213_v19 = vrot.slane %v2211_v20, 5 }
  0xde   : >> { %v2328_v20 = vor.u32 %v2327_v59, %v6423_v57  ;;  %v2300_v26 = vsel %vm6204_vm11, %v2295_v2, %v6408_v24  ;;  %v2529_v2 = vrot.slane %v5248_v48, 5  ;;  %v6495_v48 = vld [vmem:[%s6193_s30 + $0x58] sm:$0xf] }
  0xdf   : >> { %2019 = vrot.lane.b32.xlu1 %v1979_v28, %s5747_s10  ;;  %v2225_v28 = vshll.u32 %v5214_v16, 16 }
  0xe0   : >> { %2017 = vrot.lane.b32.xlu0 %v1976_v35, %s5747_s10  ;;  %v2216_v35 = vshrl.u32 %v5213_v21, 16  ;;  %v2331_v21 = vshll.u32 %v5227_v0, 16 }
  0xe1   : >> { %v2227_v33 = vrot.slane %v2225_v28, 5  ;;  %v1066_v28 = vld [vmem:[%s6193_s30 + $0x1c] sm:$0xf] }
  0xe2   : >> { %v2218_v49 = vrot.slane %v2216_v35, 4  ;;  %v2333_v35 = vrot.slane %v2331_v21, 5  ;;  %v1144_v37 = vshll.u32 %v1066_v28, 16 }
  0xe3   : >> { %2007 = vrot.lane.b32.xlu1 %v1958_v38, %s5747_s10  ;;  %v5225_v38 = vld [vmem:[%s6193_s30 + $0x54] sm:$0xf] }
  0xe4   : >> { %2005 = vrot.lane.b32.xlu0 %v1955_v41, %s5747_s10  ;;  %v2304_v41 = vor.u32 %v2303_v25, %v6408_v24  ;;  %v2312_v52 = vshrl.u32 %v5225_v38, 16  ;;  %v2315_v53 = vshll.u32 %v5225_v38, 16  ;;  %v2237_v25 = vrot.slane %v2235_v63, 5  ;;  %v1078_v38 = vld [vmem:[%s6193_s30 + $0x4c] sm:$0xf] }
  0xe5   : >> { %v1148_v24 = vshrl.u32 %v1066_v28, 16  ;;  %v1137_v63 = vrot.slane %v1135_v43, 4  ;;  %v1068_v43 = vld [vmem:[%s6193_s30 + $0x24] sm:$0xf] }
  0xe6   : >> { %v2305_v61 = vrot.slane %v2304_v41, 4  ;;  %v2314_v16 = vrot.slane %v2312_v52, 4 }
  0xe7   : >> { %2023 = vrot.lane.b32.xlu1 %v1986_v44, %s5747_s10  ;;  %v5204_v44 = vld [vmem:[%s6193_s30 + $0x54] sm:$0xf]  ;;  %v1150_v59 = vrot.slane %v1148_v24, 4  ;;  %v1069_v24 = vld [vmem:[%s6193_s30 + $0x28] sm:$0xf] }
  0xe8   : >> { %2021 = vrot.lane.b32.xlu0 %v1983_v45, %s5747_s10  ;;  %v2199_v45 = vrot.slane %v2198_v29, 4 }
  0xea   : >> { %v2204_v60 = vsel %vm6204_vm11, %v2199_v45, %v6395_v55  ;;  %v2310_v55 = vsel %vm6204_vm11, %v2305_v61, %v2309_v58  ;;  %v6457_v58 = vrot.slane %v1144_v37, 5 }
  0xeb   : >> { %2104 = vrot.lane.b32.xlu1 %v5195_v47, %s5748_s11  ;;  %v2231_v47 = vrot.slane %v2229_v31, 4  ;;  %v2498_v31 = vrot.slane %v5235_v22, 5 }
  0xec   : >> { %2102 = vrot.lane.b32.xlu0 %v5194_v54, %s5748_s11  ;;  %v2214_v54 = vsel %vm6204_vm11, %v2209_v40, %v2213_v19 }
  0xed   : >> { %v2500_v45 = vrot.slane %v2498_v31, 4 }
  0xef   : >> { %2120 = vrot.lane.b32.xlu1 %v5203_v62, %s5748_s11  ;;  %v2232_v62 = vor.u32 %v2231_v47, %v2227_v33  ;;  %v5234_v47 = vld [vmem:[%s6193_s30 + $0x18] sm:$0xe] }
  0xf0   : >> { %2118 = vrot.lane.b32.xlu0 %v5202_v3, %s5748_s11  ;;  %v2222_v3 = vor.u32 %v2221_v50, %v2218_v49  ;;  %v1240_v49 = vshll.u32 %v1078_v38, 16  ;;  %v1244_v50 = vshrl.u32 %v1078_v38, 16  ;;  %v5258_v61 = vrot.slane %v5234_v47, 9  ;;  %v1031_v38 = vld [vmem:[%s6193_s30 + $0x18] sm:$0xf] }
  0xf1   : >> { %v2233_v23 = vrot.slane %v2232_v62, 4  ;;  %v1067_v62 = vld [vmem:[%s6193_s30 + $0x20] sm:$0x1]  ;;  %1047 = vst.msk [vmem:[#allocation4 + $0x10] sm:$0xf] %vm226_vm2, %v1031_v38 }
  0xf2   : >> { %v2223_v29 = vrot.slane %v2222_v3, 4  ;;  %v5246_v3 = vld [vmem:[%s6193_s30 + $0x48] sm:$0xe]  ;;  %v5237_v47 = vld [vmem:[%s6193_s30 + $0x24] sm:$0xe] }
  0xf3   : >> { %2108 = vrot.lane.b32.xlu1 %v5197_v17, %s5748_s11  ;;  %v2317_v17 = vrot.slane %v2315_v53, 5  ;;  %v2238_v19 = vsel %vm6204_vm11, %v2233_v23, %v2237_v25  ;;  %v1151_v23 = vor.u32 %v1150_v59, %v6457_v58  ;;  %v1154_v25 = vshll.u32 %v1067_v62, 16 }
  0xf4   : >> { %2106 = vrot.lane.b32.xlu0 %v5196_v34, %s5748_s11  ;;  %v2329_v34 = vrot.slane %v2328_v20, 4  ;;  %v2228_v40 = vsel %vm6204_vm11, %v2223_v29, %v2227_v33  ;;  %v1246_v20 = vrot.slane %v1244_v50, 4  ;;  %v5262_v29 = vrot.slane %v5246_v3, 9 }
  0xf5   : >> { %v2318_v30 = vor.u32 %v2317_v17, %v2314_v16  ;;  %v1079_v16 = vld [vmem:[%s6193_s30 + $0x50] sm:$0x1]  ;;  %v6466_v17 = vrot.slane %v1240_v49, 5  ;;  %v1156_v37 = vrot.slane %v1154_v25, 5  ;;  %v1159_v59 = vshrl.u32 %v1068_v43, 16 }
  0xf6   : >> { %v2334_v33 = vsel %vm6204_vm11, %v2329_v34, %v2333_v35  ;;  %v1250_v28 = vshll.u32 %v1079_v16, 16  ;;  %v6477_v35 = vld [vmem:[%s6193_s30 + $0x28] sm:$0xf] }
  0xf7   : >> { %2124 = vrot.lane.b32.xlu1 %v5205_v39, %s5748_s11  ;;  %v1077_v39 = vld [vmem:[%s6193_s30 + $0x48] sm:$0xf]  ;;  %v2319_v41 = vrot.slane %v2318_v30, 4 }
  0xf8   : >> { %2122 = vrot.lane.b32.xlu0 %v5204_v44, %s5748_s11  ;;  %v1138_v44 = vshll.u32 %v1065_v32, 16  ;;  %v1231_v52 = vshrl.u32 %v1077_v39, 16  ;;  %v1234_v53 = vshll.u32 %v1077_v39, 16  ;;  %v1247_v32 = vor.u32 %v1246_v20, %v6466_v17 }
  0xf9   : >> { %v5259_v20 = vrot.slane %v5237_v47, 9  ;;  %v1034_v47 = vld [vmem:[%s6193_s30 + $0x28] sm:$0xf] }
  0xfa   : >> { %v1140_v0 = vrot.slane %v1138_v44, 5  ;;  %v1233_v21 = vrot.slane %v1231_v52, 4  ;;  %v1236_v22 = vrot.slane %v1234_v53, 5  ;;  %v1248_v49 = vrot.slane %v1247_v32, 4  ;;  %1050 = vst.msk [vmem:[#allocation4 + $0x1c] sm:$0xf] %vm226_vm2, %v1034_v47 }
  0xfb   : >> { %2385 = vrot.lane.b32.xlu1 %v2214_v54, %s5749_s12  ;;  %v2526_v54 = vrot.slane %v5247_v42, 5  ;;  %v5239_v42 = vld [vmem:[%s6193_s30 + $0x2c] sm:$0x1]  ;;  %v1168_v52 = vshll.u32 %v1069_v24, 16  ;;  %v1172_v53 = vshrl.u32 %v1069_v24, 16 }
  0xfc   : >> { %2383 = vrot.lane.b32.xlu0 %v2204_v60, %s5749_s12  ;;  %v2324_v60 = vsel %vm6204_vm11, %v2319_v41, %v6423_v57  ;;  %v2502_v57 = vsel %vm6237_vm14, %v2500_v45, %v2501_v46  ;;  %v1141_v30 = vor.u32 %v1140_v0, %v1137_v63  ;;  %v1237_v34 = vor.u32 %v1236_v22, %v1233_v21  ;;  %v1081_v0 = vld [vmem:[%s6193_s30 + $0x58] sm:$0xf]  ;;  %v1080_v22 = vld [vmem:[%s6193_s30 + $0x54] sm:$0xf] }
  0xfd   : >> { %v1252_v45 = vrot.slane %v1250_v28, 5  ;;  %v2505_v46 = vrot.slane %v6477_v35, 5  ;;  %v2508_v16 = vrot.slane %v5239_v42, 5  ;;  %v2533_v21 = vrot.slane %v6495_v48, 5  ;;  %v1070_v35 = vld [vmem:[%s6193_s30 + $0x2c] sm:$0x1] }
  0xfe   : >> { %v1142_v41 = vrot.slane %v1141_v30, 4  ;;  %v1238_v50 = vrot.slane %v1237_v34, 4  ;;  %v1174_v25 = vrot.slane %v1172_v53, 4  ;;  %v1264_v28 = vshll.u32 %v1081_v0, 16 }
  0xff   : >> { %2401 = vrot.lane.b32.xlu1 %v2310_v55, %s5749_s12  ;;  %v2528_v55 = vrot.slane %v2526_v54, 4  ;;  %v2507_v3 = vrot.slane %v2505_v46, 4  ;;  %v1268_v32 = vshrl.u32 %v1081_v0, 16  ;;  %v1255_v36 = vshrl.u32 %v1080_v22, 16 }
 0x100   : >> { %2399 = vrot.lane.b32.xlu0 %v2300_v26, %s5749_s12  ;;  %v2499_v26 = vsel %vm6237_vm14, %v5258_v61, %v2498_v31  ;;  %v1039_v61 = vld [vmem:[%s6193_s30 + $0x48] sm:$0xf]  ;;  %v1147_v63 = vsel %vm6204_vm11, %v1142_v41, %v6457_v58  ;;  %v1253_v58 = vsel %vm6204_vm11, %v1248_v49, %v1252_v45  ;;  %v2506_v38 = vsel %vm6237_vm14, %v5259_v20, %v2505_v46 }
 0x101   : >> { %v2530_v31 = vsel %vm6237_vm14, %v2528_v55, %v2529_v2  ;;  %1055 = vst.msk [vmem:[#allocation4 + $0x30] sm:$0xf] %vm226_vm2, %v1039_v61  ;;  %v5251_v55 = vld [vmem:[%s6193_s30 + $0x5c] sm:$0x1]  ;;  %v1270_v45 = vrot.slane %v1268_v32, 4 }
 0x102   : >> { %v2536_v24 = vrot.slane %v5251_v55, 5  ;;  %v1350_v55 = vld [vmem:[%s6193_s30 + $0x1c] sm:$0xf] }
 0x103   : >> { %2389 = vrot.lane.b32.xlu1 %v2238_v19, %s5749_s12  ;;  %v1152_v19 = vrot.slane %v1151_v23, 4  ;;  %v6521_v23 = vrot.slane %v1168_v52, 5  ;;  %v1257_v52 = vrot.slane %v1255_v36, 4 }
 0x104   : >> { %2387 = vrot.lane.b32.xlu0 %v2228_v40, %s5749_s12  ;;  %v2527_v40 = vsel %vm6237_vm14, %v5262_v29, %v2526_v54  ;;  %v1161_v29 = vrot.slane %v1159_v59, 4 }
 0x105   : >> { %v1157_v54 = vsel %vm6204_vm11, %v1152_v19, %v1156_v37  ;;  %v5277_v19 = vcombine.low %v5914_v8, %v5914_v8  ;;  %v2509_v37 = vsel %vm6237_vm14, %v2507_v3, %v2508_v16  ;;  %v1175_v42 = vor.u32 %v1174_v25, %v6521_v23  ;;  %v1041_v16 = vld [vmem:[%s6193_s30 + $0x54] sm:$0xf] }
 0x106   : >> { %1057 = vst.msk [vmem:[#allocation4 + $0x38] sm:$0xf] %vm226_vm2, %v1041_v16  ;;  %v1366_v16 = vld [vmem:[%s6193_s30 + $0x5c] sm:$0x1] }
 0x107   : >> { %2405 = vrot.lane.b32.xlu1 %v2334_v33, %s5749_s12  ;;  %v1040_v33 = vld [vmem:[%s6193_s30 + $0x4c] sm:$0xf]  ;;  %5657 = vmatprep.subr.msk.bf16.mxu0 %vm2719_vm0, %v5277_v19  ;;  %v2721_v41 = vsel %vm2719_vm0, %v5277_v19, 0 }
 0x108   : >> { %2403 = vrot.lane.b32.xlu0 %v2324_v60, %s5749_s12  ;;  %v1162_v60 = vshll.u32 %v1068_v43, 16  ;;  %1056 = vst.msk [vmem:[#allocation4 + $0x34] sm:$0xf] %vm226_vm2, %v1040_v33  ;;  %v1178_v43 = vshll.u32 %v1070_v35, 16  ;;  %5602 = vmatpush3.bf16.msra.mxu0 %v2721_v41  ;;  %v5276_v33 = vcombine.low %v5904_v6, %v5909_v7  ;;  %v1362_v35 = vld [vmem:[%s6193_s30 + $0x4c] sm:$0xf] }
 0x109   : >> { %5658 = vmatprep.subr.msk.bf16.mxu1 %vm2719_vm0, %v5277_v19 }
 0x10a   : >> { %v1164_v30 = vrot.slane %v1162_v60, 5  ;;  %5648 = vmatpush3.bf16.msra.mxu1 %v2721_v41  ;;  %v5275_v60 = vcombine.low %v5894_v4, %v5899_v5  ;;  %5603 = vmatprep.subr.bf16.mxu0 %v5276_v33  ;;  %v1180_v0 = vrot.slane %v1178_v43, 5  ;;  %v1353_v41 = vld [vmem:[%s6193_s30 + $0x28] sm:$0xf] }
 0x10b   : >> { %2554 = vrot.lane.b32.xlu1 %v2502_v57, %s5750_s13  ;;  %v1243_v57 = vsel %vm6204_vm11, %v1238_v50, %v6466_v17  ;;  %v1082_v50 = vld [vmem:[%s6193_s30 + $0x5c] sm:$0x1]  ;;  %5646 = vmatprep.subr.bf16.mxu1 %v5276_v33  ;;  %v1361_v43 = vld [vmem:[%s6193_s30 + $0x48] sm:$0xe] }
 0x10c   : >> { %2552 = vrot.lane.b32.xlu0 %v2499_v26, %s5750_s13  ;;  %v5249_v26 = vld [vmem:[%s6193_s30 + $0x54] sm:$0xe]  ;;  %v1165_v49 = vor.u32 %v1164_v30, %v1161_v29  ;;  %v1274_v3 = vshll.u32 %v1082_v50, 16  ;;  %5604 = vmatpush3.bf16.msra.mxu0 %v5276_v33  ;;  %v1410_v29 = vrot.slane %v1350_v55, 5  ;;  %v1448_v55 = vrot.slane %v1366_v16, 5 }
 0x10d   : >> { %v1295_v39 = vpop.permute.xlu1 %1294  ;;  %5605 = vmatprep.subr.bf16.mxu0 %v5275_v60 }
 0x10e   : >> { %1335 = vst.msk [vmem:[#allocation4 + $0x20] sm:$0xf] %vm1326_vm15, %v1295_v39  ;;  %v1279_v44 = vpop.permute.xlu0 %1278  ;;  %v2535_v39 = vrot.slane %v2533_v21, 4  ;;  %5649 = vmatpush3.bf16.msra.mxu1 %v5276_v33  ;;  %v1412_v19 = vrot.slane %v1410_v29, 4  ;;  %v1365_v33 = vld [vmem:[%s6193_s30 + $0x58] sm:$0xf] }
 0x10f   : >> { %1327 = vst.msk [vmem:[#allocation4] sm:$0xf] %vm1326_vm15, %v1279_v44  ;;  %2570 = vrot.lane.b32.xlu1 %v2530_v31, %s5750_s13  ;;  %v1258_v31 = vshll.u32 %v1080_v22, 16  ;;  %v6541_v44 = vrot.slane %v1264_v28, 5  ;;  %5647 = vmatprep.subr.bf16.mxu1 %v5275_v60 }
 0x110   : >> { %2568 = vrot.lane.b32.xlu0 %v2527_v40, %s5750_s13  ;;  %v5263_v40 = vrot.slane %v5249_v26, 9  ;;  %v2537_v61 = vsel %vm6237_vm14, %v2535_v39, %v2536_v24  ;;  %v1276_v26 = vrot.slane %v1274_v3, 5  ;;  %5606 = vmatpush3.bf16.msra.mxu0 %v5275_v60 }
 0x111   : >> { %v1297_v62 = vpop.permute.xlu1 %1296  ;;  %v1260_v53 = vrot.slane %v1258_v31, 5  ;;  %v1349_v31 = vld [vmem:[%s6193_s30 + $0x18] sm:$0xe] }
 0x112   : >> { %1336 = vst.msk [vmem:[#allocation4 + $0x24] sm:$0xf] %vm1326_vm15, %v1297_v62  ;;  %v1281_v2 = vpop.permute.xlu0 %1280  ;;  %v1042_v62 = vld [vmem:[%s6193_s30 + $0x58] sm:$0xf]  ;;  %v2534_v22 = vsel %vm6237_vm14, %v5263_v40, %v2533_v21  ;;  %5650 = vmatpush3.bf16.msra.mxu1 %v5275_v60  ;;  %v5112_v39 = vrot.slane %v1349_v31, 9 }
 0x113   : >> { %1328 = vst.msk [vmem:[#allocation4 + $0x4] sm:$0xf] %vm1326_vm15, %v1281_v2  ;;  %1288 = vrot.lane.b32.xlu1 %v1157_v54, %s5743_s6  ;;  %v1033_v54 = vld [vmem:[%s6193_s30 + $0x24] sm:$0xf]  ;;  %v1271_v2 = vor.u32 %v1270_v45, %v6541_v44  ;;  %v1363_v40 = vld [vmem:[%s6193_s30 + $0x50] sm:$0x1] }
 0x114   : >> { %1286 = vrot.lane.b32.xlu0 %v1147_v63, %s5743_s6  ;;  %1049 = vst.msk [vmem:[#allocation4 + $0x18] sm:$0xf] %vm226_vm2, %v1033_v54  ;;  %v1176_v63 = vrot.slane %v1175_v42, 4  ;;  %1058 = vst.msk [vmem:[#allocation4 + $0x3c] sm:$0xf] %vm226_vm2, %v1042_v62  ;;  %v1441_v47 = vrot.slane %v1363_v40, 5  ;;  %v1411_v50 = vsel %vm6237_vm14, %v5112_v39, %v1410_v29 }
 0x115   : >> { %v1285_v34 = vpop.permute.xlu1 %1284  ;;  %v1272_v21 = vrot.slane %v1271_v2, 4  ;;  %v5154_v39 = vld [vmem:[%s6193_s30 + $0x54] sm:$0xf] }
 0x116   : >> { %1330 = vst.msk [vmem:[#allocation4 + $0xc] sm:$0xf] %vm1326_vm15, %v1285_v34  ;;  %v1283_v17 = vpop.permute.xlu0 %1282  ;;  %v1181_v48 = vsel %vm6204_vm11, %v1176_v63, %v1180_v0  ;;  %v1351_v34 = vld [vmem:[%s6193_s30 + $0x20] sm:$0x1]  ;;  %v1445_v63 = vrot.slane %v1365_v33, 5 }
 0x117   : >> { %1329 = vst.msk [vmem:[#allocation4 + $0x8] sm:$0xf] %vm1326_vm15, %v1283_v17  ;;  %1304 = vrot.lane.b32.xlu1 %v1253_v58, %s5743_s6  ;;  %v1166_v58 = vrot.slane %v1165_v49, 4  ;;  %v1413_v17 = vrot.slane %v1351_v34, 5 }
 0x118   : >> { %1302 = vrot.lane.b32.xlu0 %v1243_v57, %s5743_s6  ;;  %v1261_v57 = vor.u32 %v1260_v53, %v1257_v52  ;;  %v5116_v52 = vrot.slane %v1361_v43, 9  ;;  %v1354_v53 = vld [vmem:[%s6193_s30 + $0x2c] sm:$0x1] }
 0x119   : >> { %v1301_v46 = vpop.permute.xlu1 %1300  ;;  %v1171_v28 = vsel %vm6204_vm11, %v1166_v58, %v6521_v23  ;;  %v1277_v23 = vsel %vm6204_vm11, %v1272_v21, %v1276_v26  ;;  %v1414_v45 = vsel %vm6237_vm14, %v1412_v19, %v1413_v17  ;;  %v1420_v62 = vrot.slane %v1354_v53, 5  ;;  %v5155_v17 = vld [vmem:[%s6193_s30 + $0x58] sm:$0xf]  ;;  %v5144_v43 = vld [vmem:[%s6193_s30 + $0x2c] sm:$0x1] }
 0x11a   : >> { %1338 = vst.msk [vmem:[#allocation4 + $0x2c] sm:$0xf] %vm1326_vm15, %v1301_v46  ;;  %v1299_v59 = vpop.permute.xlu0 %1298  ;;  %v1262_v32 = vrot.slane %v1261_v57, 4  ;;  %v1417_v46 = vrot.slane %v1353_v41, 5  ;;  %v1447_v57 = vrot.slane %v1445_v63, 4  ;;  %v1794_v41 = vshll.u32 %v5155_v17, 16 }
 0x11b   : >> { %1337 = vst.msk [vmem:[#allocation4 + $0x28] sm:$0xf] %vm1326_vm15, %v1299_v59  ;;  %2558 = vrot.lane.b32.xlu1 %v2509_v37, %s5750_s13  ;;  %v1438_v37 = vrot.slane %v1362_v35, 5  ;;  %v1352_v59 = vld [vmem:[%s6193_s30 + $0x24] sm:$0xe] }
 0x11c   : >> { %2556 = vrot.lane.b32.xlu0 %v2506_v38, %s5750_s13  ;;  %v1267_v38 = vsel %vm6204_vm11, %v1262_v32, %v6541_v44  ;;  %v5113_v3 = vrot.slane %v1352_v59, 9  ;;  %v1449_v29 = vsel %vm6237_vm14, %v1447_v57, %v1448_v55  ;;  %v5146_v53 = vld [vmem:[%s6193_s30 + $0x34] sm:$0xf] }
 0x11d   : >> { %v1453_v20 = vpop.permute.xlu1 %1452  ;;  %v1440_v44 = vrot.slane %v1438_v37, 4  ;;  %v1439_v2 = vsel %vm6237_vm14, %v5116_v52, %v1438_v37  ;;  %v5125_v37 = vld [vmem:[%s6193_s30 + $0x28] sm:$0xf]  ;;  %v1788_v52 = vshll.u32 %v5154_v39, 16  ;;  %v1722_v16 = vshll.u32 %v5146_v53, 16 }
 0x11e   : >> { %1500 = vst.msk [vmem:[#allocation4 + $0x4] sm:$0xf] %vm1498_vm1, %v1453_v20  ;;  %v1451_v25 = vpop.permute.xlu0 %1450  ;;  %v1726_v57 = vshrl.u32 %v5146_v53, 16 }
 0x11f   : >> { %1499 = vst.msk [vmem:[#allocation4] sm:$0xf] %vm1498_vm1, %v1451_v25  ;;  %2574 = vrot.lane.b32.xlu1 %v2537_v61, %s5750_s13  ;;  %v1442_v60 = vsel %vm6237_vm14, %v1440_v44, %v1441_v47  ;;  %v1419_v61 = vrot.slane %v1417_v46, 4 }
 0x120   : >> { %2572 = vrot.lane.b32.xlu0 %v2534_v22, %s5750_s13  ;;  %v1364_v22 = vld [vmem:[%s6193_s30 + $0x54] sm:$0xe] }
 0x121   : >> { %v1469_v30 = vpop.permute.xlu1 %1468  ;;  %v1421_v58 = vsel %vm6237_vm14, %v1419_v61, %v1420_v62  ;;  %v5117_v21 = vrot.slane %v1364_v22, 9  ;;  %v6651_v61 = vrot.slane %v1794_v41, 5  ;;  %v5145_v62 = vld [vmem:[%s6193_s30 + $0x30] sm:$0xf] }
 0x122   : >> { %1508 = vst.msk [vmem:[#allocation4 + $0x24] sm:$0xf] %vm1498_vm1, %v1469_v30  ;;  %v1467_v36 = vpop.permute.xlu0 %1466  ;;  %v5143_v30 = vld [vmem:[%s6193_s30 + $0x28] sm:$0xf] }
 0x123   : >> { %1507 = vst.msk [vmem:[#allocation4 + $0x20] sm:$0xf] %vm1498_vm1, %v1467_v36  ;;  %1292 = vrot.lane.b32.xlu1 %v1181_v48, %s5743_s6  ;;  %v1418_v48 = vsel %vm6237_vm14, %v5113_v3, %v1417_v46  ;;  %v1446_v34 = vsel %vm6237_vm14, %v5117_v21, %v1445_v63  ;;  %v1698_v36 = vshll.u32 %v5143_v30, 16  ;;  %v1702_v31 = vshrl.u32 %v5143_v30, 16 }
 0x124   : >> { %1290 = vrot.lane.b32.xlu0 %v1171_v28, %s5743_s6  ;;  %v5142_v28 = vld [vmem:[%s6193_s30 + $0x24] sm:$0xf]  ;;  %v1716_v21 = vshll.u32 %v5145_v62, 16 }
 0x125   : >> { %v1457_v24 = vpop.permute.xlu1 %1456  ;;  %v1692_v19 = vshll.u32 %v5142_v28, 16  ;;  %v1704_v44 = vrot.slane %v1702_v31, 4 }
 0x126   : >> { %1502 = vst.msk [vmem:[#allocation4 + $0xc] sm:$0xf] %vm1498_vm1, %v1457_v24  ;;  %v1455_v42 = vpop.permute.xlu0 %1454 }
 0x127   : >> { %1501 = vst.msk [vmem:[#allocation4 + $0x8] sm:$0xf] %vm1498_vm1, %v1455_v42  ;;  %1308 = vrot.lane.b32.xlu1 %v1277_v23, %s5743_s6  ;;  %v1689_v23 = vshrl.u32 %v5142_v28, 16  ;;  %v1798_v42 = vshrl.u32 %v5155_v17, 16  ;;  %v1694_v46 = vrot.slane %v1692_v19, 5 }
 0x128   : >> { %1306 = vrot.lane.b32.xlu0 %v1267_v38, %s5743_s6  ;;  %v5124_v38 = vld [vmem:[%s6193_s30 + $0x24] sm:$0xf]  ;;  %v5147_v17 = vld [vmem:[%s6193_s30 + $0x38] sm:$0x1] }
 0x129   : >> { %v1473_v49 = vpop.permute.xlu1 %1472  ;;  %v1691_v47 = vrot.slane %v1689_v23, 4  ;;  %v1800_v3 = vrot.slane %v1798_v42, 4  ;;  %v6668_v23 = vrot.slane %v1722_v16, 5  ;;  %v1718_v42 = vrot.slane %v1716_v21, 5 }
 0x12a   : >> { %1510 = vst.msk [vmem:[#allocation4 + $0x2c] sm:$0xf] %vm1498_vm1, %v1473_v49  ;;  %v1471_v54 = vpop.permute.xlu0 %1470  ;;  %v5133_v49 = vld [vmem:[%s6193_s30 + $0x58] sm:$0xf] }
 0x12b   : >> { %1509 = vst.msk [vmem:[#allocation4 + $0x28] sm:$0xf] %vm1498_vm1, %v1471_v54  ;;  %1460 = vrot.lane.b32.xlu1 %v1414_v45, %s5744_s7  ;;  %v6644_v45 = vrot.slane %v1698_v36, 5  ;;  %v5132_v54 = vld [vmem:[%s6193_s30 + $0x54] sm:$0xf]  ;;  %v1801_v31 = vor.u32 %v1800_v3, %v6651_v61 }
 0x12c   : >> { %1458 = vrot.lane.b32.xlu0 %v1411_v50, %s5744_s7  ;;  %v1785_v50 = vshrl.u32 %v5154_v39, 16 }
 0x12d   : >> { %v1554_v0 = vpop.permute.xlu1 %1553  ;;  %v1705_v63 = vor.u32 %v1704_v44, %v6644_v45 }
 0x12e   : >> { %1601 = vst.msk [vmem:[#allocation4 + $0x4] sm:$0xf] %vm1599_vm4, %v1554_v0  ;;  %v1552_v20 = vpop.permute.xlu0 %1551  ;;  %v1695_v0 = vor.u32 %v1694_v46, %v1691_v47  ;;  %v1787_v22 = vrot.slane %v1785_v50, 4 }
 0x12f   : >> { %1600 = vst.msk [vmem:[#allocation4] sm:$0xf] %vm1599_vm4, %v1552_v20  ;;  %1476 = vrot.lane.b32.xlu1 %v1442_v60, %s5744_s7  ;;  %v1708_v60 = vshll.u32 %v5144_v43, 16  ;;  %v5127_v20 = vld [vmem:[%s6193_s30 + $0x34] sm:$0xf] }
 0x130   : >> { %1474 = vrot.lane.b32.xlu0 %v1439_v2, %s5744_s7  ;;  %v5156_v2 = vld [vmem:[%s6193_s30 + $0x5c] sm:$0x1]  ;;  %v1696_v36 = vrot.slane %v1695_v0, 4  ;;  %v5159_v0 = vld [vmem:[%s6193_s30 + $0x68] sm:$0x1] }
 0x131   : >> { %v1570_v25 = vpop.permute.xlu1 %1569  ;;  %v1710_v30 = vrot.slane %v1708_v60, 5  ;;  %v1804_v28 = vshll.u32 %v5156_v2, 16 }
 0x132   : >> { %1609 = vst.msk [vmem:[#allocation4 + $0x24] sm:$0xf] %vm1599_vm4, %v1570_v25  ;;  %v1568_v26 = vpop.permute.xlu0 %1567  ;;  %v5126_v25 = vld [vmem:[%s6193_s30 + $0x30] sm:$0xf]  ;;  %v1701_v53 = vsel %vm6204_vm11, %v1696_v36, %v6644_v45 }
 0x133   : >> { %1608 = vst.msk [vmem:[#allocation4 + $0x20] sm:$0xf] %vm1599_vm4, %v1568_v26  ;;  %1464 = vrot.lane.b32.xlu1 %v1421_v58, %s5744_s7  ;;  %v1790_v58 = vrot.slane %v1788_v52, 5  ;;  %v5158_v26 = vld [vmem:[%s6193_s30 + $0x64] sm:$0xf]  ;;  %v1806_v50 = vrot.slane %v1804_v28, 5 }
 0x134   : >> { %1462 = vrot.lane.b32.xlu0 %v1418_v48, %s5744_s7  ;;  %v1713_v48 = vshrl.u32 %v5145_v62, 16  ;;  %v1732_v52 = vshll.u32 %v5147_v17, 16 }
 0x135   : >> { %v1558_v32 = vpop.permute.xlu1 %1557  ;;  %v1791_v19 = vor.u32 %v1790_v58, %v1787_v22 }
 0x136   : >> { %1603 = vst.msk [vmem:[#allocation4 + $0xc] sm:$0xf] %vm1599_vm4, %v1558_v32  ;;  %v1556_v35 = vpop.permute.xlu0 %1555  ;;  %v5157_v32 = vld [vmem:[%s6193_s30 + $0x60] sm:$0xf]  ;;  %v1715_v41 = vrot.slane %v1713_v48, 4  ;;  %v1734_v22 = vrot.slane %v1732_v52, 5 }
 0x137   : >> { %1602 = vst.msk [vmem:[#allocation4 + $0x8] sm:$0xf] %vm1599_vm4, %v1556_v35  ;;  %1480 = vrot.lane.b32.xlu1 %v1449_v29, %s5744_s7  ;;  %v1706_v35 = vrot.slane %v1705_v63, 4  ;;  %v1809_v43 = vshrl.u32 %v5157_v32, 16  ;;  %v1812_v44 = vshll.u32 %v5157_v32, 16  ;;  %v1792_v62 = vrot.slane %v1791_v19, 4 }
 0x138   : >> { %1478 = vrot.lane.b32.xlu0 %v1446_v34, %s5744_s7  ;;  %v5135_v34 = vld [vmem:[%s6193_s30 + $0x64] sm:$0xf]  ;;  %v1719_v63 = vor.u32 %v1718_v42, %v1715_v41  ;;  %v5179_v19 = vld [vmem:[%s6193_s30 + $0x58] sm:$0xf] }
 0x139   : >> { %v1574_v24 = vpop.permute.xlu1 %1573  ;;  %v1711_v46 = vsel %vm6204_vm11, %v1706_v35, %v1710_v30  ;;  %v1811_v2 = vrot.slane %v1809_v43, 4  ;;  %v1814_v3 = vrot.slane %v1812_v44, 5  ;;  %v5180_v43 = vld [vmem:[%s6193_s30 + $0x5c] sm:$0x1]  ;;  %v5170_v44 = vld [vmem:[%s6193_s30 + $0x34] sm:$0xf] }
 0x13a   : >> { %1611 = vst.msk [vmem:[#allocation4 + $0x2c] sm:$0xf] %vm1599_vm4, %v1574_v24  ;;  %v1572_v40 = vpop.permute.xlu0 %1571  ;;  %v1818_v24 = vshll.u32 %v5158_v26, 16  ;;  %v1720_v48 = vrot.slane %v1719_v63, 4  ;;  %v1992_v52 = vrot.slane %v5180_v43, 5 }
 0x13b   : >> { %1610 = vst.msk [vmem:[#allocation4 + $0x28] sm:$0xf] %vm1599_vm4, %v1572_v40  ;;  %1561 = vrot.lane.b32.xlu1 %v5125_v37, %s5745_s8  ;;  %v1728_v37 = vrot.slane %v1726_v57, 4  ;;  %v5134_v40 = vld [vmem:[%s6193_s30 + $0x60] sm:$0xf]  ;;  %v1828_v57 = vshll.u32 %v5159_v0, 16  ;;  %v1815_v21 = vor.u32 %v1814_v3, %v1811_v2 }
 0x13c   : >> { %1559 = vrot.lane.b32.xlu0 %v5124_v38, %s5745_s8  ;;  %v1822_v38 = vshrl.u32 %v5158_v26, 16  ;;  %v5167_v26 = vld [vmem:[%s6193_s30 + $0x28] sm:$0xf]  ;;  %v1725_v35 = vsel %vm6204_vm11, %v1720_v48, %v6668_v23  ;;  %v5169_v0 = vld [vmem:[%s6193_s30 + $0x30] sm:$0xe] }
 0x13d   : >> { %v1835_v33 = vpop.permute.xlu1 %1834  ;;  %v1961_v32 = vrot.slane %v5167_v26, 5  ;;  %v1816_v36 = vrot.slane %v1815_v21, 4 }
 0x13e   : >> { %1882 = vst.msk [vmem:[#allocation4 + $0x4] sm:$0xf] %vm1880_vm5, %v1835_v33  ;;  %v1833_v59 = vpop.permute.xlu0 %1832  ;;  %v1729_v33 = vor.u32 %v1728_v37, %v6668_v23  ;;  %v5166_v37 = vld [vmem:[%s6193_s30 + $0x24] sm:$0xe] }
 0x13f   : >> { %1881 = vst.msk [vmem:[#allocation4] sm:$0xf] %vm1880_vm5, %v1833_v59  ;;  %1577 = vrot.lane.b32.xlu1 %v5133_v49, %s5745_s8  ;;  %v1802_v49 = vrot.slane %v1801_v31, 4  ;;  %v1824_v59 = vrot.slane %v1822_v38, 4  ;;  %v5168_v31 = vld [vmem:[%s6193_s30 + $0x2c] sm:$0x1] }
 0x140   : >> { %1575 = vrot.lane.b32.xlu0 %v5132_v54, %s5745_s8  ;;  %v1820_v54 = vrot.slane %v1818_v24, 5  ;;  %v1963_v23 = vrot.slane %v1961_v32, 4  ;;  %v1964_v38 = vrot.slane %v5168_v31, 5  ;;  %v5186_v42 = vrot.slane %v5166_v37, 9 }
 0x141   : >> { %v1851_v55 = vpop.permute.xlu1 %1850  ;;  %v1807_v45 = vsel %vm6204_vm11, %v1802_v49, %v1806_v50 }
 0x142   : >> { %1890 = vst.msk [vmem:[#allocation4 + $0x24] sm:$0xf] %vm1880_vm5, %v1851_v55  ;;  %v1849_v29 = vpop.permute.xlu0 %1848  ;;  %v1825_v58 = vor.u32 %v1824_v59, %v1820_v54  ;;  %v1821_v41 = vsel %vm6204_vm11, %v1816_v36, %v1820_v54  ;;  %v1965_v49 = vsel %vm6237_vm14, %v1963_v23, %v1964_v38  ;;  %v1962_v54 = vsel %vm6237_vm14, %v5186_v42, %v1961_v32  ;;  %v5217_v32 = vld [vmem:[%s6193_s30 + $0x34] sm:$0xf]  ;;  %v5228_v42 = vld [vmem:[%s6193_s30 + $0x60] sm:$0xf] }
 0x143   : >> { %1889 = vst.msk [vmem:[#allocation4 + $0x20] sm:$0xf] %vm1880_vm5, %v1849_v29  ;;  %1565 = vrot.lane.b32.xlu1 %v5127_v20, %s5745_s8  ;;  %v1730_v20 = vrot.slane %v1729_v33, 4  ;;  %v2253_v37 = vshrl.u32 %v5217_v32, 16  ;;  %v5199_v38 = vld [vmem:[%s6193_s30 + $0x34] sm:$0xf] }
 0x144   : >> { %1563 = vrot.lane.b32.xlu0 %v5126_v25, %s5745_s8  ;;  %v1797_v25 = vsel %vm6204_vm11, %v1792_v62, %v6651_v61  ;;  %v1826_v28 = vrot.slane %v1825_v58, 4  ;;  %v1830_v61 = vrot.slane %v1828_v57, 5  ;;  %v5182_v62 = vld [vmem:[%s6193_s30 + $0x64] sm:$0xf]  ;;  %v5187_v58 = vrot.slane %v5169_v0, 9 }
 0x145   : >> { %v1839_v39 = vpop.permute.xlu1 %1838  ;;  %v1735_v30 = vsel %vm6204_vm11, %v1730_v20, %v1734_v22  ;;  %v5183_v57 = vld [vmem:[%s6193_s30 + $0x68] sm:$0x1] }
 0x146   : >> { %1884 = vst.msk [vmem:[#allocation4 + $0xc] sm:$0xf] %vm1880_vm5, %v1839_v39  ;;  %v1837_v47 = vpop.permute.xlu0 %1836  ;;  %v1831_v24 = vsel %vm6204_vm11, %v1826_v28, %v1830_v61  ;;  %v1989_v39 = vrot.slane %v5179_v19, 5  ;;  %v1999_v26 = vrot.slane %v5183_v57, 5 }
 0x147   : >> { %1883 = vst.msk [vmem:[#allocation4 + $0x8] sm:$0xf] %vm1880_vm5, %v1837_v47  ;;  %1581 = vrot.lane.b32.xlu1 %v5135_v34, %s5745_s8 }
 0x148   : >> { %1579 = vrot.lane.b32.xlu0 %v5134_v40, %s5745_s8  ;;  %v1991_v50 = vrot.slane %v1989_v39, 4 }
 0x149   : >> { %v1855_v60 = vpop.permute.xlu1 %1854 }
 0x14a   : >> { %1892 = vst.msk [vmem:[#allocation4 + $0x2c] sm:$0xf] %vm1880_vm5, %v1855_v60  ;;  %v1853_v16 = vpop.permute.xlu0 %1852  ;;  %v5171_v60 = vld [vmem:[%s6193_s30 + $0x38] sm:$0x1]  ;;  %v1993_v2 = vsel %vm6237_vm14, %v1991_v50, %v1992_v52 }
 0x14b   : >> { %1891 = vst.msk [vmem:[#allocation4 + $0x28] sm:$0xf] %vm1880_vm5, %v1853_v16  ;;  %1842 = vrot.lane.b32.xlu1 %v1711_v46, %s5746_s9  ;;  %v5178_v46 = vld [vmem:[%s6193_s30 + $0x54] sm:$0xe]  ;;  %v1971_v16 = vrot.slane %v5171_v60, 5 }
 0x14c   : >> { %1840 = vrot.lane.b32.xlu0 %v1701_v53, %s5746_s9  ;;  %v1968_v53 = vrot.slane %v5170_v44, 5  ;;  %v5190_v59 = vrot.slane %v5178_v46, 9  ;;  %v5218_v46 = vld [vmem:[%s6193_s30 + $0x38] sm:$0x1]  ;;  %v5220_v60 = vld [vmem:[%s6193_s30 + $0x40] sm:$0xf] }
 0x14d   : >> { %v2004_v55 = vpop.permute.xlu1 %2003  ;;  %v2273_v57 = vshll.u32 %v5220_v60, 16 }
 0x14e   : >> { %2051 = vst.msk [vmem:[#allocation4 + $0x4] sm:$0xf] %vm2049_vm6, %v2004_v55  ;;  %v2002_v29 = vpop.permute.xlu0 %2001  ;;  %v1970_v3 = vrot.slane %v1968_v53, 4  ;;  %v1990_v22 = vsel %vm6237_vm14, %v5190_v59, %v1989_v39  ;;  %v5229_v39 = vld [vmem:[%s6193_s30 + $0x64] sm:$0xf]  ;;  %v2339_v59 = vshll.u32 %v5228_v42, 16 }
 0x14f   : >> { %2050 = vst.msk [vmem:[#allocation4] sm:$0xf] %vm2049_vm6, %v2002_v29  ;;  %1858 = vrot.lane.b32.xlu1 %v1807_v45, %s5746_s9  ;;  %v1996_v45 = vrot.slane %v5182_v62, 5  ;;  %v2345_v52 = vshll.u32 %v5229_v39, 16 }
 0x150   : >> { %1856 = vrot.lane.b32.xlu0 %v1797_v25, %s5746_s9  ;;  %v5181_v25 = vld [vmem:[%s6193_s30 + $0x60] sm:$0xe]  ;;  %v1972_v48 = vsel %vm6237_vm14, %v1970_v3, %v1971_v16  ;;  %v2259_v3 = vshll.u32 %v5218_v46, 16  ;;  %v5219_v16 = vld [vmem:[%s6193_s30 + $0x3c] sm:$0xf] }
 0x151   : >> { %v2020_v34 = vpop.permute.xlu1 %2019  ;;  %v1998_v21 = vrot.slane %v1996_v45, 4  ;;  %v5191_v28 = vrot.slane %v5181_v25, 9 }
 0x152   : >> { %2059 = vst.msk [vmem:[#allocation4 + $0x24] sm:$0xf] %vm2049_vm6, %v2020_v34  ;;  %v2018_v17 = vpop.permute.xlu0 %2017 }
 0x153   : >> { %2058 = vst.msk [vmem:[#allocation4 + $0x20] sm:$0xf] %vm2049_vm6, %v2018_v17  ;;  %1846 = vrot.lane.b32.xlu1 %v1735_v30, %s5746_s9  ;;  %v1969_v30 = vsel %vm6237_vm14, %v5187_v58, %v1968_v53  ;;  %v2000_v34 = vsel %vm6237_vm14, %v1998_v21, %v1999_v26  ;;  %v1997_v31 = vsel %vm6237_vm14, %v5191_v28, %v1996_v45  ;;  %v2249_v17 = vshll.u32 %v5217_v32, 16 }
 0x154   : >> { %1844 = vrot.lane.b32.xlu0 %v1725_v35, %s5746_s9  ;;  %v5216_v35 = vld [vmem:[%s6193_s30 + $0x30] sm:$0xf]  ;;  %v2349_v53 = vshrl.u32 %v5229_v39, 16  ;;  %v2277_v21 = vshrl.u32 %v5220_v60, 16  ;;  %v2267_v28 = vshll.u32 %v5219_v16, 16 }
 0x155   : >> { %v2008_v40 = vpop.permute.xlu1 %2007  ;;  %v2243_v23 = vshll.u32 %v5216_v35, 16  ;;  %v6765_v44 = vrot.slane %v2249_v17, 5 }
 0x156   : >> { %2053 = vst.msk [vmem:[#allocation4 + $0xc] sm:$0xf] %vm2049_vm6, %v2008_v40  ;;  %v2006_v47 = vpop.permute.xlu0 %2005  ;;  %v2351_v58 = vrot.slane %v2349_v53, 4  ;;  %v2279_v39 = vrot.slane %v2277_v21, 4  ;;  %v2269_v46 = vrot.slane %v2267_v28, 5 }
 0x157   : >> { %2052 = vst.msk [vmem:[#allocation4 + $0x8] sm:$0xf] %vm2049_vm6, %v2006_v47  ;;  %1862 = vrot.lane.b32.xlu1 %v1831_v24, %s5746_s9  ;;  %v2240_v24 = vshrl.u32 %v5216_v35, 16  ;;  %v2255_v47 = vrot.slane %v2253_v37, 4  ;;  %v2245_v50 = vrot.slane %v2243_v23, 5 }
 0x158   : >> { %1860 = vrot.lane.b32.xlu0 %v1821_v41, %s5746_s9  ;;  %v5198_v41 = vld [vmem:[%s6193_s30 + $0x30] sm:$0xf] }
 0x159   : >> { %v2024_v33 = vpop.permute.xlu1 %2023 }
 0x15a   : >> { %2061 = vst.msk [vmem:[#allocation4 + $0x2c] sm:$0xf] %vm2049_vm6, %v2024_v33  ;;  %v2022_v63 = vpop.permute.xlu0 %2021  ;;  %v5207_v33 = vld [vmem:[%s6193_s30 + $0x64] sm:$0xf] }
 0x15b   : >> { %2060 = vst.msk [vmem:[#allocation4 + $0x28] sm:$0xf] %vm2049_vm6, %v2022_v63  ;;  %2011 = vrot.lane.b32.xlu1 %v1965_v49, %s5747_s10  ;;  %v2242_v49 = vrot.slane %v2240_v24, 4  ;;  %v5206_v63 = vld [vmem:[%s6193_s30 + $0x60] sm:$0xf]  ;;  %v6792_v24 = vrot.slane %v2273_v57, 5 }
 0x15c   : >> { %2009 = vrot.lane.b32.xlu0 %v1962_v54, %s5747_s10  ;;  %v2336_v54 = vshrl.u32 %v5228_v42, 16 }
 0x15d   : >> { %v2105_v20 = vpop.permute.xlu1 %2104  ;;  %v2246_v45 = vor.u32 %v2245_v50, %v2242_v49 }
 0x15e   : >> { %2152 = vst.msk [vmem:[#allocation4 + $0x4] sm:$0xf] %vm2150_vm9, %v2105_v20  ;;  %v2103_v55 = vpop.permute.xlu0 %2102  ;;  %v5230_v20 = vld [vmem:[%s6193_s30 + $0x68] sm:$0x1]  ;;  %v2338_v25 = vrot.slane %v2336_v54, 4 }
 0x15f   : >> { %2151 = vst.msk [vmem:[#allocation4] sm:$0xf] %vm2150_vm9, %v2103_v55  ;;  %2027 = vrot.lane.b32.xlu1 %v1993_v2, %s5747_s10  ;;  %v2256_v2 = vor.u32 %v2255_v47, %v6765_v44  ;;  %v5201_v55 = vld [vmem:[%s6193_s30 + $0x40] sm:$0xf]  ;;  %v2355_v35 = vshll.u32 %v5230_v20, 16  ;;  %v2247_v17 = vrot.slane %v2246_v45, 4 }
 0x160   : >> { %2025 = vrot.lane.b32.xlu0 %v1990_v22, %s5747_s10  ;;  %v6780_v22 = vrot.slane %v2345_v52, 5  ;;  %v5233_v45 = vld [vmem:[%s6193_s30 + $0x74] sm:$0x1] }
 0x161   : >> { %v2121_v29 = vpop.permute.xlu1 %2120  ;;  %v2357_v54 = vrot.slane %v2355_v35, 5  ;;  %v2379_v21 = vshll.u32 %v5233_v45, 16 }
 0x162   : >> { %2160 = vst.msk [vmem:[#allocation4 + $0x24] sm:$0xf] %vm2150_vm9, %v2121_v29  ;;  %v2119_v61 = vpop.permute.xlu0 %2118  ;;  %v5200_v29 = vld [vmem:[%s6193_s30 + $0x3c] sm:$0xf]  ;;  %v2352_v37 = vor.u32 %v2351_v58, %v6780_v22 }
 0x163   : >> { %2159 = vst.msk [vmem:[#allocation4 + $0x20] sm:$0xf] %vm2150_vm9, %v2119_v61  ;;  %2015 = vrot.lane.b32.xlu1 %v1972_v48, %s5747_s10  ;;  %v2341_v48 = vrot.slane %v2339_v59, 5  ;;  %v5232_v61 = vld [vmem:[%s6193_s30 + $0x70] sm:$0xf] }
 0x164   : >> { %2013 = vrot.lane.b32.xlu0 %v1969_v30, %s5747_s10  ;;  %v2264_v30 = vshrl.u32 %v5219_v16, 16  ;;  %v2353_v60 = vrot.slane %v2352_v37, 4 }
 0x165   : >> { %v2109_v36 = vpop.permute.xlu1 %2108  ;;  %v2342_v23 = vor.u32 %v2341_v48, %v2338_v25 }
 0x166   : >> { %2154 = vst.msk [vmem:[#allocation4 + $0xc] sm:$0xf] %vm2150_vm9, %v2109_v36  ;;  %v2107_v19 = vpop.permute.xlu0 %2106  ;;  %v5231_v36 = vld [vmem:[%s6193_s30 + $0x6c] sm:$0xf]  ;;  %v2266_v47 = vrot.slane %v2264_v30, 4 }
 0x167   : >> { %2153 = vst.msk [vmem:[#allocation4 + $0x8] sm:$0xf] %vm2150_vm9, %v2107_v19  ;;  %2031 = vrot.lane.b32.xlu1 %v2000_v34, %s5747_s10  ;;  %v2261_v34 = vrot.slane %v2259_v3, 5  ;;  %v2257_v19 = vrot.slane %v2256_v2, 4  ;;  %v2360_v49 = vshrl.u32 %v5231_v36, 16  ;;  %v2363_v50 = vshll.u32 %v5231_v36, 16 }
 0x168   : >> { %2029 = vrot.lane.b32.xlu0 %v1997_v31, %s5747_s10  ;;  %v5209_v31 = vld [vmem:[%s6193_s30 + $0x70] sm:$0xf]  ;;  %v2343_v3 = vrot.slane %v2342_v23, 4  ;;  %v2270_v16 = vor.u32 %v2269_v46, %v2266_v47  ;;  %v2381_v36 = vrot.slane %v2379_v21, 5 }
 0x169   : >> { %v2125_v40 = vpop.permute.xlu1 %2124  ;;  %v2262_v53 = vsel %vm6204_vm11, %v2257_v19, %v2261_v34  ;;  %v2362_v20 = vrot.slane %v2360_v49, 4  ;;  %v2365_v58 = vrot.slane %v2363_v50, 5  ;;  %v5240_v23 = vld [vmem:[%s6193_s30 + $0x30] sm:$0xe]  ;;  %v5254_v49 = vld [vmem:[%s6193_s30 + $0x68] sm:$0x1] }
 0x16a   : >> { %2162 = vst.msk [vmem:[#allocation4 + $0x2c] sm:$0xf] %vm2150_vm9, %v2125_v40  ;;  %v2123_v43 = vpop.permute.xlu0 %2122  ;;  %v2369_v40 = vshll.u32 %v5232_v61, 16  ;;  %v2271_v30 = vrot.slane %v2270_v16, 4  ;;  %v5244_v50 = vld [vmem:[%s6193_s30 + $0x40] sm:$0xf] }
 0x16b   : >> { %2161 = vst.msk [vmem:[#allocation4 + $0x28] sm:$0xf] %vm2150_vm9, %v2123_v43  ;;  %2112 = vrot.lane.b32.xlu1 %v5199_v38, %s5748_s11  ;;  %v5221_v38 = vld [vmem:[%s6193_s30 + $0x44] sm:$0x1]  ;;  %v5208_v43 = vld [vmem:[%s6193_s30 + $0x6c] sm:$0xf]  ;;  %v2366_v28 = vor.u32 %v2365_v58, %v2362_v20 }
 0x16c   : >> { %2110 = vrot.lane.b32.xlu0 %v5198_v41, %s5748_s11  ;;  %v2373_v41 = vshrl.u32 %v5232_v61, 16  ;;  %v2283_v59 = vshll.u32 %v5221_v38, 16  ;;  %v5241_v61 = vld [vmem:[%s6193_s30 + $0x34] sm:$0xf]  ;;  %v5253_v38 = vld [vmem:[%s6193_s30 + $0x64] sm:$0xf] }
 0x16d   : >> { %v2386_v62 = vpop.permute.xlu1 %2385  ;;  %v2367_v37 = vrot.slane %v2366_v28, 4  ;;  %v5256_v16 = vld [vmem:[%s6193_s30 + $0x70] sm:$0xf]  ;;  %v5243_v58 = vld [vmem:[%s6193_s30 + $0x3c] sm:$0xe] }
 0x16e   : >> { %2433 = vst.msk [vmem:[#allocation4 + $0x4] sm:$0xf] %vm2431_vm10, %v2386_v62  ;;  %v2384_v0 = vpop.permute.xlu0 %2383  ;;  %v2280_v62 = vor.u32 %v2279_v39, %v6792_v24  ;;  %v5255_v28 = vld [vmem:[%s6193_s30 + $0x6c] sm:$0xe] }
 0x16f   : >> { %2432 = vst.msk [vmem:[#allocation4] sm:$0xf] %vm2431_vm10, %v2384_v0  ;;  %2128 = vrot.lane.b32.xlu1 %v5207_v33, %s5748_s11  ;;  %v2252_v33 = vsel %vm6204_vm11, %v2247_v17, %v6765_v44  ;;  %v2375_v0 = vrot.slane %v2373_v41, 4  ;;  %v2285_v44 = vrot.slane %v2283_v59, 5  ;;  %v2276_v17 = vsel %vm6204_vm11, %v2271_v30, %v6792_v24 }
 0x170   : >> { %2126 = vrot.lane.b32.xlu0 %v5206_v63, %s5748_s11  ;;  %v2371_v63 = vrot.slane %v2369_v40, 5  ;;  %v2281_v25 = vrot.slane %v2280_v62, 4  ;;  %v5245_v62 = vld [vmem:[%s6193_s30 + $0x44] sm:$0x1] }
 0x171   : >> { %v2402_v26 = vpop.permute.xlu1 %2401 }
 0x172   : >> { %2441 = vst.msk [vmem:[#allocation4 + $0x24] sm:$0xf] %vm2431_vm10, %v2402_v26  ;;  %v2400_v32 = vpop.permute.xlu0 %2399  ;;  %v2376_v48 = vor.u32 %v2375_v0, %v2371_v63  ;;  %v2286_v34 = vsel %vm6204_vm11, %v2281_v25, %v2285_v44  ;;  %v2372_v46 = vsel %vm6204_vm11, %v2367_v37, %v2371_v63  ;;  %v2519_v63 = vrot.slane %v5244_v50, 5 }
 0x173   : >> { %2440 = vst.msk [vmem:[#allocation4 + $0x20] sm:$0xf] %vm2431_vm10, %v2400_v32  ;;  %2116 = vrot.lane.b32.xlu1 %v5201_v55, %s5748_s11  ;;  %v2358_v55 = vsel %vm6204_vm11, %v2353_v60, %v2357_v54  ;;  %v2543_v60 = vrot.slane %v5254_v49, 5  ;;  %v2547_v25 = vrot.slane %v5256_v16, 5 }
 0x174   : >> { %2114 = vrot.lane.b32.xlu0 %v5200_v29, %s5748_s11  ;;  %v2348_v29 = vsel %vm6204_vm11, %v2343_v3, %v6780_v22  ;;  %v2377_v35 = vrot.slane %v2376_v48, 4  ;;  %v5242_v22 = vld [vmem:[%s6193_s30 + $0x38] sm:$0x1]  ;;  %v2521_v44 = vrot.slane %v2519_v63, 4 }
 0x175   : >> { %v2390_v42 = vpop.permute.xlu1 %2389  ;;  %v2515_v40 = vrot.slane %v5242_v22, 5  ;;  %v5265_v22 = vrot.slane %v5255_v28, 9 }
 0x176   : >> { %2435 = vst.msk [vmem:[#allocation4 + $0xc] sm:$0xf] %vm2431_vm10, %v2390_v42  ;;  %v2388_v52 = vpop.permute.xlu0 %2387  ;;  %v2382_v24 = vsel %vm6204_vm11, %v2377_v35, %v2381_v36  ;;  %v5260_v42 = vrot.slane %v5240_v23, 9 }
 0x177   : >> { %2434 = vst.msk [vmem:[#allocation4 + $0x8] sm:$0xf] %vm2431_vm10, %v2388_v52  ;;  %2132 = vrot.lane.b32.xlu1 %v5209_v31, %s5748_s11  ;;  %v2512_v31 = vrot.slane %v5241_v61, 5  ;;  %v2548_v37 = vsel %vm6237_vm14, %v5265_v22, %v2547_v25 }
 0x178   : >> { %2130 = vrot.lane.b32.xlu0 %v5208_v43, %s5748_s11  ;;  %v2540_v43 = vrot.slane %v5253_v38, 5 }
 0x179   : >> { %v2406_v2 = vpop.permute.xlu1 %2405  ;;  %v2514_v41 = vrot.slane %v2512_v31, 4 }
 0x17a   : >> { %2443 = vst.msk [vmem:[#allocation4 + $0x2c] sm:$0xf] %vm2431_vm10, %v2406_v2  ;;  %v2404_v57 = vpop.permute.xlu0 %2403  ;;  %v2542_v59 = vrot.slane %v2540_v43, 4  ;;  %v2513_v2 = vsel %vm6237_vm14, %v5260_v42, %v2512_v31 }
 0x17b   : >> { %2442 = vst.msk [vmem:[#allocation4 + $0x28] sm:$0xf] %vm2431_vm10, %v2404_v57  ;;  %2393 = vrot.lane.b32.xlu1 %v2262_v53, %s5749_s12  ;;  %v2516_v54 = vsel %vm6237_vm14, %v2514_v41, %v2515_v40 }
 0x17c   : >> { %2391 = vrot.lane.b32.xlu0 %v2252_v33, %s5749_s12  ;;  %v5252_v33 = vld [vmem:[%s6193_s30 + $0x60] sm:$0xe]  ;;  %v2544_v57 = vsel %vm6237_vm14, %v2542_v59, %v2543_v60 }
 0x17d   : >> { %v2555_v26 = vpop.permute.xlu1 %2554  ;;  %v5264_v3 = vrot.slane %v5252_v33, 9 }
 0x17e   : >> { %2602 = vst.msk [vmem:[#allocation4 + $0x4] sm:$0xf] %vm2600_vm12, %v2555_v26  ;;  %v2553_v32 = vpop.permute.xlu0 %2552  ;;  %v5261_v26 = vrot.slane %v5243_v58, 9 }
 0x17f   : >> { %2601 = vst.msk [vmem:[#allocation4] sm:$0xf] %vm2600_vm12, %v2553_v32  ;;  %2409 = vrot.lane.b32.xlu1 %v2358_v55, %s5749_s12  ;;  %v2522_v55 = vrot.slane %v5245_v62, 5  ;;  %v2541_v21 = vsel %vm6237_vm14, %v5264_v3, %v2540_v43  ;;  %v2549_v32 = vrot.slane %v2547_v25, 4 }
 0x180   : >> { %2407 = vrot.lane.b32.xlu0 %v2348_v29, %s5749_s12  ;;  %v5257_v29 = vld [vmem:[%s6193_s30 + $0x74] sm:$0x1]  ;;  %v2520_v36 = vsel %vm6237_vm14, %v5261_v26, %v2519_v63 }
 0x181   : >> { %v2571_v19 = vpop.permute.xlu1 %2570  ;;  %v2523_v61 = vsel %vm6237_vm14, %v2521_v44, %v2522_v55 }
 0x182   : >> { %2610 = vst.msk [vmem:[#allocation4 + $0x24] sm:$0xf] %vm2600_vm12, %v2571_v19  ;;  %v2569_v39 = vpop.permute.xlu0 %2568 }
 0x183   : >> { %2609 = vst.msk [vmem:[#allocation4 + $0x20] sm:$0xf] %vm2600_vm12, %v2569_v39  ;;  %2397 = vrot.lane.b32.xlu1 %v2286_v34, %s5749_s12  ;;  %v2550_v34 = vrot.slane %v5257_v29, 5 }
 0x184   : >> { %2395 = vrot.lane.b32.xlu0 %v2276_v17, %s5749_s12 }
 0x185   : >> { %v1289_v47 = vpop.permute.xlu1 %1288  ;;  %v2551_v19 = vsel %vm6237_vm14, %v2549_v32, %v2550_v34 }
 0x186   : >> { %1332 = vst.msk [vmem:[#allocation4 + $0x14] sm:$0xf] %vm1326_vm15, %v1289_v47  ;;  %v1287_v52 = vpop.permute.xlu0 %1286  ;;  %v5702_v53 = vld [vmem:[#allocation4] sm:$0xff]  }
 0x187   : >> { %1331 = vst.msk [vmem:[#allocation4 + $0x10] sm:$0xf] %vm1326_vm15, %v1287_v52  ;;  %2413 = vrot.lane.b32.xlu1 %v2382_v24, %s5749_s12  ;;  %5607 = vmatprep.mubr.msk.bf16.mxu0 %vm2694_vm13, %v5702_v53 }
 0x188   : >> { %2411 = vrot.lane.b32.xlu0 %v2372_v46, %s5749_s12 }
 0x189   : >> { %v1305_v0 = vpop.permute.xlu1 %1304 }
 0x18a   : >> { %1340 = vst.msk [vmem:[#allocation4 + $0x34] sm:$0xf] %vm1326_vm15, %v1305_v0  ;;  %v1303_v45 = vpop.permute.xlu0 %1302  ;;  %v5703_v20 = vld [vmem:[#allocation4 + $0x20] sm:$0xff]  }
 0x18b   : >> { %1339 = vst.msk [vmem:[#allocation4 + $0x30] sm:$0xf] %vm1326_vm15, %v1303_v45  ;;  %2562 = vrot.lane.b32.xlu1 %v2516_v54, %s5750_s13  ;;  %5615 = vmatprep.mubr.msk.bf16.mxu1 %vm2694_vm13, %v5703_v20 }
 0x18c   : >> { %2560 = vrot.lane.b32.xlu0 %v2513_v2, %s5750_s13 }
 0x18d   : >> { %v2559_v48 = vpop.permute.xlu1 %2558 }
 0x18e   : >> { %2604 = vst.msk [vmem:[#allocation4 + $0xc] sm:$0xf] %vm2600_vm12, %v2559_v48  ;;  %v2557_v30 = vpop.permute.xlu0 %2556 }
 0x18f   : >> { %2603 = vst.msk [vmem:[#allocation4 + $0x8] sm:$0xf] %vm2600_vm12, %v2557_v30  ;;  %2578 = vrot.lane.b32.xlu1 %v2544_v57, %s5750_s13 }
 0x190   : >> { %2576 = vrot.lane.b32.xlu0 %v2541_v21, %s5750_s13 }
 0x191   : >> { %v2575_v35 = vpop.permute.xlu1 %2574 }
 0x192   : >> { %2612 = vst.msk [vmem:[#allocation4 + $0x2c] sm:$0xf] %vm2600_vm12, %v2575_v35  ;;  %v2573_v31 = vpop.permute.xlu0 %2572 }
 0x193   : >> { %2611 = vst.msk [vmem:[#allocation4 + $0x28] sm:$0xf] %vm2600_vm12, %v2573_v31  ;;  %2566 = vrot.lane.b32.xlu1 %v2523_v61, %s5750_s13 }
 0x194   : >> { %2564 = vrot.lane.b32.xlu0 %v2520_v36, %s5750_s13 }
 0x195   : >> { %v1293_v17 = vpop.permute.xlu1 %1292 }
 0x196   : >> { %1334 = vst.msk [vmem:[#allocation4 + $0x1c] sm:$0xf] %vm1326_vm15, %v1293_v17  ;;  %v1291_v23 = vpop.permute.xlu0 %1290  ;;  %v5704_v38 = vld [vmem:[#allocation4 + $0x8] sm:$0xff]  }
 0x197   : >> { %1333 = vst.msk [vmem:[#allocation4 + $0x18] sm:$0xf] %vm1326_vm15, %v1291_v23  ;;  %2582 = vrot.lane.b32.xlu1 %v2551_v19, %s5750_s13  ;;  %5608 = vmatmul.mubr.msk.bf16.vlgmr.msra.gmra.mxu0 %vm2694_vm13, %v5704_v38 }
 0x198   : >> { %2580 = vrot.lane.b32.xlu0 %v2548_v37, %s5750_s13 }
 0x199   : >> { %v1309_v39 = vpop.permute.xlu1 %1308 }
 0x19a   : >> { %1342 = vst.msk [vmem:[#allocation4 + $0x3c] sm:$0xf] %vm1326_vm15, %v1309_v39  ;;  %v1307_v40 = vpop.permute.xlu0 %1306  ;;  %v5705_v24 = vld [vmem:[#allocation4 + $0x28] sm:$0xff]  }
 0x19b   : >> { %1341 = vst.msk [vmem:[#allocation4 + $0x38] sm:$0xf] %vm1326_vm15, %v1307_v40  ;;  %5616 = vmatmul.mubr.msk.bf16.vlgmr.msra.gmra.mxu1 %vm2694_vm13, %v5705_v24 }
 0x19d   : >> { %v1461_v41 = vpop.permute.xlu1 %1460 }
 0x19e   : >> { %1504 = vst.msk [vmem:[#allocation4 + $0x14] sm:$0xf] %vm1498_vm1, %v1461_v41  ;;  %v1459_v42 = vpop.permute.xlu0 %1458 }
 0x19f   : >> { %1503 = vst.msk [vmem:[#allocation4 + $0x10] sm:$0xf] %vm1498_vm1, %v1459_v42 }
 0x1a1   : >> { %v1477_v43 = vpop.permute.xlu1 %1476 }
 0x1a2   : >> { %1512 = vst.msk [vmem:[#allocation4 + $0x34] sm:$0xf] %vm1498_vm1, %v1477_v43  ;;  %v1475_v47 = vpop.permute.xlu0 %1474 }
 0x1a3   : >> { %1511 = vst.msk [vmem:[#allocation4 + $0x30] sm:$0xf] %vm1498_vm1, %v1475_v47 }
 0x1a5   : >> { %v1465_v46 = vpop.permute.xlu1 %1464 }
 0x1a6   : >> { %1506 = vst.msk [vmem:[#allocation4 + $0x1c] sm:$0xf] %vm1498_vm1, %v1465_v46  ;;  %v1463_v49 = vpop.permute.xlu0 %1462 }
 0x1a7   : >> { %1505 = vst.msk [vmem:[#allocation4 + $0x18] sm:$0xf] %vm1498_vm1, %v1463_v49 }
 0x1a9   : >> { %v1481_v50 = vpop.permute.xlu1 %1480 }
 0x1aa   : >> { %1514 = vst.msk [vmem:[#allocation4 + $0x3c] sm:$0xf] %vm1498_vm1, %v1481_v50  ;;  %v1479_v52 = vpop.permute.xlu0 %1478 }
 0x1ab   : >> { %1513 = vst.msk [vmem:[#allocation4 + $0x38] sm:$0xf] %vm1498_vm1, %v1479_v52 }
 0x1ad   : >> { %v1562_v53 = vpop.permute.xlu1 %1561 }
 0x1ae   : >> { %1605 = vst.msk [vmem:[#allocation4 + $0x14] sm:$0xf] %vm1599_vm4, %v1562_v53  ;;  %v1560_v33 = vpop.permute.xlu0 %1559 }
 0x1af   : >> { %1604 = vst.msk [vmem:[#allocation4 + $0x10] sm:$0xf] %vm1599_vm4, %v1560_v33 }
 0x1b1   : >> { %v1578_v54 = vpop.permute.xlu1 %1577 }
 0x1b2   : >> { %1613 = vst.msk [vmem:[#allocation4 + $0x34] sm:$0xf] %vm1599_vm4, %v1578_v54  ;;  %v1576_v59 = vpop.permute.xlu0 %1575 }
 0x1b3   : >> { %1612 = vst.msk [vmem:[#allocation4 + $0x30] sm:$0xf] %vm1599_vm4, %v1576_v59 }
 0x1b5   : >> { %v1566_v60 = vpop.permute.xlu1 %1565 }
 0x1b6   : >> { %1607 = vst.msk [vmem:[#allocation4 + $0x1c] sm:$0xf] %vm1599_vm4, %v1566_v60  ;;  %v1564_v62 = vpop.permute.xlu0 %1563 }
 0x1b7   : >> { %1606 = vst.msk [vmem:[#allocation4 + $0x18] sm:$0xf] %vm1599_vm4, %v1564_v62 }
 0x1b9   : >> { %v1582_v63 = vpop.permute.xlu1 %1581 }
 0x1ba   : >> { %1615 = vst.msk [vmem:[#allocation4 + $0x3c] sm:$0xf] %vm1599_vm4, %v1582_v63  ;;  %v1580_v0 = vpop.permute.xlu0 %1579 }
 0x1bb   : >> { %1614 = vst.msk [vmem:[#allocation4 + $0x38] sm:$0xf] %vm1599_vm4, %v1580_v0 }
 0x1bd   : >> { %v1843_v2 = vpop.permute.xlu1 %1842 }
 0x1be   : >> { %1886 = vst.msk [vmem:[#allocation4 + $0x14] sm:$0xf] %vm1880_vm5, %v1843_v2  ;;  %v1841_v3 = vpop.permute.xlu0 %1840 }
 0x1bf   : >> { %1885 = vst.msk [vmem:[#allocation4 + $0x10] sm:$0xf] %vm1880_vm5, %v1841_v3 }
 0x1c1   : >> { %v1859_v16 = vpop.permute.xlu1 %1858 }
 0x1c2   : >> { %1894 = vst.msk [vmem:[#allocation4 + $0x34] sm:$0xf] %vm1880_vm5, %v1859_v16  ;;  %v1857_v45 = vpop.permute.xlu0 %1856 }
 0x1c3   : >> { %1893 = vst.msk [vmem:[#allocation4 + $0x30] sm:$0xf] %vm1880_vm5, %v1857_v45 }
 0x1c5   : >> { %v1847_v20 = vpop.permute.xlu1 %1846 }
 0x1c6   : >> { %1888 = vst.msk [vmem:[#allocation4 + $0x1c] sm:$0xf] %vm1880_vm5, %v1847_v20  ;;  %v1845_v58 = vpop.permute.xlu0 %1844 }
 0x1c7   : >> { %1887 = vst.msk [vmem:[#allocation4 + $0x18] sm:$0xf] %vm1880_vm5, %v1845_v58 }
 0x1c9   : >> { %v1863_v57 = vpop.permute.xlu1 %1862 }
 0x1ca   : >> { %1896 = vst.msk [vmem:[#allocation4 + $0x3c] sm:$0xf] %vm1880_vm5, %v1863_v57  ;;  %v1861_v44 = vpop.permute.xlu0 %1860 }
 0x1cb   : >> { %1895 = vst.msk [vmem:[#allocation4 + $0x38] sm:$0xf] %vm1880_vm5, %v1861_v44 }
 0x1cd   : >> { %v2012_v55 = vpop.permute.xlu1 %2011 }
 0x1ce   : >> { %2055 = vst.msk [vmem:[#allocation4 + $0x14] sm:$0xf] %vm2049_vm6, %v2012_v55  ;;  %v2010_v25 = vpop.permute.xlu0 %2009 }
 0x1cf   : >> { %2054 = vst.msk [vmem:[#allocation4 + $0x10] sm:$0xf] %vm2049_vm6, %v2010_v25 }
 0x1d1   : >> { %v2028_v48 = vpop.permute.xlu1 %2027 }
 0x1d2   : >> { %2063 = vst.msk [vmem:[#allocation4 + $0x34] sm:$0xf] %vm2049_vm6, %v2028_v48  ;;  %v2026_v21 = vpop.permute.xlu0 %2025 }
 0x1d3   : >> { %2062 = vst.msk [vmem:[#allocation4 + $0x30] sm:$0xf] %vm2049_vm6, %v2026_v21 }
 0x1d5   : >> { %v2016_v26 = vpop.permute.xlu1 %2015 }
 0x1d6   : >> { %2057 = vst.msk [vmem:[#allocation4 + $0x1c] sm:$0xf] %vm2049_vm6, %v2016_v26  ;;  %v2014_v29 = vpop.permute.xlu0 %2013 }
 0x1d7   : >> { %2056 = vst.msk [vmem:[#allocation4 + $0x18] sm:$0xf] %vm2049_vm6, %v2014_v29 }
 0x1d9   : >> { %v2032_v30 = vpop.permute.xlu1 %2031 }
 0x1da   : >> { %2065 = vst.msk [vmem:[#allocation4 + $0x3c] sm:$0xf] %vm2049_vm6, %v2032_v30  ;;  %v2030_v28 = vpop.permute.xlu0 %2029 }
 0x1db   : >> { %2064 = vst.msk [vmem:[#allocation4 + $0x38] sm:$0xf] %vm2049_vm6, %v2030_v28 }
 0x1dd   : >> { %v2113_v61 = vpop.permute.xlu1 %2112 }
 0x1de   : >> { %2156 = vst.msk [vmem:[#allocation4 + $0x14] sm:$0xf] %vm2150_vm9, %v2113_v61  ;;  %v2111_v32 = vpop.permute.xlu0 %2110 }
 0x1df   : >> { %2155 = vst.msk [vmem:[#allocation4 + $0x10] sm:$0xf] %vm2150_vm9, %v2111_v32 }
 0x1e1   : >> { %v2129_v34 = vpop.permute.xlu1 %2128 }
 0x1e2   : >> { %2164 = vst.msk [vmem:[#allocation4 + $0x34] sm:$0xf] %vm2150_vm9, %v2129_v34  ;;  %v2127_v35 = vpop.permute.xlu0 %2126 }
 0x1e3   : >> { %2163 = vst.msk [vmem:[#allocation4 + $0x30] sm:$0xf] %vm2150_vm9, %v2127_v35 }
 0x1e5   : >> { %v2117_v36 = vpop.permute.xlu1 %2116 }
 0x1e6   : >> { %2158 = vst.msk [vmem:[#allocation4 + $0x1c] sm:$0xf] %vm2150_vm9, %v2117_v36  ;;  %v2115_v22 = vpop.permute.xlu0 %2114 }
 0x1e7   : >> { %2157 = vst.msk [vmem:[#allocation4 + $0x18] sm:$0xf] %vm2150_vm9, %v2115_v22  ;;  %v5309_v22 = vld [vmem:[%s6956_s14 + $0x18] sm:$0xf] }
 0x1e9   : >> { %v2133_v31 = vpop.permute.xlu1 %2132 }
 0x1ea   : >> { %2166 = vst.msk [vmem:[#allocation4 + $0x3c] sm:$0xf] %vm2150_vm9, %v2133_v31  ;;  %v2131_v19 = vpop.permute.xlu0 %2130 }
 0x1eb   : >> { %2165 = vst.msk [vmem:[#allocation4 + $0x38] sm:$0xf] %vm2150_vm9, %v2131_v19 }
 0x1ed   : >> { %v2394_v17 = vpop.permute.xlu1 %2393 }
 0x1ee   : >> { %2437 = vst.msk [vmem:[#allocation4 + $0x14] sm:$0xf] %vm2431_vm10, %v2394_v17  ;;  %v2392_v37 = vpop.permute.xlu0 %2391 }
 0x1ef   : >> { %2436 = vst.msk [vmem:[#allocation4 + $0x10] sm:$0xf] %vm2431_vm10, %v2392_v37 }
 0x1f1   : >> { %v2410_v23 = vpop.permute.xlu1 %2409 }
 0x1f2   : >> { %2445 = vst.msk [vmem:[#allocation4 + $0x34] sm:$0xf] %vm2431_vm10, %v2410_v23  ;;  %v2408_v38 = vpop.permute.xlu0 %2407 }
 0x1f3   : >> { %2444 = vst.msk [vmem:[#allocation4 + $0x30] sm:$0xf] %vm2431_vm10, %v2408_v38 }
 0x1f5   : >> { %v2398_v39 = vpop.permute.xlu1 %2397 }
 0x1f6   : >> { %2439 = vst.msk [vmem:[#allocation4 + $0x1c] sm:$0xf] %vm2431_vm10, %v2398_v39  ;;  %v2396_v40 = vpop.permute.xlu0 %2395 }
 0x1f7   : >> { %2438 = vst.msk [vmem:[#allocation4 + $0x18] sm:$0xf] %vm2431_vm10, %v2396_v40 }
 0x1f9   : >> { %v2414_v24 = vpop.permute.xlu1 %2413 }
 0x1fa   : >> { %2447 = vst.msk [vmem:[#allocation4 + $0x3c] sm:$0xf] %vm2431_vm10, %v2414_v24  ;;  %v2412_v41 = vpop.permute.xlu0 %2411 }
 0x1fb   : >> { %2446 = vst.msk [vmem:[#allocation4 + $0x38] sm:$0xf] %vm2431_vm10, %v2412_v41  ;;  %v5304_v41 = vld [vmem:[%s6956_s14 + $0xc] sm:$0xf] }
 0x1fd   : >> { %v2563_v42 = vpop.permute.xlu1 %2562 }
 0x1fe   : >> { %2606 = vst.msk [vmem:[#allocation4 + $0x14] sm:$0xf] %vm2600_vm12, %v2563_v42  ;;  %v2561_v43 = vpop.permute.xlu0 %2560 }
 0x1ff   : >> { %2605 = vst.msk [vmem:[#allocation4 + $0x10] sm:$0xf] %vm2600_vm12, %v2561_v43 }
 0x201   : >> { %v2579_v47 = vpop.permute.xlu1 %2578 }
 0x202   : >> { %2614 = vst.msk [vmem:[#allocation4 + $0x34] sm:$0xf] %vm2600_vm12, %v2579_v47  ;;  %v2577_v46 = vpop.permute.xlu0 %2576 }
 0x203   : >> { %2613 = vst.msk [vmem:[#allocation4 + $0x30] sm:$0xf] %vm2600_vm12, %v2577_v46 }
 0x205   : >> { %v2567_v49 = vpop.permute.xlu1 %2566 }
 0x206   : >> { %2608 = vst.msk [vmem:[#allocation4 + $0x1c] sm:$0xf] %vm2600_vm12, %v2567_v49  ;;  %v2565_v50 = vpop.permute.xlu0 %2564  ;;  %v5706_v52 = vld [vmem:[#allocation4 + $0x10] sm:$0xff]  }
 0x207   : >> { %2607 = vst.msk [vmem:[#allocation4 + $0x18] sm:$0xf] %vm2600_vm12, %v2565_v50  ;;  %5611 = vmatprep.mubr.msk.bf16.mxu0 %vm2694_vm13, %v5706_v52 }
 0x209   : >> { %v2583_v53 = vpop.permute.xlu1 %2582 }
 0x20a   : >> { %2616 = vst.msk [vmem:[#allocation4 + $0x3c] sm:$0xf] %vm2600_vm12, %v2583_v53  ;;  %v2581_v33 = vpop.permute.xlu0 %2580  ;;  %v5707_v54 = vld [vmem:[#allocation4 + $0x30] sm:$0xff]  }
 0x20b   : >> { %2615 = vst.msk [vmem:[#allocation4 + $0x38] sm:$0xf] %vm2600_vm12, %v2581_v33  ;;  %5619 = vmatprep.mubr.msk.bf16.mxu1 %vm2694_vm13, %v5707_v54  ;;  %v5312_v33 = vld [vmem:[%s6956_s14 + $0x20] sm:$0x1] }
 0x20e   : >> { %v5708_v59 = vld [vmem:[#allocation4 + $0x18] sm:$0xff]  }
 0x20f   : >> { %5612 = vmatmul.mubr.msk.bf16.gmra.mxu0 %vm2694_vm13, %v5708_v59 }
 0x212   : >> { %v5709_v60 = vld [vmem:[#allocation4 + $0x38] sm:$0xff]  }
 0x213   : >> { %5620 = vmatmul.mubr.msk.bf16.gmra.mxu1 %vm2694_vm13, %v5709_v60 }
 0x257   : >> { %v5609_v62 = vpop.f32.mrf.mxu0 }
 0x258   : >> { %v2766_v63 = vadd.f32 %v5609_v62, %v5919_v9 }
 0x259   : >> { %v2757_v0 = vpop.f32.mrf.mxu0 }
 0x25a   : >> { %v2822_v2 = vmax.f32 %v2766_v63, 0.0  ;;  %v2758_v3 = vadd.f32 %v5919_v9, %v2757_v0 }
 0x25b   : >> { %v5610_v16 = vpop.f32.mrf.mxu0  ;;  %v5617_v45 = vpop.f32.mrf.mxu1 }
 0x25c   : >> { %v5563_v20 = vpack.c.bf16 %v2822_v2, %v2822_v2  ;;  %v2820_v58 = vmax.f32 %v2758_v3, 0.0  ;;  %v2769_v57 = vadd.f32 %v5610_v16, %v5919_v9  ;;  %v2798_v44 = vadd.f32 %v5617_v45, %v5919_v9  ;;  %v5329_v2 = vld [vmem:[%s6956_s14 + $0x48] sm:$0xf] }
 0x25d   : >> { %v2760_v55 = vpop.f32.mrf.mxu0  ;;  %v2789_v25 = vpop.f32.mrf.mxu1 }
 0x25e   : >> { %v2902_v48 = vshrl.u32 %v5563_v20, 16  ;;  %v5561_v21 = vpack.c.bf16 %v2820_v58, %v2820_v58  ;;  %v2823_v26 = vmax.f32 %v2769_v57, 0.0  ;;  %v2830_v29 = vmax.f32 %v2798_v44, 0.0 }
 0x25f   : >> { %v2761_v30 = vadd.f32 %v5919_v9, %v2760_v55  ;;  %v2790_v28 = vadd.f32 %v5919_v9, %v2789_v25  ;;  %v5618_v61 = vpop.f32.mrf.mxu1  ;;  %v2905_v34 = vshll.u32 %v5563_v20, 16  ;;  %v5307_v25 = vld [vmem:[%s6956_s14 + $0x14] sm:$0x1] }
 0x260   : >> { %v2904_v32 = vrot.slane %v2902_v48, 7  ;;  %v2885_v35 = vshrl.u32 %v5561_v21, 16  ;;  %v5564_v36 = vpack.c.bf16 %v2823_v26, %v2823_v26  ;;  %v2888_v31 = vshll.u32 %v5561_v21, 16 }
 0x261   : >> { %v5571_v19 = vpack.c.bf16 %v2830_v29, %v2830_v29  ;;  %v2821_v17 = vmax.f32 %v2761_v30, 0.0  ;;  %v2828_v37 = vmax.f32 %v2790_v28, 0.0  ;;  %v2801_v40 = vadd.f32 %v5618_v61, %v5919_v9  ;;  %v2792_v57 = vpop.f32.mrf.mxu1  ;;  %v5324_v61 = vld [vmem:[%s6956_s14 + $0x3c] sm:$0xf] }
 0x262   : >> { %v2907_v23 = vor.u32 %v2905_v34, %v2904_v32  ;;  %v2887_v38 = vrot.slane %v2885_v35, 7  ;;  %v2910_v39 = vshrl.u32 %v5564_v36, 16  ;;  %v2908_v24 = vrot.slane %v2904_v32, 4 }
 0x263   : >> { %v2913_v42 = vshll.u32 %v5564_v36, 16  ;;  %v2970_v43 = vshrl.u32 %v5571_v19, 16  ;;  %v5562_v47 = vpack.c.bf16 %v2821_v17, %v2821_v17  ;;  %v2973_v52 = vshll.u32 %v5571_v19, 16 }
 0x264   : >> { %v3054_v46 = vsel %vm6037_vm7, %v2907_v23, %v5309_v22  ;;  %v2890_v49 = vor.u32 %v2888_v31, %v2887_v38  ;;  %v2912_v50 = vrot.slane %v2910_v39, 7  ;;  %v2891_v53 = vrot.slane %v2887_v38, 4  ;;  %v5332_v23 = vld [vmem:[%s6956_s14 + $0x50] sm:$0x1] }
 0x265   : >> { %5310 = vst [vmem:[%s6956_s14 + $0x18] sm:$0xf] %v3054_v46  ;;  %v2972_v54 = vrot.slane %v2970_v43, 7  ;;  %v2893_v59 = vshrl.u32 %v5562_v47, 16  ;;  %v5569_v60 = vpack.c.bf16 %v2828_v37, %v2828_v37  ;;  %v2831_v3 = vmax.f32 %v2801_v40, 0.0 }
 0x266   : >> { %v3047_v62 = vsel %vm6037_vm7, %v2890_v49, %v5304_v41  ;;  %v2915_v63 = vor.u32 %v2913_v42, %v2912_v50  ;;  %v2917_v0 = vrot.slane %v2912_v50, 4  ;;  %v2896_v20 = vshll.u32 %v5562_v47, 16  ;;  %v5327_v49 = vld [vmem:[%s6956_s14 + $0x44] sm:$0x1] }
 0x267   : >> { %5305 = vst [vmem:[%s6956_s14 + $0xc] sm:$0xf] %v3047_v62  ;;  %v2975_v16 = vor.u32 %v2973_v52, %v2972_v54  ;;  %v2895_v45 = vrot.slane %v2893_v59, 7  ;;  %v2953_v58 = vshrl.u32 %v5569_v60, 16  ;;  %v2956_v48 = vshll.u32 %v5569_v60, 16 }
 0x268   : >> { %v2916_v44 = vsel %vm6043_vm8, %v2908_v24, %v2915_v63  ;;  %v3058_v55 = vsel %vm5799_vm3, %v2917_v0, %v5312_v33  ;;  %v5572_v21 = vpack.c.bf16 %v2831_v3, %v2831_v3  ;;  %v2793_v34 = vadd.f32 %v5919_v9, %v2792_v57 }
 0x269   : >> { %5311 = vst.msk [vmem:[%s6956_s14 + $0x1c] sm:$0xf] %vm226_vm2, %v2916_v44  ;;  %5313 = vst [vmem:[%s6956_s14 + $0x20] sm:$0x1] %v3058_v55  ;;  %v3082_v26 = vsel %vm6037_vm7, %v2975_v16, %v5329_v2  ;;  %v2898_v29 = vor.u32 %v2896_v20, %v2895_v45  ;;  %v2900_v30 = vrot.slane %v2895_v45, 4  ;;  %v2955_v28 = vrot.slane %v2953_v58, 7 }
 0x26a   : >> { %5330 = vst [vmem:[%s6956_s14 + $0x48] sm:$0xf] %v3082_v26  ;;  %v2978_v32 = vshrl.u32 %v5572_v21, 16  ;;  %v2981_v19 = vshll.u32 %v5572_v21, 16  ;;  %v2829_v17 = vmax.f32 %v2793_v34, 0.0  ;;  %v2976_v38 = vrot.slane %v2972_v54, 4 }
 0x26b   : >> { %v2899_v35 = vsel %vm6043_vm8, %v2891_v53, %v2898_v29  ;;  %v3051_v36 = vsel %vm5799_vm3, %v2900_v30, %v5307_v25  ;;  %v2958_v22 = vor.u32 %v2956_v48, %v2955_v28  ;;  %v2959_v50 = vrot.slane %v2955_v28, 4 }
 0x26c   : >> { %5306 = vst.msk [vmem:[%s6956_s14 + $0x10] sm:$0xf] %vm226_vm2, %v2899_v35  ;;  %5308 = vst [vmem:[%s6956_s14 + $0x14] sm:$0x1] %v3051_v36  ;;  %v2980_v31 = vrot.slane %v2978_v32, 7  ;;  %v5570_v24 = vpack.c.bf16 %v2829_v17, %v2829_v17 }
 0x26d   : >> { %v3075_v37 = vsel %vm6037_vm7, %v2958_v22, %v5324_v61  ;;  %v5319_v35 = vld [vmem:[%s6956_s14 + $0x30] sm:$0xf] }
 0x26e   : >> { %5325 = vst [vmem:[%s6956_s14 + $0x3c] sm:$0xf] %v3075_v37  ;;  %v2983_v39 = vor.u32 %v2981_v19, %v2980_v31  ;;  %v2985_v40 = vrot.slane %v2980_v31, 4  ;;  %v2961_v43 = vshrl.u32 %v5570_v24, 16  ;;  %v2964_v46 = vshll.u32 %v5570_v24, 16 }
 0x270   : >> { %v2984_v41 = vsel %vm6043_vm8, %v2976_v38, %v2983_v39  ;;  %v3086_v42 = vsel %vm5799_vm3, %v2985_v40, %v5332_v23  ;;  %v2963_v47 = vrot.slane %v2961_v43, 7  ;;  %v5314_v40 = vld [vmem:[%s6956_s14 + $0x24] sm:$0xf] }
 0x271   : >> { %5331 = vst.msk [vmem:[%s6956_s14 + $0x4c] sm:$0xf] %vm226_vm2, %v2984_v41  ;;  %5333 = vst [vmem:[%s6956_s14 + $0x50] sm:$0x1] %v3086_v42 }
 0x272   : >> { %v2966_v52 = vor.u32 %v2964_v46, %v2963_v47  ;;  %v2968_v53 = vrot.slane %v2963_v47, 4 }
 0x274   : >> { %v2967_v33 = vsel %vm6043_vm8, %v2959_v50, %v2966_v52  ;;  %v3079_v54 = vsel %vm5799_vm3, %v2968_v53, %v5327_v49  ;;  %v5322_v52 = vld [vmem:[%s6956_s14 + $0x38] sm:$0x1] }
 0x275   : >> { %5326 = vst.msk [vmem:[%s6956_s14 + $0x40] sm:$0xf] %vm226_vm2, %v2967_v33  ;;  %5328 = vst [vmem:[%s6956_s14 + $0x44] sm:$0x1] %v3079_v54 }
 0x2cf   : >> { %v5613_v59 = vpop.f32.mrf.mxu0 }
 0x2d0   : >> { %v2782_v60 = vadd.f32 %v5613_v59, %v5919_v9 }
 0x2d1   : >> { %v2773_v62 = vpop.f32.mrf.mxu0 }
 0x2d2   : >> { %v2826_v63 = vmax.f32 %v2782_v60, 0.0  ;;  %v2774_v0 = vadd.f32 %v5919_v9, %v2773_v62 }
 0x2d3   : >> { %v5614_v2 = vpop.f32.mrf.mxu0  ;;  %v5621_v3 = vpop.f32.mrf.mxu1 }
 0x2d4   : >> { %v5567_v16 = vpack.c.bf16 %v2826_v63, %v2826_v63  ;;  %v2824_v45 = vmax.f32 %v2774_v0, 0.0  ;;  %v2785_v20 = vadd.f32 %v5614_v2, %v5919_v9  ;;  %v2814_v58 = vadd.f32 %v5621_v3, %v5919_v9  ;;  %v5339_v63 = vld [vmem:[%s6956_s14 + $0x60] sm:$0xf] }
 0x2d5   : >> { %v2776_v57 = vpop.f32.mrf.mxu0  ;;  %v2805_v44 = vpop.f32.mrf.mxu1 }
 0x2d6   : >> { %v2936_v55 = vshrl.u32 %v5567_v16, 16  ;;  %v5565_v25 = vpack.c.bf16 %v2824_v45, %v2824_v45  ;;  %v2827_v48 = vmax.f32 %v2785_v20, 0.0  ;;  %v2834_v21 = vmax.f32 %v2814_v58, 0.0 }
 0x2d7   : >> { %v2777_v26 = vadd.f32 %v5919_v9, %v2776_v57  ;;  %v2806_v29 = vadd.f32 %v5919_v9, %v2805_v44  ;;  %v5622_v30 = vpop.f32.mrf.mxu1  ;;  %v2939_v61 = vshll.u32 %v5567_v16, 16  ;;  %v5317_v44 = vld [vmem:[%s6956_s14 + $0x2c] sm:$0x1] }
 0x2d8   : >> { %v2938_v28 = vrot.slane %v2936_v55, 7  ;;  %v2919_v32 = vshrl.u32 %v5565_v25, 16  ;;  %v5568_v34 = vpack.c.bf16 %v2827_v48, %v2827_v48  ;;  %v2922_v36 = vshll.u32 %v5565_v25, 16 }
 0x2d9   : >> { %v5575_v22 = vpack.c.bf16 %v2834_v21, %v2834_v21  ;;  %v2825_v31 = vmax.f32 %v2777_v26, 0.0  ;;  %v2832_v19 = vmax.f32 %v2806_v29, 0.0  ;;  %v2817_v38 = vadd.f32 %v5622_v30, %v5919_v9  ;;  %v2808_v20 = vpop.f32.mrf.mxu1  ;;  %v5334_v30 = vld [vmem:[%s6956_s14 + $0x54] sm:$0xf] }
 0x2da   : >> { %v2941_v17 = vor.u32 %v2939_v61, %v2938_v28  ;;  %v2921_v37 = vrot.slane %v2919_v32, 7  ;;  %v2944_v23 = vshrl.u32 %v5568_v34, 16  ;;  %v2942_v39 = vrot.slane %v2938_v28, 4 }
 0x2db   : >> { %v2947_v24 = vshll.u32 %v5568_v34, 16  ;;  %v3004_v41 = vshrl.u32 %v5575_v22, 16  ;;  %v5566_v42 = vpack.c.bf16 %v2825_v31, %v2825_v31  ;;  %v3007_v49 = vshll.u32 %v5575_v22, 16 }
 0x2dc   : >> { %v3068_v43 = vsel %vm6037_vm7, %v2941_v17, %v5319_v35  ;;  %v2924_v47 = vor.u32 %v2922_v36, %v2921_v37  ;;  %v2946_v46 = vrot.slane %v2944_v23, 7  ;;  %v2925_v50 = vrot.slane %v2921_v37, 4  ;;  %v5342_v17 = vld [vmem:[%s6956_s14 + $0x68] sm:$0x1] }
 0x2dd   : >> { %5320 = vst [vmem:[%s6956_s14 + $0x30] sm:$0xf] %v3068_v43  ;;  %v3006_v53 = vrot.slane %v3004_v41, 7  ;;  %v2927_v33 = vshrl.u32 %v5566_v42, 16  ;;  %v5573_v54 = vpack.c.bf16 %v2832_v19, %v2832_v19  ;;  %v2835_v0 = vmax.f32 %v2817_v38, 0.0 }
 0x2de   : >> { %v3061_v59 = vsel %vm6037_vm7, %v2924_v47, %v5314_v40  ;;  %v2949_v60 = vor.u32 %v2947_v24, %v2946_v46  ;;  %v2951_v62 = vrot.slane %v2946_v46, 4  ;;  %v2930_v16 = vshll.u32 %v5566_v42, 16  ;;  %v5337_v47 = vld [vmem:[%s6956_s14 + $0x5c] sm:$0x1] }
 0x2df   : >> { %5315 = vst [vmem:[%s6956_s14 + $0x24] sm:$0xf] %v3061_v59  ;;  %v3009_v2 = vor.u32 %v3007_v49, %v3006_v53  ;;  %v2929_v3 = vrot.slane %v2927_v33, 7  ;;  %v2987_v45 = vshrl.u32 %v5573_v54, 16  ;;  %v2990_v55 = vshll.u32 %v5573_v54, 16 }
 0x2e0   : >> { %v2950_v58 = vsel %vm6043_vm8, %v2942_v39, %v2949_v60  ;;  %v3072_v57 = vsel %vm5799_vm3, %v2951_v62, %v5322_v52  ;;  %v5576_v25 = vpack.c.bf16 %v2835_v0, %v2835_v0  ;;  %v2809_v61 = vadd.f32 %v5919_v9, %v2808_v20 }
 0x2e1   : >> { %5321 = vst.msk [vmem:[%s6956_s14 + $0x34] sm:$0xf] %vm226_vm2, %v2950_v58  ;;  %5323 = vst [vmem:[%s6956_s14 + $0x38] sm:$0x1] %v3072_v57  ;;  %v3096_v48 = vsel %vm6037_vm7, %v3009_v2, %v5339_v63  ;;  %v2932_v21 = vor.u32 %v2930_v16, %v2929_v3  ;;  %v2934_v26 = vrot.slane %v2929_v3, 4  ;;  %v2989_v29 = vrot.slane %v2987_v45, 7 }
 0x2e2   : >> { %5340 = vst [vmem:[%s6956_s14 + $0x60] sm:$0xf] %v3096_v48  ;;  %v3012_v28 = vshrl.u32 %v5576_v25, 16  ;;  %v3015_v22 = vshll.u32 %v5576_v25, 16  ;;  %v2833_v31 = vmax.f32 %v2809_v61, 0.0  ;;  %v3010_v37 = vrot.slane %v3006_v53, 4 }
 0x2e3   : >> { %v2933_v32 = vsel %vm6043_vm8, %v2925_v50, %v2932_v21  ;;  %v3065_v34 = vsel %vm5799_vm3, %v2934_v26, %v5317_v44  ;;  %v2992_v35 = vor.u32 %v2990_v55, %v2989_v29  ;;  %v2993_v46 = vrot.slane %v2989_v29, 4 }
 0x2e4   : >> { %5316 = vst.msk [vmem:[%s6956_s14 + $0x28] sm:$0xf] %vm226_vm2, %v2933_v32  ;;  %5318 = vst [vmem:[%s6956_s14 + $0x2c] sm:$0x1] %v3065_v34  ;;  %v3014_v36 = vrot.slane %v3012_v28, 7  ;;  %v5574_v39 = vpack.c.bf16 %v2833_v31, %v2833_v31 }
 0x2e5   : >> { %v3089_v19 = vsel %vm6037_vm7, %v2992_v35, %v5334_v30 }
 0x2e6   : >> { %5335 = vst [vmem:[%s6956_s14 + $0x54] sm:$0xf] %v3089_v19  ;;  %v3017_v23 = vor.u32 %v3015_v22, %v3014_v36  ;;  %v3019_v38 = vrot.slane %v3014_v36, 4  ;;  %v2995_v41 = vshrl.u32 %v5574_v39, 16  ;;  %v2998_v43 = vshll.u32 %v5574_v39, 16 }
 0x2e8   : >> { %v3018_v40 = vsel %vm6043_vm8, %v3010_v37, %v3017_v23  ;;  %v3100_v24 = vsel %vm5799_vm3, %v3019_v38, %v5342_v17  ;;  %v2997_v42 = vrot.slane %v2995_v41, 7 }
 0x2e9   : >> { %5341 = vst.msk [vmem:[%s6956_s14 + $0x64] sm:$0xf] %vm226_vm2, %v3018_v40  ;;  %5343 = vst [vmem:[%s6956_s14 + $0x68] sm:$0x1] %v3100_v24  ;;  %1021 = sbr.rel (!%p1019_p4) target bundleno = 139 (0x8b), region = 97 }
 0x2ea   : >> { %v3000_v49 = vor.u32 %v2998_v43, %v2997_v42  ;;  %v3002_v50 = vrot.slane %v2997_v42, 4 }
 0x2ec   : >> { %v3001_v52 = vsel %vm6043_vm8, %v2993_v46, %v3000_v49  ;;  %v3093_v53 = vsel %vm5799_vm3, %v3002_v50, %v5337_v47 }
 0x2ed   : >> { %5336 = vst.msk [vmem:[%s6956_s14 + $0x58] sm:$0xf] %vm226_vm2, %v3001_v52  ;;  %5338 = vst [vmem:[%s6956_s14 + $0x5c] sm:$0x1] %v3093_v53 }
 0x2ee LB: >> { %s5577_s16 = smul.u32 96, %s5740_s15  ;;  %s5751_s21 = smov 4   ;;  %vm4956_vm3 = vcmask 31744   ;;  %s5740_s15 = sphi %s7067_s15, %s3107_s15  }
 0x2ef   : >> { %s5752_s22 = smov 8   ;;  %s5753_s23 = smov 12  }
 0x2f0   : >> { %s7073_s17 = scalar_lea.vmem [#allocation3], %s5577_s16  ;;  %s5754_s24 = smov 16  }
 0x2f1   : >> { %s5755_s25 = smov 20   ;;  %s5756_s27 = smov 24  }
 0x2f2   : >> { %s5757_s28 = smov 28   ;;  %s5758_s19 = smov 32  }
 0x2f3   : >> { %s5578_s20 = sshll.u32 %s5740_s15, 7  ;;  %s3107_s15 = sadd.s32 1, %s5740_s15  }
 0x2f4   : >> { %v3156_v33 = vld [vmem:[%s7073_s17 + $0x30] sm:$0xf]  ;;  %v3157_v54 = vld [vmem:[%s7073_s17 + $0x34] sm:$0xf]  ;;  %v3144_v59 = vld [vmem:[%s7073_s17] sm:$0xf]  ;;  %s7820_s30 = scalar_lea.vmem %s6022_s26, %s5578_s20  ;;  %s7827_s6 = scalar_lea.vmem %s6027_s29, %s5578_s20 }
 0x2f5   : >> { %v3268_v1 = vshrl.u32 %v3156_v33, 16  ;;  %v3271_v4 = vshll.u32 %v3156_v33, 16  ;;  %v3277_v5 = vshll.u32 %v3157_v54, 16  ;;  %v3281_v6 = vshrl.u32 %v3157_v54, 16  ;;  %v3145_v7 = vld [vmem:[%s7073_s17 + $0x4] sm:$0xf] }
 0x2f6   : >> { %v3172_v8 = vshrl.u32 %v3144_v59, 16  ;;  %v3175_v9 = vshll.u32 %v3144_v59, 16  ;;  %v3181_v51 = vshll.u32 %v3145_v7, 16  ;;  %v3185_v56 = vshrl.u32 %v3145_v7, 16  ;;  %v3158_v60 = vld [vmem:[%s7073_s17 + $0x38] sm:$0x1] }
 0x2f7   : >> { %v3270_v62 = vrot.slane %v3268_v1, 4  ;;  %v3273_v63 = vrot.slane %v3271_v4, 5  ;;  %v3279_v0 = vrot.slane %v3277_v5, 5  ;;  %v3283_v2 = vrot.slane %v3281_v6, 4  ;;  %v3146_v3 = vld [vmem:[%s7073_s17 + $0x8] sm:$0x1] }
 0x2f8   : >> { %v3174_v16 = vrot.slane %v3172_v8, 4  ;;  %v3177_v45 = vrot.slane %v3175_v9, 5  ;;  %v3183_v20 = vrot.slane %v3181_v51, 5  ;;  %v3187_v58 = vrot.slane %v3185_v56, 4  ;;  %v3148_v57 = vld [vmem:[%s7073_s17 + $0x10] sm:$0xf] }
 0x2f9   : >> { %v3274_v44 = vor.u32 %v3273_v63, %v3270_v62  ;;  %v3284_v55 = vor.u32 %v3283_v2, %v3279_v0  ;;  %v3287_v25 = vshll.u32 %v3158_v60, 16  ;;  %v3191_v48 = vshll.u32 %v3146_v3, 16  ;;  %v3149_v29 = vld [vmem:[%s7073_s17 + $0x14] sm:$0x1]  ;;  %v3147_v61 = vld [vmem:[%s7073_s17 + $0xc] sm:$0xf] }
 0x2fa   : >> { %v3178_v21 = vor.u32 %v3177_v45, %v3174_v16  ;;  %v3188_v26 = vor.u32 %v3187_v58, %v3183_v20  ;;  %v3205_v30 = vshll.u32 %v3148_v57, 16  ;;  %v3209_v28 = vshrl.u32 %v3148_v57, 16  ;;  %v3160_v37 = vld [vmem:[%s7073_s17 + $0x40] sm:$0xf]  ;;  %v3161_v24 = vld [vmem:[%s7073_s17 + $0x44] sm:$0x1] }
 0x2fb   : >> { %v3275_v32 = vrot.slane %v3274_v44, 4  ;;  %v3285_v34 = vrot.slane %v3284_v55, 4  ;;  %v3289_v35 = vrot.slane %v3287_v25, 5  ;;  %v3193_v36 = vrot.slane %v3191_v48, 5  ;;  %v3159_v41 = vld [vmem:[%s7073_s17 + $0x3c] sm:$0xf] }
 0x2fc   : >> { %v3179_v22 = vrot.slane %v3178_v21, 4  ;;  %v3189_v31 = vrot.slane %v3188_v26, 4  ;;  %v3207_v19 = vrot.slane %v3205_v30, 5  ;;  %v3211_v17 = vrot.slane %v3209_v28, 4  ;;  %v3429_v33 = vld [vmem:[%s7073_s17 + $0x4] sm:$0xf] }
 0x2fd   : >> { %v3280_v23 = vsel %vm6204_vm11, %v3275_v32, %v3279_v0  ;;  %v3290_v38 = vsel %vm6204_vm11, %v3285_v34, %v3289_v35  ;;  %v3215_v39 = vshll.u32 %v3149_v29, 16  ;;  %v3196_v40 = vshrl.u32 %v3147_v61, 16  ;;  %v3430_v2 = vld [vmem:[%s7073_s17 + $0x8] sm:$0x1]  ;;  %v3441_v3 = vld [vmem:[%s7073_s17 + $0x34] sm:$0xf] }
 0x2fe   : >> { %3379 = vrot.lane.b32.xlu1 %v3280_v23, %s5751_s21  ;;  %v3184_v42 = vsel %vm6204_vm11, %v3179_v22, %v3183_v20  ;;  %v3194_v43 = vsel %vm6204_vm11, %v3189_v31, %v3193_v36  ;;  %v3212_v47 = vor.u32 %v3211_v17, %v3207_v19  ;;  %v3199_v46 = vshll.u32 %v3147_v61, 16  ;;  %v3428_v20 = vld [vmem:[%s7073_s17] sm:$0xe]  ;;  %v3442_v26 = vld [vmem:[%s7073_s17 + $0x38] sm:$0x1]  ;;  %p3104_p5 = scmp.ge.s32.totalorder %s3107_s15, 2  }
 0x2ff   : >> { %3363 = vrot.lane.b32.xlu0 %v3184_v42, %s5751_s21  ;;  %v3217_v49 = vrot.slane %v3215_v39, 5  ;;  %v3198_v50 = vrot.slane %v3196_v40, 4  ;;  %v3301_v52 = vshll.u32 %v3160_v37, 16  ;;  %v3305_v53 = vshrl.u32 %v3160_v37, 16  ;;  %v3432_v29 = vld [vmem:[%s7073_s17 + $0x10] sm:$0xf] }
 0x300   : >> { %v3213_v54 = vrot.slane %v3212_v47, 4  ;;  %v3201_v59 = vrot.slane %v3199_v46, 5  ;;  %v3311_v1 = vshll.u32 %v3161_v24, 16  ;;  %v3292_v4 = vshrl.u32 %v3159_v41, 16  ;;  %v3440_v28 = vld [vmem:[%s7073_s17 + $0x30] sm:$0xe] }
 0x301   : >> { %v3303_v5 = vrot.slane %v3301_v52, 5  ;;  %v3307_v6 = vrot.slane %v3305_v53, 4  ;;  %v3295_v7 = vshll.u32 %v3159_v41, 16  ;;  %v3481_v51 = vrot.slane %v3429_v33, 5  ;;  %v3433_v31 = vld [vmem:[%s7073_s17 + $0x14] sm:$0x1] }
 0x302   : >> { %3381 = vrot.lane.b32.xlu1 %v3290_v38, %s5751_s21  ;;  %v3202_v8 = vor.u32 %v3201_v59, %v3198_v50  ;;  %v3294_v9 = vrot.slane %v3292_v4, 4  ;;  %v3218_v56 = vsel %vm6204_vm11, %v3213_v54, %v3217_v49  ;;  %v3313_v62 = vrot.slane %v3311_v1, 5  ;;  %v3431_v17 = vld [vmem:[%s7073_s17 + $0xc] sm:$0xe]  ;;  %v3445_v41 = vld [vmem:[%s7073_s17 + $0x44] sm:$0x1] }
 0x303   : >> { %3365 = vrot.lane.b32.xlu0 %v3194_v43, %s5751_s21  ;;  %v3308_v60 = vor.u32 %v3307_v6, %v3303_v5  ;;  %v3297_v63 = vrot.slane %v3295_v7, 5  ;;  %v3483_v57 = vrot.slane %v3481_v51, 4  ;;  %v3484_v25 = vrot.slane %v3430_v2, 5  ;;  %v3443_v42 = vld [vmem:[%s7073_s17 + $0x3c] sm:$0xe] }
 0x304   : >> { %v3203_v0 = vrot.slane %v3202_v8, 4  ;;  %v3509_v48 = vrot.slane %v3441_v3, 5  ;;  %v5347_v21 = vrot.slane %v3428_v20, 9  ;;  %v3512_v34 = vrot.slane %v3442_v26, 5  ;;  %v5374_v52 = vld [vmem:[%s7073_s17 + $0x10] sm:$0xf] }
 0x305   : >> { %v3309_v16 = vrot.slane %v3308_v60, 4  ;;  %v3298_v45 = vor.u32 %v3297_v63, %v3294_v9  ;;  %v3485_v61 = vsel %vm6237_vm14, %v3483_v57, %v3484_v25  ;;  %v3488_v35 = vrot.slane %v3432_v29, 5  ;;  %v5373_v33 = vld [vmem:[%s7073_s17 + $0xc] sm:$0xf]  ;;  %v5386_v6 = vld [vmem:[%s7073_s17 + $0x40] sm:$0xf] }
 0x306   : >> { %3369 = vrot.lane.b32.xlu1 %v3218_v56, %s5751_s21  ;;  %v3208_v58 = vsel %vm6204_vm11, %v3203_v0, %v3207_v19  ;;  %v3511_v32 = vrot.slane %v3509_v48, 4  ;;  %v3482_v36 = vsel %vm6237_vm14, %v5347_v21, %v3481_v51  ;;  %v5351_v22 = vrot.slane %v3440_v28, 9  ;;  %v3444_v19 = vld [vmem:[%s7073_s17 + $0x40] sm:$0xf]  ;;  %v5358_v7 = vld [vmem:[%s7073_s17 + $0x10] sm:$0xf] }
 0x307   : >> { %3367 = vrot.lane.b32.xlu0 %v3208_v58, %s5751_s21  ;;  %v3314_v44 = vsel %vm6204_vm11, %v3309_v16, %v3313_v62  ;;  %v3299_v55 = vrot.slane %v3298_v45, 4  ;;  %v3490_v23 = vrot.slane %v3488_v35, 4  ;;  %v3491_v38 = vrot.slane %v3433_v31, 5  ;;  %v5357_v8 = vld [vmem:[%s7073_s17 + $0xc] sm:$0xf] }
 0x308   : >> { %v3513_v37 = vsel %vm6237_vm14, %v3511_v32, %v3512_v34  ;;  %v3516_v39 = vrot.slane %v3444_v19, 5  ;;  %v3510_v40 = vsel %vm6237_vm14, %v5351_v22, %v3509_v48  ;;  %v5348_v24 = vrot.slane %v3431_v17, 9  ;;  %v5385_v9 = vld [vmem:[%s7073_s17 + $0x3c] sm:$0xf]  ;;  %v5375_v60 = vld [vmem:[%s7073_s17 + $0x14] sm:$0x1] }
 0x309   : >> { %v3304_v30 = vsel %vm6204_vm11, %v3299_v55, %v3303_v5  ;;  %v3492_v43 = vsel %vm6237_vm14, %v3490_v23, %v3491_v38  ;;  %v3519_v46 = vrot.slane %v3445_v41, 5  ;;  %v5352_v50 = vrot.slane %v3443_v42, 9  ;;  %v5366_v3 = vld [vmem:[%s7073_s17 + $0x40] sm:$0xf]  ;;  %v5377_v20 = vld [vmem:[%s7073_s17 + $0x1c] sm:$0xf] }
 0x30a   : >> { %3385 = vrot.lane.b32.xlu1 %v3314_v44, %s5751_s21  ;;  %v3518_v47 = vrot.slane %v3516_v39, 4  ;;  %v3489_v49 = vsel %vm6237_vm14, %v5348_v24, %v3488_v35  ;;  %v3735_v59 = vshll.u32 %v5374_v52, 16  ;;  %v3739_v1 = vshrl.u32 %v5374_v52, 16  ;;  %v5365_v58 = vld [vmem:[%s7073_s17 + $0x3c] sm:$0xf] }
 0x30b   : >> { %3383 = vrot.lane.b32.xlu0 %v3304_v30, %s5751_s21  ;;  %v3517_v54 = vsel %vm6237_vm14, %v5352_v50, %v3516_v39  ;;  %v3726_v4 = vshrl.u32 %v5373_v33, 16  ;;  %v3729_v5 = vshll.u32 %v5373_v33, 16  ;;  %v3831_v56 = vshll.u32 %v5386_v6, 16  ;;  %v5376_v55 = vld [vmem:[%s7073_s17 + $0x18] sm:$0xf] }
 0x30c   : >> { %v3520_v53 = vsel %vm6237_vm14, %v3518_v47, %v3519_v46  ;;  %v7153_v51 = vrot.slane %v3735_v59, 5  ;;  %v3741_v62 = vrot.slane %v3739_v1, 4  ;;  %v3835_v2 = vshrl.u32 %v5386_v6, 16  ;;  %v5387_v21 = vld [vmem:[%s7073_s17 + $0x44] sm:$0x1] }
 0x30d   : >> { %v3728_v63 = vrot.slane %v3726_v4, 4  ;;  %v3731_v0 = vrot.slane %v3729_v5, 5  ;;  %v3822_v16 = vshrl.u32 %v5385_v9, 16  ;;  %v3825_v45 = vshll.u32 %v5385_v9, 16  ;;  %v5360_v30 = vld [vmem:[%s7073_s17 + $0x1c] sm:$0xf] }
 0x30e   : >> { %3537 = vrot.lane.b32.xlu1 %v3485_v61, %s5752_s22  ;;  %v3745_v57 = vshll.u32 %v5375_v60, 16  ;;  %v7161_v44 = vrot.slane %v3831_v56, 5  ;;  %v3742_v25 = vor.u32 %v3741_v62, %v7153_v51  ;;  %v3837_v26 = vrot.slane %v3835_v2, 4  ;;  %v5359_v34 = vld [vmem:[%s7073_s17 + $0x18] sm:$0xf] }
 0x30f   : >> { %3535 = vrot.lane.b32.xlu0 %v3482_v36, %s5752_s22  ;;  %v3732_v48 = vor.u32 %v3731_v0, %v3728_v63  ;;  %v3759_v29 = vshll.u32 %v5377_v20, 16  ;;  %v3824_v28 = vrot.slane %v3822_v16, 4  ;;  %v3827_v61 = vrot.slane %v3825_v45, 5  ;;  %v5389_v22 = vld [vmem:[%s7073_s17 + $0x4c] sm:$0xf] }
 0x310   : >> { %v3763_v32 = vshrl.u32 %v5377_v20, 16  ;;  %v3750_v35 = vshrl.u32 %v5376_v55, 16  ;;  %v3753_v36 = vshll.u32 %v5376_v55, 16  ;;  %v3747_v31 = vrot.slane %v3745_v57, 5  ;;  %v5388_v17 = vld [vmem:[%s7073_s17 + $0x48] sm:$0xf] }
 0x311   : >> { %v3841_v19 = vshll.u32 %v5387_v21, 16  ;;  %v3743_v23 = vrot.slane %v3742_v25, 4  ;;  %v3733_v38 = vrot.slane %v3732_v48, 4  ;;  %v3838_v39 = vor.u32 %v3837_v26, %v7161_v44  ;;  %v5378_v41 = vld [vmem:[%s7073_s17 + $0x20] sm:$0x1] }
 0x312   : >> { %3553 = vrot.lane.b32.xlu1 %v3513_v37, %s5752_s22  ;;  %v5368_v37 = vld [vmem:[%s7073_s17 + $0x4c] sm:$0xf]  ;;  %v3828_v24 = vor.u32 %v3827_v61, %v3824_v28  ;;  %v3765_v42 = vrot.slane %v3763_v32, 4  ;;  %v3859_v47 = vshrl.u32 %v5389_v22, 16  ;;  %v5367_v46 = vld [vmem:[%s7073_s17 + $0x48] sm:$0xf] }
 0x313   : >> { %3551 = vrot.lane.b32.xlu0 %v3510_v40, %s5752_s22  ;;  %v3761_v40 = vrot.slane %v3759_v29, 5  ;;  %v3755_v50 = vrot.slane %v3753_v36, 5  ;;  %v3846_v52 = vshrl.u32 %v5388_v17, 16  ;;  %v3748_v33 = vsel %vm6204_vm11, %v3743_v23, %v3747_v31  ;;  %v5390_v6 = vld [vmem:[%s7073_s17 + $0x50] sm:$0x1] }
 0x314   : >> { %v3843_v59 = vrot.slane %v3841_v19, 5  ;;  %v3769_v1 = vshll.u32 %v5378_v41, 16  ;;  %v3738_v4 = vsel %vm6204_vm11, %v3733_v38, %v7153_v51  ;;  %v3829_v9 = vrot.slane %v3828_v24, 4  ;;  %v3120_v63 = vld [vmem:[%s7073_s17 + $0x30] sm:$0xf] }
 0x315   : >> { %v3766_v5 = vor.u32 %v3765_v42, %v3761_v40  ;;  %v3848_v60 = vrot.slane %v3846_v52, 4  ;;  %3136 = vst.msk [vmem:[#allocation4 + $0x20] sm:$0xf] %vm226_vm2, %v3120_v63  ;;  %v3112_v0 = vld [vmem:[%s7073_s17] sm:$0xf]  ;;  %v3865_v45 = vshll.u32 %v5390_v6, 16 }
 0x316   : >> { %3541 = vrot.lane.b32.xlu1 %v3492_v43, %s5752_s22  ;;  %v3855_v43 = vshll.u32 %v5389_v22, 16  ;;  %v3771_v2 = vrot.slane %v3769_v1, 5  ;;  %3128 = vst.msk [vmem:[#allocation4] sm:$0xf] %vm226_vm2, %v3112_v0  ;;  %v3834_v20 = vsel %vm6204_vm11, %v3829_v9, %v7161_v44  ;;  %v5398_v55 = vld [vmem:[%s7073_s17 + $0x10] sm:$0xf] }
 0x317   : >> { %3539 = vrot.lane.b32.xlu0 %v3489_v49, %s5752_s22  ;;  %v3752_v49 = vrot.slane %v3750_v35, 4  ;;  %v3121_v25 = vld [vmem:[%s7073_s17 + $0x34] sm:$0xf]  ;;  %v3113_v48 = vld [vmem:[%s7073_s17 + $0x4] sm:$0xf]  ;;  %v3867_v26 = vrot.slane %v3865_v45, 5 }
 0x318   : >> { %3137 = vst.msk [vmem:[#allocation4 + $0x24] sm:$0xf] %vm226_vm2, %v3121_v25  ;;  %v4032_v29 = vrot.slane %v5398_v55, 5  ;;  %3129 = vst.msk [vmem:[#allocation4 + $0x4] sm:$0xf] %vm226_vm2, %v3113_v48 }
 0x319   : >> { %v3756_v56 = vor.u32 %v3755_v50, %v3752_v49  ;;  %v5399_v61 = vld [vmem:[%s7073_s17 + $0x14] sm:$0x1]  ;;  %v5410_v32 = vld [vmem:[%s7073_s17 + $0x40] sm:$0xf]  ;;  %v3115_v35 = vld [vmem:[%s7073_s17 + $0x10] sm:$0xf] }
 0x31a   : >> { %3557 = vrot.lane.b32.xlu1 %v3520_v53, %s5752_s22  ;;  %v3849_v53 = vshll.u32 %v5388_v17, 16  ;;  %3131 = vst.msk [vmem:[#allocation4 + $0xc] sm:$0xf] %vm226_vm2, %v3115_v35  ;;  %v3114_v36 = vld [vmem:[%s7073_s17 + $0xc] sm:$0xf]  ;;  %v4034_v31 = vrot.slane %v4032_v29, 4 }
 0x31b   : >> { %3555 = vrot.lane.b32.xlu0 %v3517_v54, %s5752_s22  ;;  %v3839_v54 = vrot.slane %v3838_v39, 4  ;;  %v4035_v19 = vrot.slane %v5399_v61, 5  ;;  %v4060_v17 = vrot.slane %v5410_v32, 5  ;;  %3130 = vst.msk [vmem:[#allocation4 + $0x8] sm:$0xf] %vm226_vm2, %v3114_v36 }
 0x31c   : >> { %v3851_v62 = vrot.slane %v3849_v53, 5  ;;  %v5411_v38 = vld [vmem:[%s7073_s17 + $0x44] sm:$0x1]  ;;  %v5401_v39 = vld [vmem:[%s7073_s17 + $0x1c] sm:$0xf] }
 0x31d   : >> { %v3844_v51 = vsel %vm6204_vm11, %v3839_v54, %v3843_v59  ;;  %v3123_v24 = vld [vmem:[%s7073_s17 + $0x40] sm:$0xf]  ;;  %v3122_v41 = vld [vmem:[%s7073_s17 + $0x3c] sm:$0xf]  ;;  %v4036_v42 = vsel %vm6237_vm14, %v4034_v31, %v4035_v19  ;;  %v5413_v53 = vld [vmem:[%s7073_s17 + $0x4c] sm:$0xf] }
 0x31e   : >> { %3638 = vrot.lane.b32.xlu1 %v5358_v7, %s5753_s23  ;;  %v3857_v7 = vrot.slane %v3855_v43, 5  ;;  %v3852_v57 = vor.u32 %v3851_v62, %v3848_v60  ;;  %3139 = vst.msk [vmem:[#allocation4 + $0x2c] sm:$0xf] %vm226_vm2, %v3123_v24  ;;  %v4062_v43 = vrot.slane %v4060_v17, 4  ;;  %3138 = vst.msk [vmem:[#allocation4 + $0x28] sm:$0xf] %vm226_vm2, %v3122_v41 }
 0x31f   : >> { %3636 = vrot.lane.b32.xlu0 %v5357_v8, %s5753_s23  ;;  %v3861_v8 = vrot.slane %v3859_v47, 4  ;;  %v4063_v47 = vrot.slane %v5411_v38, 5  ;;  %v5402_v52 = vld [vmem:[%s7073_s17 + $0x20] sm:$0x1]  ;;  %v5448_v0 = vld [vmem:[%s7073_s17 + $0x1c] sm:$0xf] }
 0x320   : >> { %v3853_v28 = vrot.slane %v3852_v57, 4  ;;  %v4042_v1 = vrot.slane %v5402_v52, 5  ;;  %v5432_v45 = vld [vmem:[%s7073_s17 + $0x1c] sm:$0xf]  ;;  %v5460_v55 = vld [vmem:[%s7073_s17 + $0x4c] sm:$0xf] }
 0x321   : >> { %v3862_v16 = vor.u32 %v3861_v8, %v3857_v7  ;;  %v4064_v54 = vsel %vm6237_vm14, %v4062_v43, %v4063_v47  ;;  %v5412_v8 = vld [vmem:[%s7073_s17 + $0x48] sm:$0xe]  ;;  %v5431_v48 = vld [vmem:[%s7073_s17 + $0x18] sm:$0xf]  ;;  %v5440_v61 = vld [vmem:[%s7073_s17 + $0x4c] sm:$0xf] }
 0x322   : >> { %3654 = vrot.lane.b32.xlu1 %v5366_v3, %s5753_s23  ;;  %v3767_v3 = vrot.slane %v3766_v5, 4  ;;  %v5426_v63 = vrot.slane %v5412_v8, 9  ;;  %v5459_v25 = vld [vmem:[%s7073_s17 + $0x48] sm:$0xf]  ;;  %v5463_v47 = vld [vmem:[%s7073_s17 + $0x58] sm:$0xf] }
 0x323   : >> { %3652 = vrot.lane.b32.xlu0 %v5365_v58, %s5753_s23  ;;  %v3757_v58 = vrot.slane %v3756_v56, 4  ;;  %v3863_v44 = vrot.slane %v3862_v16, 4  ;;  %v4286_v16 = vshll.u32 %v5448_v0, 16  ;;  %v4376_v35 = vshll.u32 %v5459_v25, 16  ;;  %v5439_v36 = vld [vmem:[%s7073_s17 + $0x48] sm:$0xf] }
 0x324   : >> { %v3772_v21 = vsel %vm6204_vm11, %v3767_v3, %v3771_v2  ;;  %v5447_v3 = vld [vmem:[%s7073_s17 + $0x18] sm:$0xf]  ;;  %v5434_v31 = vld [vmem:[%s7073_s17 + $0x28] sm:$0xf] }
 0x325   : >> { %v3868_v22 = vsel %vm6204_vm11, %v3863_v44, %v3867_v26  ;;  %v4280_v57 = vshll.u32 %v5447_v3, 16  ;;  %v5449_v44 = vld [vmem:[%s7073_s17 + $0x20] sm:$0x1]  ;;  %v4378_v41 = vrot.slane %v4376_v35, 5 }
 0x326   : >> { %3642 = vrot.lane.b32.xlu1 %v5360_v30, %s5753_s23  ;;  %v3762_v30 = vsel %vm6204_vm11, %v3757_v58, %v3761_v40  ;;  %v5409_v40 = vld [vmem:[%s7073_s17 + $0x3c] sm:$0xe]  ;;  %v4277_v58 = vshrl.u32 %v5447_v3, 16  ;;  %v4296_v19 = vshll.u32 %v5449_v44, 16 }
 0x327   : >> { %3640 = vrot.lane.b32.xlu0 %v5359_v34, %s5753_s23  ;;  %v5397_v34 = vld [vmem:[%s7073_s17 + $0xc] sm:$0xe]  ;;  %v5425_v50 = vrot.slane %v5409_v40, 9 }
 0x328   : >> { %v5421_v23 = vrot.slane %v5397_v34, 9  ;;  %v4279_v32 = vrot.slane %v4277_v58, 4  ;;  %v4282_v34 = vrot.slane %v4280_v57, 5  ;;  %v4298_v52 = vrot.slane %v4296_v19, 5 }
 0x329   : >> { %v4061_v5 = vsel %vm6237_vm14, %v5425_v50, %v4060_v17  ;;  %v5450_v17 = vld [vmem:[%s7073_s17 + $0x24] sm:$0xf] }
 0x32a   : >> { %3658 = vrot.lane.b32.xlu1 %v5368_v37, %s5753_s23  ;;  %v3858_v37 = vsel %vm6204_vm11, %v3853_v28, %v3857_v7  ;;  %v4033_v49 = vsel %vm6237_vm14, %v5421_v23, %v4032_v29  ;;  %v5414_v7 = vld [vmem:[%s7073_s17 + $0x50] sm:$0x1]  ;;  %v4382_v29 = vshll.u32 %v5460_v55, 16  ;;  %v4373_v28 = vshrl.u32 %v5459_v25, 16  ;;  %v5464_v25 = vld [vmem:[%s7073_s17 + $0x5c] sm:$0x1] }
 0x32b   : >> { %3656 = vrot.lane.b32.xlu0 %v5367_v46, %s5753_s23  ;;  %v4039_v46 = vrot.slane %v5401_v39, 5  ;;  %v4070_v60 = vrot.slane %v5414_v7, 5  ;;  %v5461_v23 = vld [vmem:[%s7073_s17 + $0x50] sm:$0x1]  ;;  %v4283_v24 = vor.u32 %v4282_v34, %v4279_v32  ;;  %v4304_v50 = vshll.u32 %v5450_v17, 16 }
 0x32c   : >> { %v7278_v38 = vrot.slane %v4382_v29, 5  ;;  %v4375_v40 = vrot.slane %v4373_v28, 4  ;;  %v4416_v28 = vshll.u32 %v5464_v25, 16 }
 0x32d   : >> { %v4041_v59 = vrot.slane %v4039_v46, 4  ;;  %v4284_v7 = vrot.slane %v4283_v24, 4 }
 0x32e   : >> { %3919 = vrot.lane.b32.xlu1 %v3748_v33, %s5754_s24  ;;  %v5400_v33 = vld [vmem:[%s7073_s17 + $0x18] sm:$0xe]  ;;  %v4379_v8 = vor.u32 %v4378_v41, %v4375_v40  ;;  %v3163_v41 = vld [vmem:[%s7073_s17 + $0x4c] sm:$0xf] }
 0x32f   : >> { %3917 = vrot.lane.b32.xlu0 %v3738_v4, %s5754_s24  ;;  %v4067_v4 = vrot.slane %v5413_v53, 5  ;;  %v5422_v6 = vrot.slane %v5400_v33, 9  ;;  %v4043_v9 = vsel %vm6237_vm14, %v4041_v59, %v4042_v1  ;;  %v4392_v53 = vshll.u32 %v5461_v23, 16  ;;  %v5462_v33 = vld [vmem:[%s7073_s17 + $0x54] sm:$0xf] }
 0x330   : >> { %v4418_v23 = vrot.slane %v4416_v28, 5 }
 0x331   : >> { %v4069_v56 = vrot.slane %v4067_v4, 4  ;;  %v4040_v62 = vsel %vm6237_vm14, %v5422_v6, %v4039_v46  ;;  %v5433_v46 = vld [vmem:[%s7073_s17 + $0x24] sm:$0xf]  ;;  %v5441_v6 = vld [vmem:[%s7073_s17 + $0x54] sm:$0xf]  ;;  %v4394_v3 = vrot.slane %v4392_v53, 5 }
 0x332   : >> { %3935 = vrot.lane.b32.xlu1 %v3844_v51, %s5754_s24  ;;  %v4068_v51 = vsel %vm6237_vm14, %v5426_v63, %v4067_v4  ;;  %v4406_v4 = vshll.u32 %v5463_v47, 16  ;;  %v4306_v63 = vrot.slane %v4304_v50, 5 }
 0x333   : >> { %3933 = vrot.lane.b32.xlu0 %v3834_v20, %s5754_s24  ;;  %v4071_v2 = vsel %vm6237_vm14, %v4069_v56, %v4070_v60  ;;  %v4290_v20 = vshrl.u32 %v5448_v0, 16  ;;  %v5452_v60 = vld [vmem:[%s7073_s17 + $0x2c] sm:$0x1]  ;;  %v4397_v0 = vshrl.u32 %v5462_v33, 16 }
 0x335   : >> { %v4292_v26 = vrot.slane %v4290_v20, 4 }
 0x336   : >> { %3923 = vrot.lane.b32.xlu1 %v3772_v21, %s5754_s24  ;;  %v7265_v21 = vrot.slane %v4286_v16, 5  ;;  %v7293_v16 = vrot.slane %v4406_v4, 5 }
 0x337   : >> { %3921 = vrot.lane.b32.xlu0 %v3762_v30, %s5754_s24  ;;  %v4386_v30 = vshrl.u32 %v5460_v55, 16  ;;  %v4320_v55 = vshll.u32 %v5452_v60, 16 }
 0x338   : >> { %v4289_v20 = vsel %vm6204_vm11, %v4284_v7, %v7265_v21 }
 0x339   : >> { %v4388_v39 = vrot.slane %v4386_v30, 4  ;;  %v4322_v34 = vrot.slane %v4320_v55, 5 }
 0x33a   : >> { %3939 = vrot.lane.b32.xlu1 %v3868_v22, %s5754_s24  ;;  %v5451_v22 = vld [vmem:[%s7073_s17 + $0x28] sm:$0xf] }
 0x33b   : >> { %3937 = vrot.lane.b32.xlu0 %v3858_v37, %s5754_s24  ;;  %v4293_v37 = vor.u32 %v4292_v26, %v7265_v21  ;;  %v4314_v43 = vshrl.u32 %v5451_v22, 16  ;;  %v4389_v1 = vor.u32 %v4388_v39, %v7278_v38  ;;  %v4399_v26 = vrot.slane %v4397_v0, 4  ;;  %v5473_v39 = vld [vmem:[%s7073_s17 + $0x20] sm:$0x1] }
 0x33c   : >> { %v4586_v53 = vrot.slane %v5473_v39, 5 }
 0x33d   : >> { %v4294_v59 = vrot.slane %v4293_v37, 4  ;;  %v4316_v56 = vrot.slane %v4314_v43, 4  ;;  %v4390_v58 = vrot.slane %v4389_v1, 4  ;;  %v3329_v1 = vshrl.u32 %v3163_v41, 16 }
 0x33e   : >> { %4088 = vrot.lane.b32.xlu1 %v4036_v42, %s5755_s25  ;;  %v4310_v42 = vshll.u32 %v5451_v22, 16 }
 0x33f   : >> { %4086 = vrot.lane.b32.xlu0 %v4033_v49, %s5755_s25  ;;  %v4301_v49 = vshrl.u32 %v5450_v17, 16  ;;  %v4395_v21 = vsel %vm6204_vm11, %v4390_v58, %v4394_v3  ;;  %v3150_v17 = vld [vmem:[%s7073_s17 + $0x18] sm:$0xf] }
 0x340   : >> { %v3223_v50 = vshll.u32 %v3150_v17, 16 }
 0x342   : >> { %4104 = vrot.lane.b32.xlu1 %v4064_v54, %s5755_s25  ;;  %v5442_v54 = vld [vmem:[%s7073_s17 + $0x58] sm:$0xf]  ;;  %v3225_v0 = vrot.slane %v3223_v50, 5 }
 0x343   : >> { %4102 = vrot.lane.b32.xlu0 %v4061_v5, %s5755_s25  ;;  %v4410_v5 = vshrl.u32 %v5463_v47, 16  ;;  %v7371_v50 = vld [vmem:[%s7073_s17 + $0x58] sm:$0xf] }
 0x346   : >> { %4092 = vrot.lane.b32.xlu1 %v4043_v9, %s5755_s25  ;;  %v4312_v9 = vrot.slane %v4310_v42, 5  ;;  %v3162_v42 = vld [vmem:[%s7073_s17 + $0x48] sm:$0xf] }
 0x347   : >> { %4090 = vrot.lane.b32.xlu0 %v4040_v62, %s5755_s25  ;;  %v4303_v62 = vrot.slane %v4301_v49, 4  ;;  %v3220_v49 = vshrl.u32 %v3150_v17, 16  ;;  %v3316_v4 = vshrl.u32 %v3162_v42, 16 }
 0x348   : >> { %v4317_v57 = vor.u32 %v4316_v56, %v4312_v9 }
 0x349   : >> { %v4307_v44 = vor.u32 %v4306_v63, %v4303_v62  ;;  %v3152_v62 = vld [vmem:[%s7073_s17 + $0x20] sm:$0x1]  ;;  %v3222_v63 = vrot.slane %v3220_v49, 4 }
 0x34a   : >> { %4108 = vrot.lane.b32.xlu1 %v4071_v2, %s5755_s25  ;;  %v4400_v2 = vshll.u32 %v5462_v33, 16  ;;  %v4318_v32 = vrot.slane %v4317_v57, 4  ;;  %v5471_v33 = vld [vmem:[%s7073_s17 + $0x18] sm:$0xe]  ;;  %v3239_v25 = vshll.u32 %v3152_v62, 16 }
 0x34b   : >> { %4106 = vrot.lane.b32.xlu0 %v4068_v51, %s5755_s25  ;;  %v4299_v51 = vsel %vm6204_vm11, %v4294_v59, %v4298_v52  ;;  %v3325_v59 = vshll.u32 %v3163_v41, 16  ;;  %v5495_v60 = vrot.slane %v5471_v33, 9  ;;  %v5488_v62 = vld [vmem:[%s7073_s17 + $0x5c] sm:$0x1] }
 0x34c   : >> { %v4402_v29 = vrot.slane %v4400_v2, 5  ;;  %v4323_v40 = vsel %vm6204_vm11, %v4318_v32, %v4322_v34  ;;  %v3117_v32 = vld [vmem:[%s7073_s17 + $0x1c] sm:$0xf] }
 0x34d   : >> { %v7335_v3 = vrot.slane %v3325_v59, 5  ;;  %3133 = vst.msk [vmem:[#allocation4 + $0x14] sm:$0xf] %vm226_vm2, %v3117_v32  ;;  %v5513_v32 = vcombine.low %v5934_v12, %v5939_v13 }
 0x34e   : >> { %4189 = vrot.lane.b32.xlu1 %v5432_v45, %s5756_s27  ;;  %v4412_v45 = vrot.slane %v4410_v5, 4  ;;  %v4403_v22 = vor.u32 %v4402_v29, %v4399_v26  ;;  %v3319_v5 = vshll.u32 %v3162_v42, 16  ;;  %v3226_v29 = vor.u32 %v3225_v0, %v3222_v63 }
 0x34f   : >> { %4187 = vrot.lane.b32.xlu0 %v5431_v48, %s5756_s27  ;;  %v4380_v48 = vrot.slane %v4379_v8, 4  ;;  %v4618_v63 = vrot.slane %v7371_v50, 5 }
 0x350   : >> { %v4413_v30 = vor.u32 %v4412_v45, %v7293_v16  ;;  %v4404_v47 = vrot.slane %v4403_v22, 4  ;;  %v3331_v45 = vrot.slane %v3329_v1, 4  ;;  %v3321_v58 = vrot.slane %v3319_v5, 5  ;;  %v3154_v22 = vld [vmem:[%s7073_s17 + $0x28] sm:$0xf] }
 0x351   : >> { %v4385_v35 = vsel %vm6204_vm11, %v4380_v48, %v7278_v38  ;;  %v3164_v48 = vld [vmem:[%s7073_s17 + $0x50] sm:$0x1] }
 0x352   : >> { %4205 = vrot.lane.b32.xlu1 %v5440_v61, %s5756_s27  ;;  %v5472_v61 = vld [vmem:[%s7073_s17 + $0x1c] sm:$0xf]  ;;  %v4414_v37 = vrot.slane %v4413_v30, 4  ;;  %v4409_v56 = vsel %vm6204_vm11, %v4404_v47, %v7293_v16  ;;  %v3332_v30 = vor.u32 %v3331_v45, %v7335_v3  ;;  %v3335_v28 = vshll.u32 %v3164_v48, 16 }
 0x353   : >> { %4203 = vrot.lane.b32.xlu0 %v5439_v36, %s5756_s27  ;;  %v4308_v36 = vrot.slane %v4307_v44, 4  ;;  %v4583_v19 = vrot.slane %v5472_v61, 5  ;;  %v3253_v47 = vshll.u32 %v3154_v22, 16 }
 0x354   : >> { %v3333_v41 = vrot.slane %v3332_v30, 4  ;;  %v3337_v42 = vrot.slane %v3335_v28, 5 }
 0x355   : >> { %v4313_v43 = vsel %vm6204_vm11, %v4308_v36, %v4312_v9  ;;  %v4585_v52 = vrot.slane %v4583_v19, 4  ;;  %v4584_v44 = vsel %vm6237_vm14, %v5495_v60, %v4583_v19  ;;  %v3241_v36 = vrot.slane %v3239_v25, 5 }
 0x356   : >> { %4193 = vrot.lane.b32.xlu1 %v5434_v31, %s5756_s27  ;;  %v3151_v31 = vld [vmem:[%s7073_s17 + $0x1c] sm:$0xf]  ;;  %v7391_v0 = vrot.slane %v3253_v47, 5 }
 0x357   : >> { %4191 = vrot.lane.b32.xlu0 %v5433_v46, %s5756_s27  ;;  %v3229_v24 = vshll.u32 %v3151_v31, 16  ;;  %v3233_v38 = vshrl.u32 %v3151_v31, 16  ;;  %v5484_v46 = vld [vmem:[%s7073_s17 + $0x4c] sm:$0xf]  ;;  %v4587_v16 = vsel %vm6237_vm14, %v4585_v52, %v4586_v53  ;;  %v3116_v31 = vld [vmem:[%s7073_s17 + $0x18] sm:$0xf] }
 0x358   : >> { %v4611_v7 = vrot.slane %v5484_v46, 5  ;;  %3132 = vst.msk [vmem:[#allocation4 + $0x10] sm:$0xf] %vm226_vm2, %v3116_v31  ;;  %v3125_v46 = vld [vmem:[%s7073_s17 + $0x4c] sm:$0xf]  ;;  %v3257_v52 = vshrl.u32 %v3154_v22, 16 }
 0x359   : >> { %v7327_v8 = vrot.slane %v3229_v24, 5  ;;  %v3235_v9 = vrot.slane %v3233_v38, 4  ;;  %v5474_v24 = vld [vmem:[%s7073_s17 + $0x24] sm:$0xe]  ;;  %3141 = vst.msk [vmem:[#allocation4 + $0x34] sm:$0xf] %vm226_vm2, %v3125_v46 }
 0x35a   : >> { %4209 = vrot.lane.b32.xlu1 %v5442_v54, %s5756_s27  ;;  %v5485_v54 = vld [vmem:[%s7073_s17 + $0x50] sm:$0x1]  ;;  %v4613_v57 = vrot.slane %v4611_v7, 4  ;;  %v3153_v38 = vld [vmem:[%s7073_s17 + $0x24] sm:$0xf] }
 0x35b   : >> { %4207 = vrot.lane.b32.xlu0 %v5441_v6, %s5756_s27  ;;  %v4419_v6 = vsel %vm6204_vm11, %v4414_v37, %v4418_v23  ;;  %v4614_v2 = vrot.slane %v5485_v54, 5  ;;  %v3236_v55 = vor.u32 %v3235_v9, %v7327_v8  ;;  %v3227_v37 = vrot.slane %v3226_v29, 4  ;;  %v5476_v23 = vld [vmem:[%s7073_s17 + $0x2c] sm:$0x1]  ;;  %v3124_v53 = vld [vmem:[%s7073_s17 + $0x48] sm:$0xf] }
 0x35c   : >> { %v3244_v59 = vshrl.u32 %v3153_v38, 16  ;;  %v3247_v1 = vshll.u32 %v3153_v38, 16  ;;  %3140 = vst.msk [vmem:[#allocation4 + $0x30] sm:$0xf] %vm226_vm2, %v3124_v53  ;;  %v5496_v9 = vrot.slane %v5474_v24, 9  ;;  %v4621_v29 = vrot.slane %v5488_v62, 5 }
 0x35d   : >> { %v4615_v34 = vsel %vm6237_vm14, %v4613_v57, %v4614_v2  ;;  %v3232_v54 = vsel %vm6204_vm11, %v3227_v37, %v7327_v8  ;;  %v3338_v8 = vsel %vm6204_vm11, %v3333_v41, %v3337_v42  ;;  %v5486_v2 = vld [vmem:[%s7073_s17 + $0x54] sm:$0xe]  ;;  %v3155_v57 = vld [vmem:[%s7073_s17 + $0x2c] sm:$0x1]  ;;  %v5512_v24 = vcombine.low %v5924_v10, %v5929_v11  ;;  %v3127_v41 = vld [vmem:[%s7073_s17 + $0x58] sm:$0xf] }
 0x35e   : >> { %4470 = vrot.lane.b32.xlu1 %v4299_v51, %s5757_s28  ;;  %v5483_v51 = vld [vmem:[%s7073_s17 + $0x48] sm:$0xe]  ;;  %v3249_v25 = vrot.slane %v3247_v1, 5  ;;  %v3263_v22 = vshll.u32 %v3155_v57, 16  ;;  %3143 = vst.msk [vmem:[#allocation4 + $0x3c] sm:$0xf] %vm226_vm2, %v3127_v41 }
 0x35f   : >> { %4468 = vrot.lane.b32.xlu0 %v4289_v20, %s5757_s28  ;;  %v3318_v20 = vrot.slane %v3316_v4, 4  ;;  %v5499_v26 = vrot.slane %v5483_v51, 9  ;;  %v3166_v4 = vld [vmem:[%s7073_s17 + $0x58] sm:$0xf]  ;;  %v3259_v51 = vrot.slane %v3257_v52, 4 }
 0x360   : >> { %v3349_v45 = vshll.u32 %v3166_v4, 16  ;;  %v3265_v46 = vrot.slane %v3263_v22, 5  ;;  %v3435_v1 = vld [vmem:[%s7073_s17 + $0x1c] sm:$0xf]  ;;  %v3447_v62 = vld [vmem:[%s7073_s17 + $0x4c] sm:$0xf] }
 0x361   : >> { %v3322_v61 = vor.u32 %v3321_v58, %v3318_v20  ;;  %v4612_v17 = vsel %vm6237_vm14, %v5499_v26, %v4611_v7  ;;  %v4593_v7 = vrot.slane %v5476_v23, 5  ;;  %v3353_v20 = vshrl.u32 %v3166_v4, 16  ;;  %v3167_v23 = vld [vmem:[%s7073_s17 + $0x5c] sm:$0x1] }
 0x362   : >> { %4486 = vrot.lane.b32.xlu1 %v4395_v21, %s5757_s28  ;;  %v7347_v21 = vld [vmem:[%s7073_s17 + $0x28] sm:$0xf]  ;;  %v5514_v58 = vcombine.low %v5944_v14, %v5944_v14  ;;  %v7416_v31 = vrot.slane %v3349_v45, 5  ;;  %v3359_v52 = vshll.u32 %v3167_v23, 16 }
 0x363   : >> { %4484 = vrot.lane.b32.xlu0 %v4385_v35, %s5757_s28  ;;  %v3237_v35 = vrot.slane %v3236_v55, 4  ;;  %v3246_v55 = vrot.slane %v3244_v59, 4 }
 0x364   : >> { %5659 = vmatprep.subr.msk.bf16.mxu0 %vm2719_vm0, %v5514_v58  ;;  %v4806_v30 = vsel %vm2719_vm0, %v5514_v58, 0  ;;  %5660 = vmatprep.subr.msk.bf16.mxu1 %vm2719_vm0, %v5514_v58 }
 0x365   : >> { %v3242_v49 = vsel %vm6204_vm11, %v3237_v35, %v3241_v36  ;;  %5624 = vmatpush3.bf16.msra.mxu0 %v4806_v30  ;;  %v3118_v35 = vld [vmem:[%s7073_s17 + $0x24] sm:$0xf]  ;;  %v3260_v36 = vor.u32 %v3259_v51, %v7391_v0  ;;  %5654 = vmatpush3.bf16.msra.mxu1 %v4806_v30  ;;  %v3250_v37 = vor.u32 %v3249_v25, %v3246_v55  ;;  %v3448_v55 = vld [vmem:[%s7073_s17 + $0x50] sm:$0x1]  ;;  %v3438_v25 = vld [vmem:[%s7073_s17 + $0x28] sm:$0xf] }
 0x366   : >> { %4474 = vrot.lane.b32.xlu1 %v4323_v40, %s5757_s28  ;;  %v4590_v40 = vrot.slane %v7347_v21, 5  ;;  %v5500_v21 = vrot.slane %v5486_v2, 9  ;;  %3134 = vst.msk [vmem:[#allocation4 + $0x18] sm:$0xf] %vm226_vm2, %v3118_v35  ;;  %5625 = vmatprep.subr.bf16.mxu0 %v5513_v32  ;;  %v3434_v2 = vld [vmem:[%s7073_s17 + $0x18] sm:$0xe] }
 0x367   : >> { %4472 = vrot.lane.b32.xlu0 %v4313_v43, %s5757_s28  ;;  %v3323_v43 = vrot.slane %v3322_v61, 4  ;;  %v4620_v61 = vrot.slane %v4618_v63, 4  ;;  %5652 = vmatprep.subr.bf16.mxu1 %v5513_v32  ;;  %v3261_v47 = vrot.slane %v3260_v36, 4  ;;  %v5349_v57 = vrot.slane %v3434_v2, 9  ;;  %v3437_v36 = vld [vmem:[%s7073_s17 + $0x24] sm:$0xe] }
 0x368   : >> { %v4591_v28 = vsel %vm6237_vm14, %v5496_v9, %v4590_v40  ;;  %v3502_v30 = vrot.slane %v3438_v25, 5 }
 0x369   : >> { %v3328_v60 = vsel %vm6204_vm11, %v3323_v43, %v7335_v3  ;;  %v4622_v42 = vsel %vm6237_vm14, %v4620_v61, %v4621_v29  ;;  %5626 = vmatpush3.bf16.msra.mxu0 %v5513_v32  ;;  %v3126_v43 = vld [vmem:[%s7073_s17 + $0x54] sm:$0xf]  ;;  %5655 = vmatpush3.bf16.msra.mxu1 %v5513_v32  ;;  %v3266_v50 = vsel %vm6204_vm11, %v3261_v47, %v3265_v46  ;;  %v3526_v29 = vrot.slane %v3448_v55, 5  ;;  %v3439_v32 = vld [vmem:[%s7073_s17 + $0x2c] sm:$0x1] }
 0x36a   : >> { %4490 = vrot.lane.b32.xlu1 %v4419_v6, %s5757_s28  ;;  %v4592_v6 = vrot.slane %v4590_v40, 4  ;;  %5627 = vmatprep.subr.bf16.mxu0 %v5512_v24  ;;  %3142 = vst.msk [vmem:[#allocation4 + $0x38] sm:$0xf] %vm226_vm2, %v3126_v43 }
 0x36b   : >> { %4488 = vrot.lane.b32.xlu0 %v4409_v56, %s5757_s28  ;;  %v3165_v56 = vld [vmem:[%s7073_s17 + $0x54] sm:$0xf]  ;;  %5653 = vmatprep.subr.bf16.mxu1 %v5512_v24 }
 0x36c   : >> { %v3340_v48 = vshrl.u32 %v3165_v56, 16  ;;  %v3343_v3 = vshll.u32 %v3165_v56, 16  ;;  %v4594_v26 = vsel %vm6237_vm14, %v4592_v6, %v4593_v7  ;;  %v3361_v6 = vrot.slane %v3359_v52, 5 }
 0x36d   : >> { %5628 = vmatpush3.bf16.msra.mxu0 %v5512_v24  ;;  %v3495_v7 = vrot.slane %v3435_v1, 5  ;;  %5656 = vmatpush3.bf16.msra.mxu1 %v5512_v24 }
 0x36e   : >> { %4639 = vrot.lane.b32.xlu1 %v4587_v16, %s5758_s19  ;;  %v3345_v40 = vrot.slane %v3343_v3, 5  ;;  %v3446_v3 = vld [vmem:[%s7073_s17 + $0x48] sm:$0xe] }
 0x36f   : >> { %4637 = vrot.lane.b32.xlu0 %v4584_v44, %s5758_s19  ;;  %v3497_v51 = vrot.slane %v3495_v7, 4  ;;  %v3496_v61 = vsel %vm6237_vm14, %v5349_v57, %v3495_v7  ;;  %v5370_v57 = vld [vmem:[%s7073_s17 + $0x58] sm:$0xf] }
 0x370   : >> { %v3380_v19 = vpop.permute.xlu1 %3379 }
 0x371   : >> { %3420 = vst.msk [vmem:[#allocation4 + $0x20] sm:$0xf] %vm1326_vm15, %v3380_v19  ;;  %v3364_v39 = vpop.permute.xlu0 %3363  ;;  %v3355_v19 = vrot.slane %v3353_v20, 4  ;;  %v3523_v20 = vrot.slane %v3447_v62, 5  ;;  %v5391_v62 = vld [vmem:[%s7073_s17 + $0x54] sm:$0xf] }
 0x372   : >> { %3412 = vst.msk [vmem:[#allocation4] sm:$0xf] %vm1326_vm15, %v3364_v39  ;;  %4655 = vrot.lane.b32.xlu1 %v4615_v34, %s5758_s19  ;;  %v3119_v34 = vld [vmem:[%s7073_s17 + $0x28] sm:$0xf]  ;;  %v3342_v39 = vrot.slane %v3340_v48, 4  ;;  %v3870_v55 = vshrl.u32 %v5391_v62, 16 }
 0x373   : >> { %4653 = vrot.lane.b32.xlu0 %v4612_v17, %s5758_s19  ;;  %3135 = vst.msk [vmem:[#allocation4 + $0x1c] sm:$0xf] %vm226_vm2, %v3119_v34  ;;  %v3450_v34 = vld [vmem:[%s7073_s17 + $0x58] sm:$0xf]  ;;  %v3873_v25 = vshll.u32 %v5391_v62, 16 }
 0x374   : >> { %v3382_v33 = vpop.permute.xlu1 %3381  ;;  %v3346_v59 = vor.u32 %v3345_v40, %v3342_v39  ;;  %v5350_v39 = vrot.slane %v3437_v36, 9  ;;  %v3451_v40 = vld [vmem:[%s7073_s17 + $0x5c] sm:$0x1]  ;;  %v5364_v36 = vld [vmem:[%s7073_s17 + $0x34] sm:$0xf] }
 0x375   : >> { %3421 = vst.msk [vmem:[#allocation4 + $0x24] sm:$0xf] %vm1326_vm15, %v3382_v33  ;;  %v3366_v5 = vpop.permute.xlu0 %3365  ;;  %v4619_v33 = vsel %vm6237_vm14, %v5500_v21, %v4618_v63  ;;  %v5353_v21 = vrot.slane %v3446_v3, 9  ;;  %v3533_v43 = vrot.slane %v3451_v40, 5  ;;  %v5395_v40 = vld [vmem:[%s7073_s17 + $0x64] sm:$0xf] }
 0x376   : >> { %3413 = vst.msk [vmem:[#allocation4 + $0x4] sm:$0xf] %vm1326_vm15, %v3366_v5  ;;  %3373 = vrot.lane.b32.xlu1 %v3242_v49, %s5751_s21  ;;  %v3356_v49 = vor.u32 %v3355_v19, %v7416_v31  ;;  %v3505_v19 = vrot.slane %v3439_v32, 5  ;;  %v3503_v46 = vsel %vm6237_vm14, %v5350_v39, %v3502_v30  ;;  %v5393_v32 = vld [vmem:[%s7073_s17 + $0x5c] sm:$0x1] }
 0x377   : >> { %3371 = vrot.lane.b32.xlu0 %v3232_v54, %s5751_s21  ;;  %v3251_v54 = vrot.slane %v3250_v37, 4  ;;  %v3524_v23 = vsel %vm6237_vm14, %v5353_v21, %v3523_v20 }
 0x378   : >> { %v3370_v16 = vpop.permute.xlu1 %3369  ;;  %v3357_v5 = vrot.slane %v3356_v49, 4 }
 0x379   : >> { %3415 = vst.msk [vmem:[#allocation4 + $0xc] sm:$0xf] %vm1326_vm15, %v3370_v16  ;;  %v3368_v44 = vpop.permute.xlu0 %3367  ;;  %v3256_v56 = vsel %vm6204_vm11, %v3251_v54, %v7391_v0  ;;  %v5379_v54 = vld [vmem:[%s7073_s17 + $0x24] sm:$0xf] }
 0x37a   : >> { %3414 = vst.msk [vmem:[#allocation4 + $0x8] sm:$0xf] %vm1326_vm15, %v3368_v44  ;;  %3389 = vrot.lane.b32.xlu1 %v3338_v8, %s5751_s21  ;;  %v3347_v8 = vrot.slane %v3346_v59, 4  ;;  %v3362_v0 = vsel %vm6204_vm11, %v3357_v5, %v3361_v6  ;;  %v3774_v6 = vshrl.u32 %v5379_v54, 16  ;;  %v3777_v7 = vshll.u32 %v5379_v54, 16 }
 0x37b   : >> { %3387 = vrot.lane.b32.xlu0 %v3328_v60, %s5751_s21  ;;  %v3436_v60 = vld [vmem:[%s7073_s17 + $0x20] sm:$0x1] }
 0x37c   : >> { %v3386_v17 = vpop.permute.xlu1 %3385  ;;  %v3498_v45 = vrot.slane %v3436_v60, 5  ;;  %v3352_v16 = vsel %vm6204_vm11, %v3347_v8, %v7416_v31  ;;  %v3504_v31 = vrot.slane %v3502_v30, 4  ;;  %v5361_v60 = vld [vmem:[%s7073_s17 + $0x24] sm:$0xf] }
 0x37d   : >> { %3423 = vst.msk [vmem:[#allocation4 + $0x2c] sm:$0xf] %vm1326_vm15, %v3386_v17  ;;  %v3384_v38 = vpop.permute.xlu0 %3383  ;;  %v3530_v17 = vrot.slane %v3450_v34, 5 }
 0x37e   : >> { %3422 = vst.msk [vmem:[#allocation4 + $0x28] sm:$0xf] %vm1326_vm15, %v3384_v38  ;;  %4643 = vrot.lane.b32.xlu1 %v4594_v26, %s5758_s19  ;;  %v3499_v44 = vsel %vm6237_vm14, %v3497_v51, %v3498_v45  ;;  %v3525_v26 = vrot.slane %v3523_v20, 4  ;;  %v3449_v38 = vld [vmem:[%s7073_s17 + $0x54] sm:$0xe]  ;;  %v3506_v41 = vsel %vm6237_vm14, %v3504_v31, %v3505_v19  ;;  %v3875_v31 = vrot.slane %v3873_v25, 5 }
 0x37f   : >> { %4641 = vrot.lane.b32.xlu0 %v4591_v28, %s5758_s19  ;;  %v5354_v49 = vrot.slane %v3449_v38, 9  ;;  %v5381_v51 = vld [vmem:[%s7073_s17 + $0x2c] sm:$0x1] }
 0x380   : >> { %v3538_v53 = vpop.permute.xlu1 %3537  ;;  %v3527_v22 = vsel %vm6237_vm14, %v3525_v26, %v3526_v29  ;;  %v3793_v29 = vshll.u32 %v5381_v51, 16 }
 0x381   : >> { %3585 = vst.msk [vmem:[#allocation4 + $0x4] sm:$0xf] %vm1498_vm1, %v3538_v53  ;;  %v3536_v4 = vpop.permute.xlu0 %3535  ;;  %v3531_v1 = vsel %vm6237_vm14, %v5354_v49, %v3530_v17 }
 0x382   : >> { %3584 = vst.msk [vmem:[#allocation4] sm:$0xf] %vm1498_vm1, %v3536_v4  ;;  %4659 = vrot.lane.b32.xlu1 %v4622_v42, %s5758_s19  ;;  %v3532_v42 = vrot.slane %v3530_v17, 4  ;;  %v3795_v38 = vrot.slane %v3793_v29, 5 }
 0x383   : >> { %4657 = vrot.lane.b32.xlu0 %v4619_v33, %s5758_s19  ;;  %v5380_v33 = vld [vmem:[%s7073_s17 + $0x28] sm:$0xf] }
 0x384   : >> { %v3554_v9 = vpop.permute.xlu1 %3553  ;;  %v3534_v53 = vsel %vm6237_vm14, %v3532_v42, %v3533_v43  ;;  %v3787_v5 = vshrl.u32 %v5380_v33, 16  ;;  %v5394_v42 = vld [vmem:[%s7073_s17 + $0x60] sm:$0xf]  ;;  %v5372_v43 = vld [vmem:[%s7073_s17 + $0x64] sm:$0xf] }
 0x385   : >> { %3593 = vst.msk [vmem:[#allocation4 + $0x24] sm:$0xf] %vm1498_vm1, %v3554_v9  ;;  %v3552_v63 = vpop.permute.xlu0 %3551  ;;  %v5392_v9 = vld [vmem:[%s7073_s17 + $0x58] sm:$0xf] }
 0x386   : >> { %3592 = vst.msk [vmem:[#allocation4 + $0x20] sm:$0xf] %vm1498_vm1, %v3552_v63  ;;  %3377 = vrot.lane.b32.xlu1 %v3266_v50, %s5751_s21  ;;  %v3783_v50 = vshll.u32 %v5380_v33, 16  ;;  %v3879_v2 = vshll.u32 %v5392_v9, 16  ;;  %v3789_v20 = vrot.slane %v3787_v5, 4 }
 0x387   : >> { %3375 = vrot.lane.b32.xlu0 %v3256_v56, %s5751_s21  ;;  %v5362_v56 = vld [vmem:[%s7073_s17 + $0x28] sm:$0xf]  ;;  %v5384_v33 = vld [vmem:[%s7073_s17 + $0x38] sm:$0x1] }
 0x388   : >> { %v3542_v58 = vpop.permute.xlu1 %3541  ;;  %v7514_v45 = vrot.slane %v3783_v50, 5  ;;  %v7521_v30 = vrot.slane %v3879_v2, 5  ;;  %v5371_v50 = vld [vmem:[%s7073_s17 + $0x60] sm:$0xf] }
 0x389   : >> { %3587 = vst.msk [vmem:[#allocation4 + $0xc] sm:$0xf] %vm1498_vm1, %v3542_v58  ;;  %v3540_v48 = vpop.permute.xlu0 %3539  ;;  %v3776_v58 = vrot.slane %v3774_v6, 4 }
 0x38a   : >> { %3586 = vst.msk [vmem:[#allocation4 + $0x8] sm:$0xf] %vm1498_vm1, %v3540_v48  ;;  %3393 = vrot.lane.b32.xlu1 %v3362_v0, %s5751_s21  ;;  %v3883_v0 = vshrl.u32 %v5392_v9, 16  ;;  %v5383_v48 = vld [vmem:[%s7073_s17 + $0x34] sm:$0xf]  ;;  %v3897_v9 = vshll.u32 %v5394_v42, 16 }
 0x38b   : >> { %3391 = vrot.lane.b32.xlu0 %v3352_v16, %s5751_s21  ;;  %v3779_v16 = vrot.slane %v3777_v7, 5  ;;  %v3811_v19 = vshrl.u32 %v5383_v48, 16  ;;  %v3894_v7 = vshrl.u32 %v5394_v42, 16 }
 0x38c   : >> { %v3558_v28 = vpop.permute.xlu1 %3557  ;;  %v3885_v34 = vrot.slane %v3883_v0, 4 }
 0x38d   : >> { %3595 = vst.msk [vmem:[#allocation4 + $0x2c] sm:$0xf] %vm1498_vm1, %v3558_v28  ;;  %v3556_v35 = vpop.permute.xlu0 %3555  ;;  %v5382_v28 = vld [vmem:[%s7073_s17 + $0x30] sm:$0xf]  ;;  %v3780_v21 = vor.u32 %v3779_v16, %v3776_v58  ;;  %v3813_v54 = vrot.slane %v3811_v19, 4  ;;  %v3896_v25 = vrot.slane %v3894_v7, 4 }
 0x38e   : >> { %3594 = vst.msk [vmem:[#allocation4 + $0x28] sm:$0xf] %vm1498_vm1, %v3556_v35  ;;  %3545 = vrot.lane.b32.xlu1 %v3499_v44, %s5752_s22  ;;  %v5369_v44 = vld [vmem:[%s7073_s17 + $0x54] sm:$0xf]  ;;  %v3807_v35 = vshll.u32 %v5383_v48, 16  ;;  %v3801_v39 = vshll.u32 %v5382_v28, 16  ;;  %v3886_v49 = vor.u32 %v3885_v34, %v7521_v30 }
 0x38f   : >> { %3543 = vrot.lane.b32.xlu0 %v3496_v61, %s5752_s22  ;;  %v3790_v61 = vor.u32 %v3789_v20, %v7514_v45  ;;  %v3899_v48 = vrot.slane %v3897_v9, 5 }
 0x390   : >> { %v3639_v37 = vpop.permute.xlu1 %3638  ;;  %v3803_v6 = vrot.slane %v3801_v39, 5  ;;  %v5405_v39 = vld [vmem:[%s7073_s17 + $0x2c] sm:$0x1] }
 0x391   : >> { %3686 = vst.msk [vmem:[#allocation4 + $0x4] sm:$0xf] %vm1599_vm4, %v3639_v37  ;;  %v3637_v24 = vpop.permute.xlu0 %3636  ;;  %v5363_v37 = vld [vmem:[%s7073_s17 + $0x30] sm:$0xf]  ;;  %v3900_v34 = vor.u32 %v3899_v48, %v3896_v25  ;;  %v5418_v25 = vld [vmem:[%s7073_s17 + $0x60] sm:$0xe] }
 0x392   : >> { %3685 = vst.msk [vmem:[#allocation4] sm:$0xf] %vm1599_vm4, %v3637_v24  ;;  %3561 = vrot.lane.b32.xlu1 %v3527_v22, %s5752_s22  ;;  %v3872_v22 = vrot.slane %v3870_v55, 4  ;;  %v5396_v55 = vld [vmem:[%s7073_s17 + $0x68] sm:$0x1] }
 0x393   : >> { %3559 = vrot.lane.b32.xlu0 %v3524_v23, %s5752_s22  ;;  %v3798_v23 = vshrl.u32 %v5382_v28, 16  ;;  %v3913_v28 = vshll.u32 %v5396_v55, 16 }
 0x394   : >> { %v3655_v47 = vpop.permute.xlu1 %3654 }
 0x395   : >> { %3694 = vst.msk [vmem:[#allocation4 + $0x24] sm:$0xf] %vm1599_vm4, %v3655_v47  ;;  %v3653_v52 = vpop.permute.xlu0 %3652  ;;  %v3791_v47 = vrot.slane %v3790_v61, 4  ;;  %v3800_v5 = vrot.slane %v3798_v23, 4  ;;  %v3901_v23 = vrot.slane %v3900_v34, 4 }
 0x396   : >> { %3693 = vst.msk [vmem:[#allocation4 + $0x20] sm:$0xf] %vm1599_vm4, %v3653_v52  ;;  %3549 = vrot.lane.b32.xlu1 %v3506_v41, %s5752_s22  ;;  %v3889_v41 = vshll.u32 %v5393_v32, 16  ;;  %v7538_v52 = vrot.slane %v3807_v35, 5  ;;  %v5404_v35 = vld [vmem:[%s7073_s17 + $0x28] sm:$0xf] }
 0x397   : >> { %3547 = vrot.lane.b32.xlu0 %v3503_v46, %s5752_s22  ;;  %v3781_v46 = vrot.slane %v3780_v21, 4  ;;  %v4046_v19 = vrot.slane %v5404_v35, 5 }
 0x398   : >> { %v3643_v59 = vpop.permute.xlu1 %3642  ;;  %v3891_v62 = vrot.slane %v3889_v41, 5  ;;  %v3814_v0 = vor.u32 %v3813_v54, %v7538_v52 }
 0x399   : >> { %3688 = vst.msk [vmem:[#allocation4 + $0xc] sm:$0xf] %vm1599_vm4, %v3643_v59  ;;  %v3641_v4 = vpop.permute.xlu0 %3640  ;;  %v3903_v59 = vshll.u32 %v5395_v40, 16  ;;  %v3786_v2 = vsel %vm6204_vm11, %v3781_v46, %v7514_v45  ;;  %v4048_v42 = vrot.slane %v4046_v19, 4 }
 0x39a   : >> { %3687 = vst.msk [vmem:[#allocation4 + $0x8] sm:$0xf] %vm1599_vm4, %v3641_v4  ;;  %3565 = vrot.lane.b32.xlu1 %v3534_v53, %s5752_s22  ;;  %v3876_v53 = vor.u32 %v3875_v31, %v3872_v22 }
 0x39b   : >> { %3563 = vrot.lane.b32.xlu0 %v3531_v1, %s5752_s22  ;;  %v3907_v1 = vshrl.u32 %v5395_v40, 16  ;;  %v3905_v51 = vrot.slane %v3903_v59, 5  ;;  %v5416_v40 = vld [vmem:[%s7073_s17 + $0x58] sm:$0xf]  ;;  %v5415_v59 = vld [vmem:[%s7073_s17 + $0x54] sm:$0xe] }
 0x39c   : >> { %v3659_v8 = vpop.permute.xlu1 %3658  ;;  %v3877_v16 = vrot.slane %v3876_v53, 4  ;;  %v5417_v53 = vld [vmem:[%s7073_s17 + $0x5c] sm:$0x1]  ;;  %v5427_v9 = vrot.slane %v5415_v59, 9 }
 0x39d   : >> { %3696 = vst.msk [vmem:[#allocation4 + $0x2c] sm:$0xf] %vm1599_vm4, %v3659_v8  ;;  %v3657_v63 = vpop.permute.xlu0 %3656  ;;  %v3796_v8 = vsel %vm6204_vm11, %v3791_v47, %v3795_v38  ;;  %v3909_v20 = vrot.slane %v3907_v1, 4  ;;  %v5403_v38 = vld [vmem:[%s7073_s17 + $0x24] sm:$0xe]  ;;  %v4074_v47 = vrot.slane %v5416_v40, 5 }
 0x39e   : >> { %3695 = vst.msk [vmem:[#allocation4 + $0x28] sm:$0xf] %vm1599_vm4, %v3657_v63  ;;  %3646 = vrot.lane.b32.xlu1 %v5362_v56, %s5753_s23  ;;  %v3817_v63 = vshll.u32 %v5384_v33, 16  ;;  %v3882_v21 = vsel %vm6204_vm11, %v3877_v16, %v7521_v30  ;;  %v3915_v30 = vrot.slane %v3913_v28, 5  ;;  %v5407_v33 = vld [vmem:[%s7073_s17 + $0x34] sm:$0xf] }
 0x39f   : >> { %3644 = vrot.lane.b32.xlu0 %v5361_v60, %s5753_s23  ;;  %v3887_v60 = vrot.slane %v3886_v49, 4  ;;  %v3910_v29 = vor.u32 %v3909_v20, %v3905_v51  ;;  %v3906_v49 = vsel %vm6204_vm11, %v3901_v23, %v3905_v51  ;;  %v5465_v40 = vld [vmem:[%s7073_s17 + $0x60] sm:$0xf] }
 0x3a0   : >> { %v3920_v3 = vpop.permute.xlu1 %3919 }
 0x3a1   : >> { %3967 = vst.msk [vmem:[#allocation4 + $0x4] sm:$0xf] %vm1880_vm5, %v3920_v3  ;;  %v3918_v26 = vpop.permute.xlu0 %3917  ;;  %v3892_v45 = vsel %vm6204_vm11, %v3887_v60, %v3891_v62  ;;  %v3911_v31 = vrot.slane %v3910_v29, 4  ;;  %v5406_v62 = vld [vmem:[%s7073_s17 + $0x30] sm:$0xe]  ;;  %v5428_v29 = vrot.slane %v5418_v25, 9 }
 0x3a2   : >> { %3966 = vst.msk [vmem:[#allocation4] sm:$0xf] %vm1880_vm5, %v3918_v26  ;;  %3662 = vrot.lane.b32.xlu1 %v5370_v57, %s5753_s23  ;;  %v3804_v57 = vor.u32 %v3803_v6, %v3800_v5  ;;  %v3819_v26 = vrot.slane %v3817_v63, 5  ;;  %v4053_v5 = vrot.slane %v5407_v33, 5  ;;  %v5424_v16 = vrot.slane %v5406_v62, 9 }
 0x3a3   : >> { %3660 = vrot.lane.b32.xlu0 %v5369_v44, %s5753_s23  ;;  %v3815_v44 = vrot.slane %v3814_v0, 4  ;;  %v3916_v41 = vsel %vm6204_vm11, %v3911_v31, %v3915_v30  ;;  %v4424_v33 = vshll.u32 %v5465_v40, 16  ;;  %v5438_v62 = vld [vmem:[%s7073_s17 + $0x40] sm:$0xf] }
 0x3a4   : >> { %v3936_v17 = vpop.permute.xlu1 %3935  ;;  %v3805_v32 = vrot.slane %v3804_v57, 4  ;;  %v5420_v57 = vld [vmem:[%s7073_s17 + $0x68] sm:$0x1] }
 0x3a5   : >> { %3975 = vst.msk [vmem:[#allocation4 + $0x24] sm:$0xf] %vm1880_vm5, %v3936_v17  ;;  %v3934_v24 = vpop.permute.xlu0 %3933  ;;  %v3820_v22 = vsel %vm6204_vm11, %v3815_v44, %v3819_v26  ;;  %v4054_v26 = vsel %vm6237_vm14, %v5424_v16, %v4053_v5 }
 0x3a6   : >> { %3974 = vst.msk [vmem:[#allocation4 + $0x20] sm:$0xf] %vm1880_vm5, %v3934_v24  ;;  %3650 = vrot.lane.b32.xlu1 %v5364_v36, %s5753_s23 }
 0x3a7   : >> { %3648 = vrot.lane.b32.xlu0 %v5363_v37, %s5753_s23  ;;  %v3810_v37 = vsel %vm6204_vm11, %v3805_v32, %v7538_v52  ;;  %v5423_v52 = vrot.slane %v5403_v38, 9  ;;  %v5453_v32 = vld [vmem:[%s7073_s17 + $0x30] sm:$0xf] }
 0x3a8   : >> { %v3924_v4 = vpop.permute.xlu1 %3923  ;;  %v4325_v30 = vshrl.u32 %v5453_v32, 16 }
 0x3a9   : >> { %3969 = vst.msk [vmem:[#allocation4 + $0xc] sm:$0xf] %vm1880_vm5, %v3924_v4  ;;  %v3922_v56 = vpop.permute.xlu0 %3921  ;;  %v4076_v4 = vrot.slane %v4074_v47, 4  ;;  %v4047_v7 = vsel %vm6237_vm14, %v5423_v52, %v4046_v19  ;;  %v4328_v19 = vshll.u32 %v5453_v32, 16  ;;  %v5444_v52 = vld [vmem:[%s7073_s17 + $0x64] sm:$0xf] }
 0x3aa   : >> { %3968 = vst.msk [vmem:[#allocation4 + $0x8] sm:$0xf] %vm1880_vm5, %v3922_v56  ;;  %3666 = vrot.lane.b32.xlu1 %v5372_v43, %s5753_s23  ;;  %v4049_v43 = vrot.slane %v5405_v39, 5  ;;  %v5408_v56 = vld [vmem:[%s7073_s17 + $0x38] sm:$0x1] }
 0x3ab   : >> { %3664 = vrot.lane.b32.xlu0 %v5371_v50, %s5753_s23  ;;  %v4077_v50 = vrot.slane %v5417_v53, 5  ;;  %v4056_v0 = vrot.slane %v5408_v56, 5  ;;  %v5435_v39 = vld [vmem:[%s7073_s17 + $0x30] sm:$0xf]  ;;  %v4421_v53 = vshrl.u32 %v5465_v40, 16 }
 0x3ac   : >> { %v3940_v58 = vpop.permute.xlu1 %3939  ;;  %v4050_v1 = vsel %vm6237_vm14, %v4048_v42, %v4049_v43  ;;  %v5455_v42 = vld [vmem:[%s7073_s17 + $0x38] sm:$0x1]  ;;  %v4327_v43 = vrot.slane %v4325_v30, 4 }
 0x3ad   : >> { %3977 = vst.msk [vmem:[#allocation4 + $0x2c] sm:$0xf] %vm1880_vm5, %v3940_v58  ;;  %v3938_v3 = vpop.permute.xlu0 %3937  ;;  %v4078_v63 = vsel %vm6237_vm14, %v4076_v4, %v4077_v50  ;;  %v4075_v58 = vsel %vm6237_vm14, %v5427_v9, %v4074_v47  ;;  %v4330_v47 = vrot.slane %v4328_v19, 5  ;;  %v5467_v9 = vld [vmem:[%s7073_s17 + $0x68] sm:$0x1] }
 0x3ae   : >> { %3976 = vst.msk [vmem:[#allocation4 + $0x28] sm:$0xf] %vm1880_vm5, %v3938_v3  ;;  %3927 = vrot.lane.b32.xlu1 %v3796_v8, %s5754_s24  ;;  %v5419_v8 = vld [vmem:[%s7073_s17 + $0x64] sm:$0xf] }
 0x3af   : >> { %3925 = vrot.lane.b32.xlu0 %v3786_v2, %s5754_s24  ;;  %v4055_v2 = vrot.slane %v4053_v5, 4  ;;  %v4081_v51 = vrot.slane %v5419_v8, 5  ;;  %v4344_v5 = vshll.u32 %v5455_v42, 16 }
 0x3b0   : >> { %v4089_v61 = vpop.permute.xlu1 %4088 }
 0x3b1   : >> { %4136 = vst.msk [vmem:[#allocation4 + $0x4] sm:$0xf] %vm2049_vm6, %v4089_v61  ;;  %v4087_v36 = vpop.permute.xlu0 %4086  ;;  %v4057_v48 = vsel %vm6237_vm14, %v4055_v2, %v4056_v0  ;;  %v4083_v3 = vrot.slane %v4081_v51, 4  ;;  %v5454_v61 = vld [vmem:[%s7073_s17 + $0x34] sm:$0xf]  ;;  %v4082_v35 = vsel %vm6237_vm14, %v5428_v29, %v4081_v51  ;;  %v4426_v2 = vrot.slane %v4424_v33, 5 }
 0x3b2   : >> { %4135 = vst.msk [vmem:[#allocation4] sm:$0xf] %vm2049_vm6, %v4087_v36  ;;  %3943 = vrot.lane.b32.xlu1 %v3892_v45, %s5754_s24  ;;  %v4084_v45 = vrot.slane %v5420_v57, 5  ;;  %v4338_v31 = vshrl.u32 %v5454_v61, 16  ;;  %v5469_v57 = vld [vmem:[%s7073_s17 + $0x70] sm:$0xf] }
 0x3b3   : >> { %3941 = vrot.lane.b32.xlu0 %v3882_v21, %s5754_s24  ;;  %v4346_v25 = vrot.slane %v4344_v5, 5 }
 0x3b4   : >> { %v4105_v17 = vpop.permute.xlu1 %4104  ;;  %v4085_v21 = vsel %vm6237_vm14, %v4083_v3, %v4084_v45  ;;  %v5468_v3 = vld [vmem:[%s7073_s17 + $0x6c] sm:$0xf]  ;;  %v5446_v45 = vld [vmem:[%s7073_s17 + $0x70] sm:$0xf] }
 0x3b5   : >> { %4144 = vst.msk [vmem:[#allocation4 + $0x24] sm:$0xf] %vm2049_vm6, %v4105_v17  ;;  %v4103_v24 = vpop.permute.xlu0 %4102  ;;  %v5436_v17 = vld [vmem:[%s7073_s17 + $0x34] sm:$0xf]  ;;  %v4445_v19 = vshrl.u32 %v5468_v3, 16 }
 0x3b6   : >> { %4143 = vst.msk [vmem:[#allocation4 + $0x20] sm:$0xf] %vm2049_vm6, %v4103_v24  ;;  %3931 = vrot.lane.b32.xlu1 %v3820_v22, %s5754_s24  ;;  %v4334_v22 = vshll.u32 %v5454_v61, 16 }
 0x3b7   : >> { %3929 = vrot.lane.b32.xlu0 %v3810_v37, %s5754_s24  ;;  %v5466_v37 = vld [vmem:[%s7073_s17 + $0x64] sm:$0xf]  ;;  %v4447_v33 = vrot.slane %v4445_v19, 4 }
 0x3b8   : >> { %v4093_v46 = vpop.permute.xlu1 %4092  ;;  %v7635_v38 = vrot.slane %v4334_v22, 5  ;;  %v5445_v22 = vld [vmem:[%s7073_s17 + $0x6c] sm:$0xf] }
 0x3b9   : >> { %4138 = vst.msk [vmem:[#allocation4 + $0xc] sm:$0xf] %vm2049_vm6, %v4093_v46  ;;  %v4091_v54 = vpop.permute.xlu0 %4090  ;;  %v4430_v46 = vshll.u32 %v5466_v37, 16 }
 0x3ba   : >> { %4137 = vst.msk [vmem:[#allocation4 + $0x8] sm:$0xf] %vm2049_vm6, %v4091_v54  ;;  %3947 = vrot.lane.b32.xlu1 %v3916_v41, %s5754_s24  ;;  %v4340_v41 = vrot.slane %v4338_v31, 4  ;;  %v5457_v54 = vld [vmem:[%s7073_s17 + $0x40] sm:$0xf] }
 0x3bb   : >> { %3945 = vrot.lane.b32.xlu0 %v3906_v49, %s5754_s24  ;;  %v4434_v49 = vshrl.u32 %v5466_v37, 16  ;;  %v7650_v56 = vrot.slane %v4430_v46, 5  ;;  %v4362_v0 = vshrl.u32 %v5457_v54, 16 }
 0x3bc   : >> { %v4109_v6 = vpop.permute.xlu1 %4108  ;;  %v4341_v50 = vor.u32 %v4340_v41, %v7635_v38 }
 0x3bd   : >> { %4146 = vst.msk [vmem:[#allocation4 + $0x2c] sm:$0xf] %vm2049_vm6, %v4109_v6  ;;  %v4107_v60 = vpop.permute.xlu0 %4106  ;;  %v5456_v6 = vld [vmem:[%s7073_s17 + $0x3c] sm:$0xf]  ;;  %v4436_v8 = vrot.slane %v4434_v49, 4  ;;  %v4364_v32 = vrot.slane %v4362_v0, 4 }
 0x3be   : >> { %4145 = vst.msk [vmem:[#allocation4 + $0x28] sm:$0xf] %vm2049_vm6, %v4107_v60  ;;  %4096 = vrot.lane.b32.xlu1 %v4050_v1, %s5755_s25  ;;  %v5443_v1 = vld [vmem:[%s7073_s17 + $0x60] sm:$0xf]  ;;  %v4358_v60 = vshll.u32 %v5457_v54, 16  ;;  %v4352_v16 = vshll.u32 %v5456_v6, 16 }
 0x3bf   : >> { %4094 = vrot.lane.b32.xlu0 %v4047_v7, %s5755_s25  ;;  %v4331_v7 = vor.u32 %v4330_v47, %v4327_v43  ;;  %v4437_v29 = vor.u32 %v4436_v8, %v7650_v56 }
 0x3c0   : >> { %v4190_v20 = vpop.permute.xlu1 %4189  ;;  %v4354_v30 = vrot.slane %v4352_v16, 5 }
 0x3c1   : >> { %4237 = vst.msk [vmem:[#allocation4 + $0x4] sm:$0xf] %vm2150_vm9, %v4190_v20  ;;  %v4188_v55 = vpop.permute.xlu0 %4187  ;;  %v5437_v20 = vld [vmem:[%s7073_s17 + $0x3c] sm:$0xf]  ;;  %v4438_v41 = vrot.slane %v4437_v29, 4 }
 0x3c2   : >> { %4236 = vst.msk [vmem:[#allocation4] sm:$0xf] %vm2150_vm9, %v4188_v55  ;;  %4112 = vrot.lane.b32.xlu1 %v4078_v63, %s5755_s25  ;;  %v4423_v63 = vrot.slane %v4421_v53, 4  ;;  %v5470_v53 = vld [vmem:[%s7073_s17 + $0x74] sm:$0x1] }
 0x3c3   : >> { %4110 = vrot.lane.b32.xlu0 %v4075_v58, %s5755_s25  ;;  %v4349_v58 = vshrl.u32 %v5456_v6, 16  ;;  %v4464_v5 = vshll.u32 %v5470_v53, 16 }
 0x3c4   : >> { %v4206_v44 = vpop.permute.xlu1 %4205  ;;  %v4427_v61 = vor.u32 %v4426_v2, %v4423_v63 }
 0x3c5   : >> { %4245 = vst.msk [vmem:[#allocation4 + $0x24] sm:$0xf] %vm2150_vm9, %v4206_v44  ;;  %v4204_v28 = vpop.permute.xlu0 %4203  ;;  %v4342_v44 = vrot.slane %v4341_v50, 4  ;;  %v4351_v31 = vrot.slane %v4349_v58, 4  ;;  %v4466_v0 = vrot.slane %v4464_v5, 5 }
 0x3c6   : >> { %4244 = vst.msk [vmem:[#allocation4 + $0x20] sm:$0xf] %vm2150_vm9, %v4204_v28  ;;  %4100 = vrot.lane.b32.xlu1 %v4057_v48, %s5755_s25  ;;  %v4440_v48 = vshll.u32 %v5467_v9, 16  ;;  %v7662_v28 = vrot.slane %v4358_v60, 5  ;;  %v4428_v49 = vrot.slane %v4427_v61, 4 }
 0x3c7   : >> { %4098 = vrot.lane.b32.xlu0 %v4054_v26, %s5755_s25  ;;  %v4332_v26 = vrot.slane %v4331_v7, 4  ;;  %v5478_v60 = vld [vmem:[%s7073_s17 + $0x34] sm:$0xf]  ;;  %v5491_v61 = vld [vmem:[%s7073_s17 + $0x68] sm:$0x1] }
 0x3c8   : >> { %v4194_v34 = vpop.permute.xlu1 %4193  ;;  %v4442_v40 = vrot.slane %v4440_v48, 5  ;;  %v4365_v42 = vor.u32 %v4364_v32, %v7662_v28  ;;  %v4433_v7 = vsel %vm6204_vm11, %v4428_v49, %v7650_v56  ;;  %v5479_v56 = vld [vmem:[%s7073_s17 + $0x38] sm:$0x1] }
 0x3c9   : >> { %4239 = vst.msk [vmem:[#allocation4 + $0xc] sm:$0xf] %vm2150_vm9, %v4194_v34  ;;  %v4192_v36 = vpop.permute.xlu0 %4191  ;;  %v4454_v34 = vshll.u32 %v5469_v57, 16  ;;  %v4600_v48 = vrot.slane %v5479_v56, 5 }
 0x3ca   : >> { %4238 = vst.msk [vmem:[#allocation4 + $0x8] sm:$0xf] %vm2150_vm9, %v4192_v36  ;;  %4116 = vrot.lane.b32.xlu1 %v4085_v21, %s5755_s25  ;;  %v5458_v21 = vld [vmem:[%s7073_s17 + $0x44] sm:$0x1] }
 0x3cb   : >> { %4114 = vrot.lane.b32.xlu0 %v4082_v35, %s5755_s25  ;;  %v4458_v35 = vshrl.u32 %v5469_v57, 16  ;;  %v4456_v43 = vrot.slane %v4454_v34, 5  ;;  %v5477_v57 = vld [vmem:[%s7073_s17 + $0x30] sm:$0xe] }
 0x3cc   : >> { %v4210_v23 = vpop.permute.xlu1 %4209 }
 0x3cd   : >> { %4247 = vst.msk [vmem:[#allocation4 + $0x2c] sm:$0xf] %vm2150_vm9, %v4210_v23  ;;  %v4208_v24 = vpop.permute.xlu0 %4207  ;;  %v4347_v23 = vsel %vm6204_vm11, %v4342_v44, %v4346_v25  ;;  %v4460_v47 = vrot.slane %v4458_v35, 4  ;;  %v5497_v44 = vrot.slane %v5477_v57, 9  ;;  %v5489_v35 = vld [vmem:[%s7073_s17 + $0x60] sm:$0xe] }
 0x3ce   : >> { %4246 = vst.msk [vmem:[#allocation4 + $0x28] sm:$0xf] %vm2150_vm9, %v4208_v24  ;;  %4197 = vrot.lane.b32.xlu1 %v5436_v17, %s5756_s27  ;;  %v4448_v17 = vshll.u32 %v5468_v3, 16  ;;  %v4368_v24 = vshll.u32 %v5458_v21, 16  ;;  %v5481_v21 = vld [vmem:[%s7073_s17 + $0x40] sm:$0xf] }
 0x3cf   : >> { %4195 = vrot.lane.b32.xlu0 %v5435_v39, %s5756_s27  ;;  %v4337_v39 = vsel %vm6204_vm11, %v4332_v26, %v7635_v38  ;;  %v4461_v50 = vor.u32 %v4460_v47, %v4456_v43  ;;  %v4604_v19 = vrot.slane %v5481_v21, 5 }
 0x3d0   : >> { %v4471_v59 = vpop.permute.xlu1 %4470  ;;  %v4450_v54 = vrot.slane %v4448_v17, 5  ;;  %v4370_v38 = vrot.slane %v4368_v24, 5 }
 0x3d1   : >> { %4518 = vst.msk [vmem:[#allocation4 + $0x4] sm:$0xf] %vm2431_vm10, %v4471_v59  ;;  %v4469_v4 = vpop.permute.xlu0 %4468  ;;  %v4462_v2 = vrot.slane %v4461_v50, 4 }
 0x3d2   : >> { %4517 = vst.msk [vmem:[#allocation4] sm:$0xf] %vm2431_vm10, %v4469_v4  ;;  %4213 = vrot.lane.b32.xlu1 %v5444_v52, %s5756_s27  ;;  %v4355_v52 = vor.u32 %v4354_v30, %v4351_v31  ;;  %v4366_v4 = vrot.slane %v4365_v42, 4  ;;  %v4451_v8 = vor.u32 %v4450_v54, %v4447_v33  ;;  %v4628_v31 = vrot.slane %v5491_v61, 5  ;;  %v5482_v30 = vld [vmem:[%s7073_s17 + $0x44] sm:$0x1] }
 0x3d3   : >> { %4211 = vrot.lane.b32.xlu0 %v5443_v1, %s5756_s27  ;;  %v4443_v1 = vsel %vm6204_vm11, %v4438_v41, %v4442_v40  ;;  %v4467_v3 = vsel %vm6204_vm11, %v4462_v2, %v4466_v0  ;;  %v5480_v41 = vld [vmem:[%s7073_s17 + $0x3c] sm:$0xe]  ;;  %v4607_v47 = vrot.slane %v5482_v30, 5  ;;  %v5494_v33 = vld [vmem:[%s7073_s17 + $0x74] sm:$0x1] }
 0x3d4   : >> { %v4487_v51 = vpop.permute.xlu1 %4486  ;;  %v4356_v9 = vrot.slane %v4355_v52, 4  ;;  %v4371_v63 = vsel %vm6204_vm11, %v4366_v4, %v4370_v38  ;;  %v4452_v16 = vrot.slane %v4451_v8, 4  ;;  %v5498_v53 = vrot.slane %v5480_v41, 9 }
 0x3d5   : >> { %4526 = vst.msk [vmem:[#allocation4 + $0x24] sm:$0xf] %vm2431_vm10, %v4487_v51  ;;  %v4485_v55 = vpop.permute.xlu0 %4484  ;;  %v4597_v51 = vrot.slane %v5478_v60, 5  ;;  %v4635_v4 = vrot.slane %v5494_v33, 5 }
 0x3d6   : >> { %4525 = vst.msk [vmem:[#allocation4 + $0x20] sm:$0xf] %vm2431_vm10, %v4485_v55  ;;  %4201 = vrot.lane.b32.xlu1 %v5438_v62, %s5756_s27  ;;  %v4361_v58 = vsel %vm6204_vm11, %v4356_v9, %v7662_v28  ;;  %v5490_v55 = vld [vmem:[%s7073_s17 + $0x64] sm:$0xf]  ;;  %v4457_v28 = vsel %vm6204_vm11, %v4452_v16, %v4456_v43  ;;  %v4606_v43 = vrot.slane %v4604_v19, 4  ;;  %v4605_v5 = vsel %vm6237_vm14, %v5498_v53, %v4604_v19 }
 0x3d7   : >> { %4199 = vrot.lane.b32.xlu0 %v5437_v20, %s5756_s27  ;;  %v4625_v26 = vrot.slane %v5490_v55, 5 }
 0x3d8   : >> { %v4475_v36 = vpop.permute.xlu1 %4474  ;;  %v4608_v38 = vsel %vm6237_vm14, %v4606_v43, %v4607_v47 }
 0x3d9   : >> { %4520 = vst.msk [vmem:[#allocation4 + $0xc] sm:$0xf] %vm2431_vm10, %v4475_v36  ;;  %v4473_v37 = vpop.permute.xlu0 %4472 }
 0x3da   : >> { %4519 = vst.msk [vmem:[#allocation4 + $0x8] sm:$0xf] %vm2431_vm10, %v4473_v37  ;;  %4217 = vrot.lane.b32.xlu1 %v5446_v45, %s5756_s27  ;;  %v4599_v45 = vrot.slane %v4597_v51, 4  ;;  %v4598_v37 = vsel %vm6237_vm14, %v5497_v44, %v4597_v51 }
 0x3db   : >> { %4215 = vrot.lane.b32.xlu0 %v5445_v22, %s5756_s27  ;;  %v4627_v22 = vrot.slane %v4625_v26, 4 }
 0x3dc   : >> { %v4491_v46 = vpop.permute.xlu1 %4490  ;;  %v4601_v36 = vsel %vm6237_vm14, %v4599_v45, %v4600_v48 }
 0x3dd   : >> { %4528 = vst.msk [vmem:[#allocation4 + $0x2c] sm:$0xf] %vm2431_vm10, %v4491_v46  ;;  %v4489_v59 = vpop.permute.xlu0 %4488  ;;  %v4629_v42 = vsel %vm6237_vm14, %v4627_v22, %v4628_v31 }
 0x3de   : >> { %4527 = vst.msk [vmem:[#allocation4 + $0x28] sm:$0xf] %vm2431_vm10, %v4489_v59  ;;  %4478 = vrot.lane.b32.xlu1 %v4347_v23, %s5757_s28  ;;  %v5501_v23 = vrot.slane %v5489_v35, 9  ;;  %v5492_v59 = vld [vmem:[%s7073_s17 + $0x6c] sm:$0xe] }
 0x3df   : >> { %4476 = vrot.lane.b32.xlu0 %v4337_v39, %s5757_s28  ;;  %v5493_v39 = vld [vmem:[%s7073_s17 + $0x70] sm:$0xf] }
 0x3e0   : >> { %v4640_v6 = vpop.permute.xlu1 %4639  ;;  %v4632_v46 = vrot.slane %v5493_v39, 5  ;;  %v4626_v52 = vsel %vm6237_vm14, %v5501_v23, %v4625_v26 }
 0x3e1   : >> { %4687 = vst.msk [vmem:[#allocation4 + $0x4] sm:$0xf] %vm2600_vm12, %v4640_v6  ;;  %v4638_v62 = vpop.permute.xlu0 %4637  ;;  %v5502_v6 = vrot.slane %v5492_v59, 9 }
 0x3e2   : >> { %4686 = vst.msk [vmem:[#allocation4] sm:$0xf] %vm2600_vm12, %v4638_v62  ;;  %4494 = vrot.lane.b32.xlu1 %v4443_v1, %s5757_s28  ;;  %v4634_v1 = vrot.slane %v4632_v46, 4 }
 0x3e3   : >> { %4492 = vrot.lane.b32.xlu0 %v4433_v7, %s5757_s28  ;;  %v4633_v60 = vsel %vm6237_vm14, %v5502_v6, %v4632_v46 }
 0x3e4   : >> { %v4656_v20 = vpop.permute.xlu1 %4655  ;;  %v4636_v9 = vsel %vm6237_vm14, %v4634_v1, %v4635_v4 }
 0x3e5   : >> { %4695 = vst.msk [vmem:[#allocation4 + $0x24] sm:$0xf] %vm2600_vm12, %v4656_v20  ;;  %v4654_v25 = vpop.permute.xlu0 %4653 }
 0x3e6   : >> { %4694 = vst.msk [vmem:[#allocation4 + $0x20] sm:$0xf] %vm2600_vm12, %v4654_v25  ;;  %4482 = vrot.lane.b32.xlu1 %v4371_v63, %s5757_s28 }
 0x3e7   : >> { %4480 = vrot.lane.b32.xlu0 %v4361_v58, %s5757_s28 }
 0x3e8   : >> { %v3374_v29 = vpop.permute.xlu1 %3373 }
 0x3e9   : >> { %3417 = vst.msk [vmem:[#allocation4 + $0x14] sm:$0xf] %vm1326_vm15, %v3374_v29  ;;  %v3372_v32 = vpop.permute.xlu0 %3371  ;;  %v5710_v34 = vld [vmem:[#allocation4] sm:$0xff]  }
 0x3ea   : >> { %3416 = vst.msk [vmem:[#allocation4 + $0x10] sm:$0xf] %vm1326_vm15, %v3372_v32  ;;  %4498 = vrot.lane.b32.xlu1 %v4467_v3, %s5757_s28  ;;  %5629 = vmatprep.mubr.msk.bf16.mxu0 %vm2694_vm13, %v5710_v34 }
 0x3eb   : >> { %4496 = vrot.lane.b32.xlu0 %v4457_v28, %s5757_s28 }
 0x3ec   : >> { %v3390_v17 = vpop.permute.xlu1 %3389 }
 0x3ed   : >> { %3425 = vst.msk [vmem:[#allocation4 + $0x34] sm:$0xf] %vm1326_vm15, %v3390_v17  ;;  %v3388_v40 = vpop.permute.xlu0 %3387  ;;  %v5711_v24 = vld [vmem:[#allocation4 + $0x20] sm:$0xff]  }
 0x3ee   : >> { %3424 = vst.msk [vmem:[#allocation4 + $0x30] sm:$0xf] %vm1326_vm15, %v3388_v40  ;;  %4647 = vrot.lane.b32.xlu1 %v4601_v36, %s5758_s19  ;;  %5637 = vmatprep.mubr.msk.bf16.mxu1 %vm2694_vm13, %v5711_v24 }
 0x3ef   : >> { %4645 = vrot.lane.b32.xlu0 %v4598_v37, %s5758_s19 }
 0x3f0   : >> { %v4644_v49 = vpop.permute.xlu1 %4643 }
 0x3f1   : >> { %4689 = vst.msk [vmem:[#allocation4 + $0xc] sm:$0xf] %vm2600_vm12, %v4644_v49  ;;  %v4642_v54 = vpop.permute.xlu0 %4641 }
 0x3f2   : >> { %4688 = vst.msk [vmem:[#allocation4 + $0x8] sm:$0xf] %vm2600_vm12, %v4642_v54  ;;  %4663 = vrot.lane.b32.xlu1 %v4629_v42, %s5758_s19 }
 0x3f3   : >> { %4661 = vrot.lane.b32.xlu0 %v4626_v52, %s5758_s19 }
 0x3f4   : >> { %v4660_v50 = vpop.permute.xlu1 %4659 }
 0x3f5   : >> { %4697 = vst.msk [vmem:[#allocation4 + $0x2c] sm:$0xf] %vm2600_vm12, %v4660_v50  ;;  %v4658_v7 = vpop.permute.xlu0 %4657 }
 0x3f6   : >> { %4696 = vst.msk [vmem:[#allocation4 + $0x28] sm:$0xf] %vm2600_vm12, %v4658_v7  ;;  %4651 = vrot.lane.b32.xlu1 %v4608_v38, %s5758_s19 }
 0x3f7   : >> { %4649 = vrot.lane.b32.xlu0 %v4605_v5, %s5758_s19 }
 0x3f8   : >> { %v3378_v8 = vpop.permute.xlu1 %3377 }
 0x3f9   : >> { %3419 = vst.msk [vmem:[#allocation4 + $0x1c] sm:$0xf] %vm1326_vm15, %v3378_v8  ;;  %v3376_v62 = vpop.permute.xlu0 %3375  ;;  %v5712_v63 = vld [vmem:[#allocation4 + $0x8] sm:$0xff]  }
 0x3fa   : >> { %3418 = vst.msk [vmem:[#allocation4 + $0x18] sm:$0xf] %vm1326_vm15, %v3376_v62  ;;  %4667 = vrot.lane.b32.xlu1 %v4636_v9, %s5758_s19  ;;  %5630 = vmatmul.mubr.msk.bf16.vlgmr.msra.gmra.mxu0 %vm2694_vm13, %v5712_v63 }
 0x3fb   : >> { %4665 = vrot.lane.b32.xlu0 %v4633_v60, %s5758_s19 }
 0x3fc   : >> { %v3394_v2 = vpop.permute.xlu1 %3393 }
 0x3fd   : >> { %3427 = vst.msk [vmem:[#allocation4 + $0x3c] sm:$0xf] %vm1326_vm15, %v3394_v2  ;;  %v3392_v0 = vpop.permute.xlu0 %3391  ;;  %v5713_v56 = vld [vmem:[#allocation4 + $0x28] sm:$0xff]  }
 0x3fe   : >> { %3426 = vst.msk [vmem:[#allocation4 + $0x38] sm:$0xf] %vm1326_vm15, %v3392_v0  ;;  %5638 = vmatmul.mubr.msk.bf16.vlgmr.msra.gmra.mxu1 %vm2694_vm13, %v5713_v56 }
 0x400   : >> { %v3546_v51 = vpop.permute.xlu1 %3545 }
 0x401   : >> { %3589 = vst.msk [vmem:[#allocation4 + $0x14] sm:$0xf] %vm1498_vm1, %v3546_v51  ;;  %v3544_v20 = vpop.permute.xlu0 %3543 }
 0x402   : >> { %3588 = vst.msk [vmem:[#allocation4 + $0x10] sm:$0xf] %vm1498_vm1, %v3544_v20 }
 0x404   : >> { %v3562_v58 = vpop.permute.xlu1 %3561 }
 0x405   : >> { %3597 = vst.msk [vmem:[#allocation4 + $0x34] sm:$0xf] %vm1498_vm1, %v3562_v58  ;;  %v3560_v16 = vpop.permute.xlu0 %3559 }
 0x406   : >> { %3596 = vst.msk [vmem:[#allocation4 + $0x30] sm:$0xf] %vm1498_vm1, %v3560_v16 }
 0x408   : >> { %v3550_v57 = vpop.permute.xlu1 %3549 }
 0x409   : >> { %3591 = vst.msk [vmem:[#allocation4 + $0x1c] sm:$0xf] %vm1498_vm1, %v3550_v57  ;;  %v3548_v55 = vpop.permute.xlu0 %3547 }
 0x40a   : >> { %3590 = vst.msk [vmem:[#allocation4 + $0x18] sm:$0xf] %vm1498_vm1, %v3548_v55  ;;  %v4909_v55 = vld [vmem:[%s7820_s30 + $0x10] sm:$0xff] }
 0x40c   : >> { %v3566_v25 = vpop.permute.xlu1 %3565 }
 0x40d   : >> { %3599 = vst.msk [vmem:[#allocation4 + $0x3c] sm:$0xf] %vm1498_vm1, %v3566_v25  ;;  %v3564_v48 = vpop.permute.xlu0 %3563 }
 0x40e   : >> { %3598 = vst.msk [vmem:[#allocation4 + $0x38] sm:$0xf] %vm1498_vm1, %v3564_v48 }
 0x410   : >> { %v3647_v3 = vpop.permute.xlu1 %3646 }
 0x411   : >> { %3690 = vst.msk [vmem:[#allocation4 + $0x14] sm:$0xf] %vm1599_vm4, %v3647_v3  ;;  %v3645_v45 = vpop.permute.xlu0 %3644  ;;  %v4907_v3 = vld [vmem:[%s7820_s30] sm:$0xff] }
 0x412   : >> { %3689 = vst.msk [vmem:[#allocation4 + $0x10] sm:$0xf] %vm1599_vm4, %v3645_v45 }
 0x414   : >> { %v3663_v44 = vpop.permute.xlu1 %3662 }
 0x415   : >> { %3698 = vst.msk [vmem:[#allocation4 + $0x34] sm:$0xf] %vm1599_vm4, %v3663_v44  ;;  %v3661_v26 = vpop.permute.xlu0 %3660 }
 0x416   : >> { %3697 = vst.msk [vmem:[#allocation4 + $0x30] sm:$0xf] %vm1599_vm4, %v3661_v26 }
 0x418   : >> { %v3651_v29 = vpop.permute.xlu1 %3650 }
 0x419   : >> { %3692 = vst.msk [vmem:[#allocation4 + $0x1c] sm:$0xf] %vm1599_vm4, %v3651_v29  ;;  %v3649_v28 = vpop.permute.xlu0 %3648  ;;  %v4910_v29 = vld [vmem:[%s7820_s30 + $0x18] sm:$0xff] }
 0x41a   : >> { %3691 = vst.msk [vmem:[#allocation4 + $0x18] sm:$0xf] %vm1599_vm4, %v3649_v28 }
 0x41c   : >> { %v3667_v61 = vpop.permute.xlu1 %3666 }
 0x41d   : >> { %3700 = vst.msk [vmem:[#allocation4 + $0x3c] sm:$0xf] %vm1599_vm4, %v3667_v61  ;;  %v3665_v21 = vpop.permute.xlu0 %3664  ;;  %v4917_v61 = vld [vmem:[%s7820_s30 + $0x50] sm:$0xff] }
 0x41e   : >> { %3699 = vst.msk [vmem:[#allocation4 + $0x38] sm:$0xf] %vm1599_vm4, %v3665_v21 }
 0x420   : >> { %v3928_v32 = vpop.permute.xlu1 %3927 }
 0x421   : >> { %3971 = vst.msk [vmem:[#allocation4 + $0x14] sm:$0xf] %vm1880_vm5, %v3928_v32  ;;  %v3926_v34 = vpop.permute.xlu0 %3925 }
 0x422   : >> { %3970 = vst.msk [vmem:[#allocation4 + $0x10] sm:$0xf] %vm1880_vm5, %v3926_v34 }
 0x424   : >> { %v3944_v35 = vpop.permute.xlu1 %3943 }
 0x425   : >> { %3979 = vst.msk [vmem:[#allocation4 + $0x34] sm:$0xf] %vm1880_vm5, %v3944_v35  ;;  %v3942_v36 = vpop.permute.xlu0 %3941 }
 0x426   : >> { %3978 = vst.msk [vmem:[#allocation4 + $0x30] sm:$0xf] %vm1880_vm5, %v3942_v36 }
 0x428   : >> { %v3932_v22 = vpop.permute.xlu1 %3931 }
 0x429   : >> { %3973 = vst.msk [vmem:[#allocation4 + $0x1c] sm:$0xf] %vm1880_vm5, %v3932_v22  ;;  %v3930_v31 = vpop.permute.xlu0 %3929  ;;  %v4908_v22 = vld [vmem:[%s7820_s30 + $0x8] sm:$0xff] }
 0x42a   : >> { %3972 = vst.msk [vmem:[#allocation4 + $0x18] sm:$0xf] %vm1880_vm5, %v3930_v31 }
 0x42c   : >> { %v3948_v30 = vpop.permute.xlu1 %3947 }
 0x42d   : >> { %3981 = vst.msk [vmem:[#allocation4 + $0x3c] sm:$0xf] %vm1880_vm5, %v3948_v30  ;;  %v3946_v19 = vpop.permute.xlu0 %3945 }
 0x42e   : >> { %3980 = vst.msk [vmem:[#allocation4 + $0x38] sm:$0xf] %vm1880_vm5, %v3946_v19 }
 0x430   : >> { %v4097_v17 = vpop.permute.xlu1 %4096 }
 0x431   : >> { %4140 = vst.msk [vmem:[#allocation4 + $0x14] sm:$0xf] %vm2049_vm6, %v4097_v17  ;;  %v4095_v37 = vpop.permute.xlu0 %4094 }
 0x432   : >> { %4139 = vst.msk [vmem:[#allocation4 + $0x10] sm:$0xf] %vm2049_vm6, %v4095_v37 }
 0x434   : >> { %v4113_v23 = vpop.permute.xlu1 %4112 }
 0x435   : >> { %4148 = vst.msk [vmem:[#allocation4 + $0x34] sm:$0xf] %vm2049_vm6, %v4113_v23  ;;  %v4111_v39 = vpop.permute.xlu0 %4110  ;;  %v4915_v23 = vld [vmem:[%s7820_s30 + $0x40] sm:$0xff] }
 0x436   : >> { %4147 = vst.msk [vmem:[#allocation4 + $0x30] sm:$0xf] %vm2049_vm6, %v4111_v39 }
 0x438   : >> { %v4101_v40 = vpop.permute.xlu1 %4100 }
 0x439   : >> { %4142 = vst.msk [vmem:[#allocation4 + $0x1c] sm:$0xf] %vm2049_vm6, %v4101_v40  ;;  %v4099_v24 = vpop.permute.xlu0 %4098 }
 0x43a   : >> { %4141 = vst.msk [vmem:[#allocation4 + $0x18] sm:$0xf] %vm2049_vm6, %v4099_v24  ;;  %v4918_v24 = vld [vmem:[%s7820_s30 + $0x58] sm:$0xff] }
 0x43c   : >> { %v4117_v41 = vpop.permute.xlu1 %4116 }
 0x43d   : >> { %4150 = vst.msk [vmem:[#allocation4 + $0x3c] sm:$0xf] %vm2049_vm6, %v4117_v41  ;;  %v4115_v42 = vpop.permute.xlu0 %4114 }
 0x43e   : >> { %4149 = vst.msk [vmem:[#allocation4 + $0x38] sm:$0xf] %vm2049_vm6, %v4115_v42 }
 0x440   : >> { %v4198_v43 = vpop.permute.xlu1 %4197 }
 0x441   : >> { %4241 = vst.msk [vmem:[#allocation4 + $0x14] sm:$0xf] %vm2150_vm9, %v4198_v43  ;;  %v4196_v47 = vpop.permute.xlu0 %4195 }
 0x442   : >> { %4240 = vst.msk [vmem:[#allocation4 + $0x10] sm:$0xf] %vm2150_vm9, %v4196_v47 }
 0x444   : >> { %v4214_v46 = vpop.permute.xlu1 %4213 }
 0x445   : >> { %4249 = vst.msk [vmem:[#allocation4 + $0x34] sm:$0xf] %vm2150_vm9, %v4214_v46  ;;  %v4212_v49 = vpop.permute.xlu0 %4211 }
 0x446   : >> { %4248 = vst.msk [vmem:[#allocation4 + $0x30] sm:$0xf] %vm2150_vm9, %v4212_v49 }
 0x448   : >> { %v4202_v52 = vpop.permute.xlu1 %4201 }
 0x449   : >> { %4243 = vst.msk [vmem:[#allocation4 + $0x1c] sm:$0xf] %vm2150_vm9, %v4202_v52  ;;  %v4200_v53 = vpop.permute.xlu0 %4199  ;;  %v4916_v52 = vld [vmem:[%s7820_s30 + $0x48] sm:$0xff] }
 0x44a   : >> { %4242 = vst.msk [vmem:[#allocation4 + $0x18] sm:$0xf] %vm2150_vm9, %v4200_v53 }
 0x44c   : >> { %v4218_v33 = vpop.permute.xlu1 %4217 }
 0x44d   : >> { %4251 = vst.msk [vmem:[#allocation4 + $0x3c] sm:$0xf] %vm2150_vm9, %v4218_v33  ;;  %v4216_v54 = vpop.permute.xlu0 %4215 }
 0x44e   : >> { %4250 = vst.msk [vmem:[#allocation4 + $0x38] sm:$0xf] %vm2150_vm9, %v4216_v54 }
 0x450   : >> { %v4479_v59 = vpop.permute.xlu1 %4478 }
 0x451   : >> { %4522 = vst.msk [vmem:[#allocation4 + $0x14] sm:$0xf] %vm2431_vm10, %v4479_v59  ;;  %v4477_v38 = vpop.permute.xlu0 %4476 }
 0x452   : >> { %4521 = vst.msk [vmem:[#allocation4 + $0x10] sm:$0xf] %vm2431_vm10, %v4477_v38 }
 0x454   : >> { %v4495_v1 = vpop.permute.xlu1 %4494 }
 0x455   : >> { %4530 = vst.msk [vmem:[#allocation4 + $0x34] sm:$0xf] %vm2431_vm10, %v4495_v1  ;;  %v4493_v4 = vpop.permute.xlu0 %4492 }
 0x456   : >> { %4529 = vst.msk [vmem:[#allocation4 + $0x30] sm:$0xf] %vm2431_vm10, %v4493_v4 }
 0x458   : >> { %v4483_v50 = vpop.permute.xlu1 %4482 }
 0x459   : >> { %4524 = vst.msk [vmem:[#allocation4 + $0x1c] sm:$0xf] %vm2431_vm10, %v4483_v50  ;;  %v4481_v5 = vpop.permute.xlu0 %4480 }
 0x45a   : >> { %4523 = vst.msk [vmem:[#allocation4 + $0x18] sm:$0xf] %vm2431_vm10, %v4481_v5  ;;  %v4913_v5 = vld [vmem:[%s7820_s30 + $0x30] sm:$0xff] }
 0x45c   : >> { %v4499_v6 = vpop.permute.xlu1 %4498 }
 0x45d   : >> { %4532 = vst.msk [vmem:[#allocation4 + $0x3c] sm:$0xf] %vm2431_vm10, %v4499_v6  ;;  %v4497_v7 = vpop.permute.xlu0 %4496 }
 0x45e   : >> { %4531 = vst.msk [vmem:[#allocation4 + $0x38] sm:$0xf] %vm2431_vm10, %v4497_v7 }
 0x460   : >> { %v4648_v9 = vpop.permute.xlu1 %4647 }
 0x461   : >> { %4691 = vst.msk [vmem:[#allocation4 + $0x14] sm:$0xf] %vm2600_vm12, %v4648_v9  ;;  %v4646_v8 = vpop.permute.xlu0 %4645  ;;  %v4911_v9 = vld [vmem:[%s7820_s30 + $0x20] sm:$0xff] }
 0x462   : >> { %4690 = vst.msk [vmem:[#allocation4 + $0x10] sm:$0xf] %vm2600_vm12, %v4646_v8 }
 0x464   : >> { %v4664_v60 = vpop.permute.xlu1 %4663 }
 0x465   : >> { %4699 = vst.msk [vmem:[#allocation4 + $0x34] sm:$0xf] %vm2600_vm12, %v4664_v60  ;;  %v4662_v62 = vpop.permute.xlu0 %4661 }
 0x466   : >> { %4698 = vst.msk [vmem:[#allocation4 + $0x30] sm:$0xf] %vm2600_vm12, %v4662_v62 }
 0x468   : >> { %v4652_v63 = vpop.permute.xlu1 %4651 }
 0x469   : >> { %4693 = vst.msk [vmem:[#allocation4 + $0x1c] sm:$0xf] %vm2600_vm12, %v4652_v63  ;;  %v4650_v2 = vpop.permute.xlu0 %4649  ;;  %v5714_v0 = vld [vmem:[#allocation4 + $0x10] sm:$0xff]   ;;  %v4914_v63 = vld [vmem:[%s7820_s30 + $0x38] sm:$0xff] }
 0x46a   : >> { %4692 = vst.msk [vmem:[#allocation4 + $0x18] sm:$0xf] %vm2600_vm12, %v4650_v2  ;;  %5633 = vmatprep.mubr.msk.bf16.mxu0 %vm2694_vm13, %v5714_v0  ;;  %v4921_v0 = vld [vmem:[%s7820_s30 + $0x70] sm:$0xff] }
 0x46c   : >> { %v4668_v56 = vpop.permute.xlu1 %4667 }
 0x46d   : >> { %4701 = vst.msk [vmem:[#allocation4 + $0x3c] sm:$0xf] %vm2600_vm12, %v4668_v56  ;;  %v4666_v51 = vpop.permute.xlu0 %4665  ;;  %v5715_v20 = vld [vmem:[#allocation4 + $0x30] sm:$0xff]  }
 0x46e   : >> { %4700 = vst.msk [vmem:[#allocation4 + $0x38] sm:$0xf] %vm2600_vm12, %v4666_v51  ;;  %5641 = vmatprep.mubr.msk.bf16.mxu1 %vm2694_vm13, %v5715_v20 }
 0x471   : >> { %v5716_v58 = vld [vmem:[#allocation4 + $0x18] sm:$0xff]  }
 0x472   : >> { %5634 = vmatmul.mubr.msk.bf16.gmra.mxu0 %vm2694_vm13, %v5716_v58 }
 0x475   : >> { %v5717_v16 = vld [vmem:[#allocation4 + $0x38] sm:$0xff]  }
 0x476   : >> { %5642 = vmatmul.mubr.msk.bf16.gmra.mxu1 %vm2694_vm13, %v5717_v16 }
 0x4ba   : >> { %v5631_v57 = vpop.f32.mrf.mxu0 }
 0x4bb   : >> { %v4851_v25 = vadd.f32 %v5631_v57, %v5949_v15  ;;  %v4912_v57 = vld [vmem:[%s7820_s30 + $0x28] sm:$0xff] }
 0x4bc   : >> { %v4842_v48 = vpop.f32.mrf.mxu0 }
 0x4bd   : >> { %v4925_v45 = vadd.f32 %v4909_v55, %v4851_v25  ;;  %v4843_v44 = vadd.f32 %v5949_v15, %v4842_v48 }
 0x4be   : >> { %v5632_v26 = vpop.f32.mrf.mxu0  ;;  %v5639_v28 = vpop.f32.mrf.mxu1 }
 0x4bf   : >> { %v4941_v21 = vmax.f32 %v4925_v45, 0.0  ;;  %v4923_v32 = vadd.f32 %v4907_v3, %v4843_v44  ;;  %v4854_v34 = vadd.f32 %v5632_v26, %v5949_v15  ;;  %v4883_v35 = vadd.f32 %v5639_v28, %v5949_v15  ;;  %v4919_v44 = vld [vmem:[%s7820_s30 + $0x60] sm:$0xff]  ;;  %v4922_v28 = vld [vmem:[%s7820_s30 + $0x78] sm:$0xff] }
 0x4c0   : >> { %v4845_v36 = vpop.f32.mrf.mxu0  ;;  %v4874_v31 = vpop.f32.mrf.mxu1 }
 0x4c1   : >> { %4959 = vst.msk [vmem:[%s7827_s6 + $0x10] sm:$0xff] %vm4956_vm3, %v4941_v21  ;;  %v4939_v30 = vmax.f32 %v4923_v32, 0.0  ;;  %v4926_v19 = vadd.f32 %v4910_v29, %v4854_v34  ;;  %v4933_v17 = vadd.f32 %v4917_v61, %v4883_v35  ;;  %v4846_v37 = vadd.f32 %v5949_v15, %v4845_v36 }
 0x4c2   : >> { %v4875_v39 = vadd.f32 %v5949_v15, %v4874_v31  ;;  %v5640_v40 = vpop.f32.mrf.mxu1 }
 0x4c3   : >> { %4957 = vst.msk [vmem:[%s7827_s6] sm:$0xff] %vm4956_vm3, %v4939_v30  ;;  %v4942_v41 = vmax.f32 %v4926_v19, 0.0  ;;  %v4949_v42 = vmax.f32 %v4933_v17, 0.0  ;;  %v4924_v43 = vadd.f32 %v4908_v22, %v4846_v37  ;;  %v4886_v47 = vadd.f32 %v5640_v40, %v5949_v15  ;;  %v4920_v22 = vld [vmem:[%s7820_s30 + $0x68] sm:$0xff] }
 0x4c4   : >> { %v4931_v46 = vadd.f32 %v4915_v23, %v4875_v39  ;;  %v4877_v49 = vpop.f32.mrf.mxu1 }
 0x4c5   : >> { %4960 = vst.msk [vmem:[%s7827_s6 + $0x18] sm:$0xff] %vm4956_vm3, %v4942_v41  ;;  %4967 = vst.msk [vmem:[%s7827_s6 + $0x50] sm:$0xff] %vm4956_vm3, %v4949_v42  ;;  %v4940_v53 = vmax.f32 %v4924_v43, 0.0  ;;  %v4934_v33 = vadd.f32 %v4918_v24, %v4886_v47  ;;  %v4878_v54 = vadd.f32 %v5949_v15, %v4877_v49 }
 0x4c6   : >> { %v4947_v59 = vmax.f32 %v4931_v46, 0.0 }
 0x4c7   : >> { %4958 = vst.msk [vmem:[%s7827_s6 + $0x8] sm:$0xff] %vm4956_vm3, %v4940_v53  ;;  %v4950_v38 = vmax.f32 %v4934_v33, 0.0  ;;  %v4932_v1 = vadd.f32 %v4916_v52, %v4878_v54 }
 0x4c8   : >> { %4965 = vst.msk [vmem:[%s7827_s6 + $0x40] sm:$0xff] %vm4956_vm3, %v4947_v59 }
 0x4c9   : >> { %4968 = vst.msk [vmem:[%s7827_s6 + $0x58] sm:$0xff] %vm4956_vm3, %v4950_v38  ;;  %v4948_v4 = vmax.f32 %v4932_v1, 0.0 }
 0x4cb   : >> { %4966 = vst.msk [vmem:[%s7827_s6 + $0x48] sm:$0xff] %vm4956_vm3, %v4948_v4 }
 0x532   : >> { %v5635_v50 = vpop.f32.mrf.mxu0 }
 0x533   : >> { %v4867_v6 = vadd.f32 %v5635_v50, %v5949_v15 }
 0x534   : >> { %v4858_v7 = vpop.f32.mrf.mxu0 }
 0x535   : >> { %v4929_v8 = vadd.f32 %v4913_v5, %v4867_v6  ;;  %v4859_v60 = vadd.f32 %v5949_v15, %v4858_v7 }
 0x536   : >> { %v5636_v62 = vpop.f32.mrf.mxu0  ;;  %v5643_v2 = vpop.f32.mrf.mxu1 }
 0x537   : >> { %v4945_v56 = vmax.f32 %v4929_v8, 0.0  ;;  %v4927_v51 = vadd.f32 %v4911_v9, %v4859_v60  ;;  %v4870_v20 = vadd.f32 %v5636_v62, %v5949_v15  ;;  %v4899_v58 = vadd.f32 %v5643_v2, %v5949_v15 }
 0x538   : >> { %v4861_v16 = vpop.f32.mrf.mxu0  ;;  %v4890_v55 = vpop.f32.mrf.mxu1 }
 0x539   : >> { %4963 = vst.msk [vmem:[%s7827_s6 + $0x30] sm:$0xff] %vm4956_vm3, %v4945_v56  ;;  %v4943_v25 = vmax.f32 %v4927_v51, 0.0  ;;  %v4930_v48 = vadd.f32 %v4914_v63, %v4870_v20  ;;  %v4937_v3 = vadd.f32 %v4921_v0, %v4899_v58  ;;  %v4862_v45 = vadd.f32 %v5949_v15, %v4861_v16 }
 0x53a   : >> { %v4891_v26 = vadd.f32 %v5949_v15, %v4890_v55  ;;  %v5644_v29 = vpop.f32.mrf.mxu1 }
 0x53b   : >> { %4961 = vst.msk [vmem:[%s7827_s6 + $0x20] sm:$0xff] %vm4956_vm3, %v4943_v25  ;;  %v4946_v61 = vmax.f32 %v4930_v48, 0.0  ;;  %v4953_v21 = vmax.f32 %v4937_v3, 0.0  ;;  %v4928_v32 = vadd.f32 %v4912_v57, %v4862_v45  ;;  %v4902_v34 = vadd.f32 %v5644_v29, %v5949_v15 }
 0x53c   : >> { %v4935_v35 = vadd.f32 %v4919_v44, %v4891_v26  ;;  %v4893_v36 = vpop.f32.mrf.mxu1 }
 0x53d   : >> { %4964 = vst.msk [vmem:[%s7827_s6 + $0x38] sm:$0xff] %vm4956_vm3, %v4946_v61  ;;  %4971 = vst.msk [vmem:[%s7827_s6 + $0x70] sm:$0xff] %vm4956_vm3, %v4953_v21  ;;  %v4944_v31 = vmax.f32 %v4928_v32, 0.0  ;;  %v4938_v30 = vadd.f32 %v4922_v28, %v4902_v34  ;;  %v4894_v19 = vadd.f32 %v5949_v15, %v4893_v36 }
 0x53e   : >> { %v4951_v17 = vmax.f32 %v4935_v35, 0.0 }
 0x53f   : >> { %4962 = vst.msk [vmem:[%s7827_s6 + $0x28] sm:$0xff] %vm4956_vm3, %v4944_v31  ;;  %v4954_v37 = vmax.f32 %v4938_v30, 0.0  ;;  %v4936_v23 = vadd.f32 %v4920_v22, %v4894_v19  ;;  %3106 = sbr.rel (!%p3104_p5) target bundleno = 750 (0x2ee), region = 108 }
 0x540   : >> { %4969 = vst.msk [vmem:[%s7827_s6 + $0x60] sm:$0xff] %vm4956_vm3, %v4951_v17 }
 0x541   : >> { %4972 = vst.msk [vmem:[%s7827_s6 + $0x78] sm:$0xff] %vm4956_vm3, %v4954_v37  ;;  %v4952_v39 = vmax.f32 %v4936_v23, 0.0 }
 0x543   : >> { %4970 = vst.msk [vmem:[%s7827_s6 + $0x68] sm:$0xff] %vm4956_vm3, %v4952_v39 }
 0x544 PF: > { %s15_s18 = sadd.s32 1, %s5732_s18  }
 0x545   : > { %p12_p6 = scmp.ge.s32.totalorder %s15_s18, 4  }
 0x547   :  { %14 = sbr.rel (!%p12_p6) target bundleno = 1 (0x1), region = 119 }

</bundles_post_ra>
